<compile_context>
chip_gen: v7x
topology: tpu7x:2x2x1
jax: 0.10.0
libtpu: 0.0.40
codegen_flags: <defaults>
</compile_context>

<pallas_src>
import functools

import jax
import jax.numpy as jnp
from jax.experimental import pallas as pl
from jax.experimental.pallas import tpu as pltpu


# ----------------------------- Pallas kernels ------------------------------- #

def _conv_pool_relu_kernel(p_ref, w_ref, b_ref, o_ref):
    """relu(max_pool2x2(conv2d(x) + b)) for one layer, fully fused.

    p_ref : (4, K, Mp) bf16  im2col patches; quarter q = 2*r + c holds the patch
            columns of conv-output pixels (n, 2*hh + r, 2*wh + c), so the 2x2
            pool is a 4-way max over the leading axis.
    w_ref : (Cout, K) bf16   torch conv weight reshaped (Cout, Cin*KH*KW).
    b_ref : (Cout, 1) f32
    o_ref : (Cout, Mp) bf16  channel-major pooled+ReLU output, Mp = N*Hh*Wh.
    """
    w = w_ref[...]
    # bias is constant across the 2x2 window, so max(conv_q) + b == pool(conv+b)
    acc = jnp.dot(w, p_ref[0], preferred_element_type=jnp.float32)
    for q in range(1, 4):
        acc = jnp.maximum(acc, jnp.dot(w, p_ref[q],
                                       preferred_element_type=jnp.float32))
    o_ref[...] = jnp.maximum(acc + b_ref[...], 0.0).astype(o_ref.dtype)


def _mlp_kernel(x_ref, w1_ref, b1_ref, w2_ref, b2_ref, o_ref):
    """fc1 + bias + ReLU + fc2 + bias fused (dropouts are identity in eval)."""
    h = jnp.dot(x_ref[...], w1_ref[...], preferred_element_type=jnp.float32)
    h = jnp.maximum(h + b1_ref[...], 0.0).astype(jnp.bfloat16)
    o_ref[...] = jnp.dot(h, w2_ref[...],
                         preferred_element_type=jnp.float32) + b2_ref[...]


# ------------------------------ Pallas wrappers ------------------------------ #

_VMEM = pl.BlockSpec(memory_space=pltpu.MemorySpace.VMEM)


def conv_pool_relu(x_cnhw, w2d, b, *, kernel, pad, stride):
    """One fused conv+pool+relu layer on a channel-major activation.

    x_cnhw : (Cin, N, H, W) bf16   ->  returns (Cout, N, Hh, Wh) bf16
    """
    Cin, N, H, W = x_cnhw.shape
    Cout, K = w2d.shape
    KH = KW = kernel
    Ho = (H + 2 * pad - KH) // stride + 1
    Wo = (W + 2 * pad - KW) // stride + 1
    assert Ho % 2 == 0 and Wo % 2 == 0, "fused 2x2 pool needs even conv output"
    Hh, Wh = Ho // 2, Wo // 2
    Mp = N * Hh * Wh

    xp = jnp.pad(x_cnhw, ((0, 0), (0, 0), (pad, pad), (pad, pad)))
    # im2col taps, feature order (Cin, KH, KW) == torch weight flatten order.
    taps = [xp[:, :, i:i + stride * Ho:stride, j:j + stride * Wo:stride]
            for i in range(KH) for j in range(KW)]
    p = jnp.stack(taps, axis=1).reshape(Cin * KH * KW, N, Hh, 2, Wh, 2)
    # reorder pixel axis to (r, c, n, hh, wh): quarter-major for the fused pool.
    p = p.transpose(3, 5, 0, 1, 2, 4).reshape(4, Cin * KH * KW, Mp)

    out = pl.pallas_call(
        _conv_pool_relu_kernel,
        out_shape=jax.ShapeDtypeStruct((Cout, Mp), jnp.bfloat16),
        in_specs=[_VMEM, _VMEM, _VMEM],
        out_specs=_VMEM,
    )(p, w2d, b.reshape(Cout, 1))
    return out.reshape(Cout, N, Hh, Wh)


def mlp(x, w1, b1, w2, b2):
    """(N, Din) bf16 -> fc1+ReLU+fc2 -> (N, num_classes) f32, one kernel."""
    N = x.shape[0]
    num_classes = w2.shape[1]
    return pl.pallas_call(
        _mlp_kernel,
        out_shape=jax.ShapeDtypeStruct((N, num_classes), jnp.float32),
        in_specs=[_VMEM] * 5,
        out_specs=_VMEM,
    )(x, w1, b1.reshape(1, -1), w2, b2.reshape(1, -1))


# ------------------------------- model forward ------------------------------- #

def convnet_model1_forward(kp, x_nchw, *, pad, kernel, stride):
    # cast once to bf16 and go channel-major (C, N, H, W) for the whole trunk
    x = x_nchw.transpose(1, 0, 2, 3).astype(jnp.bfloat16)
    for name in ("conv1", "conv2", "conv3", "conv4"):
        x = conv_pool_relu(x, kp[name + "_w"], kp[name + "_b"],
                           kernel=kernel, pad=pad, stride=stride)
    # drop1 (p=0.4): identity (eval).  Flatten to torch order (N, C*H*W); the
    # tensor here is only (128, N, 1, 2) so this transpose is negligible.
    C, N, Hh, Wh = x.shape
    feat = x.transpose(1, 0, 2, 3).reshape(N, C * Hh * Wh)
    # fc1 + relu + (drop2 identity) + fc2, fused
    return mlp(feat, kp["fc1_w"], kp["fc1_b"], kp["fc2_w"], kp["fc2_b"])


# ------------------------------- params -------------------------------------- #

def init_params(key, num_classes, kernel, h1):
    """Parameters in the PyTorch layouts (conv OIHW, linear (out, in))."""
    ks = jax.random.split(key, 12)
    chans = [(16, 3), (32, 16), (64, 32), (128, 64)]
    p = {}
    for idx, (co, ci) in enumerate(chans, start=1):
        p[f"conv{idx}_w"] = 0.05 * jax.random.normal(
            ks[2 * idx - 2], (co, ci, kernel, kernel), jnp.float32)
        p[f"conv{idx}_b"] = 0.05 * jax.random.normal(ks[2 * idx - 1], (co,), jnp.float32)
    p["fc1_w"] = 0.05 * jax.random.normal(ks[8], (h1, 256), jnp.float32)
    p["fc1_b"] = 0.05 * jax.random.normal(ks[9], (h1,), jnp.float32)
    p["fc2_w"] = 0.05 * jax.random.normal(ks[10], (num_classes, h1), jnp.float32)
    p["fc2_b"] = 0.05 * jax.random.normal(ks[11], (num_classes,), jnp.float32)
    return p


def prepare_params(p):
    """One-time repack outside the jitted forward: conv weights flattened to
    (Cout, Cin*KH*KW) bf16, fc weights pre-transposed to (in, out) bf16,
    biases kept f32 (epilogue stays f32)."""
    kp = {}
    for idx in range(1, 5):
        w = p[f"conv{idx}_w"]
        kp[f"conv{idx}_w"] = w.reshape(w.shape[0], -1).astype(jnp.bfloat16)
        kp[f"conv{idx}_b"] = p[f"conv{idx}_b"].astype(jnp.float32)
    kp["fc1_w"] = p["fc1_w"].T.astype(jnp.bfloat16)
    kp["fc1_b"] = p["fc1_b"].astype(jnp.float32)
    kp["fc2_w"] = p["fc2_w"].T.astype(jnp.bfloat16)
    kp["fc2_b"] = p["fc2_b"].astype(jnp.float32)
    return kp


if __name__ == "__main__":
    # Hyper-params: kernel=3, pad=1, stride=1 preserve spatial dims; four 2x2
    # pools take (16, 32) -> (1, 2), so the flatten is 128*1*2 = 256 = fc1 in.
    num_classes, pad, kernel, h1, stride = 10, 1, 3, 128, 1

    key = jax.random.PRNGKey(0)
    pkey, xkey = jax.random.split(key)
    params = init_params(pkey, num_classes, kernel, h1)
    kparams = prepare_params(params)
    x = jax.random.normal(xkey, (2, 3, 16, 32), jnp.float32)

    fwd = jax.jit(functools.partial(convnet_model1_forward,
                                    pad=pad, kernel=kernel, stride=stride))
    y = fwd(kparams, x)
    jax.block_until_ready(y)
    assert y.shape == (2, num_classes) and y.dtype == jnp.float32
    print("KERNEL_OK")
</pallas_src>

<mosaic_0001>
module attributes {stable_mosaic.version = 11 : i64} {
  func.func @_conv_pool_relu_kernel(%arg0: memref<4x27x256xbf16, #tpu.memory_space<vmem>>, %arg1: memref<16x27xbf16, #tpu.memory_space<vmem>>, %arg2: memref<16x1xf32, #tpu.memory_space<vmem>>, %arg3: memref<16x256xbf16, #tpu.memory_space<vmem>>) attributes {dimension_semantics = [], scalar_prefetch = 0 : i64, scratch_operands = 0 : i64, tpu.core_type = #tpu.core_type<tc>} {
    %c0 = arith.constant 0 : index
    %c0_0 = arith.constant 0 : index
    %0 = vector.load %arg1[%c0, %c0_0] : memref<16x27xbf16, #tpu.memory_space<vmem>>, vector<16x27xbf16>
    %c0_1 = arith.constant 0 : index
    %c0_2 = arith.constant 0 : index
    %c0_3 = arith.constant 0 : index
    %1 = vector.load %arg0[%c0_1, %c0_2, %c0_3] : memref<4x27x256xbf16, #tpu.memory_space<vmem>>, vector<1x27x256xbf16>
    %2 = vector.shape_cast %1 : vector<1x27x256xbf16> to vector<27x256xbf16>
    %cst = arith.constant dense<0.000000e+00> : vector<16x256xf32>
    %3 = tpu.matmul %0, %2, %cst {dimension_numbers = #tpu.dot_dimension_numbers<[1], [0], [0], [1], [0, 0, 1, 1], [], []>} : vector<16x27xbf16>, vector<27x256xbf16>, vector<16x256xf32> -> vector<16x256xf32>
    %c1 = arith.constant 1 : index
    %c0_4 = arith.constant 0 : index
    %c0_5 = arith.constant 0 : index
    %4 = vector.load %arg0[%c1, %c0_4, %c0_5] : memref<4x27x256xbf16, #tpu.memory_space<vmem>>, vector<1x27x256xbf16>
    %5 = vector.shape_cast %4 : vector<1x27x256xbf16> to vector<27x256xbf16>
    %cst_6 = arith.constant dense<0.000000e+00> : vector<16x256xf32>
    %6 = tpu.matmul %0, %5, %cst_6 {dimension_numbers = #tpu.dot_dimension_numbers<[1], [0], [0], [1], [0, 0, 1, 1], [], []>} : vector<16x27xbf16>, vector<27x256xbf16>, vector<16x256xf32> -> vector<16x256xf32>
    %7 = arith.maximumf %3, %6 : vector<16x256xf32>
    %c2 = arith.constant 2 : index
    %c0_7 = arith.constant 0 : index
    %c0_8 = arith.constant 0 : index
    %8 = vector.load %arg0[%c2, %c0_7, %c0_8] : memref<4x27x256xbf16, #tpu.memory_space<vmem>>, vector<1x27x256xbf16>
    %9 = vector.shape_cast %8 : vector<1x27x256xbf16> to vector<27x256xbf16>
    %cst_9 = arith.constant dense<0.000000e+00> : vector<16x256xf32>
    %10 = tpu.matmul %0, %9, %cst_9 {dimension_numbers = #tpu.dot_dimension_numbers<[1], [0], [0], [1], [0, 0, 1, 1], [], []>} : vector<16x27xbf16>, vector<27x256xbf16>, vector<16x256xf32> -> vector<16x256xf32>
    %11 = arith.maximumf %7, %10 : vector<16x256xf32>
    %c3 = arith.constant 3 : index
    %c0_10 = arith.constant 0 : index
    %c0_11 = arith.constant 0 : index
    %12 = vector.load %arg0[%c3, %c0_10, %c0_11] : memref<4x27x256xbf16, #tpu.memory_space<vmem>>, vector<1x27x256xbf16>
    %13 = vector.shape_cast %12 : vector<1x27x256xbf16> to vector<27x256xbf16>
    %cst_12 = arith.constant dense<0.000000e+00> : vector<16x256xf32>
    %14 = tpu.matmul %0, %13, %cst_12 {dimension_numbers = #tpu.dot_dimension_numbers<[1], [0], [0], [1], [0, 0, 1, 1], [], []>} : vector<16x27xbf16>, vector<27x256xbf16>, vector<16x256xf32> -> vector<16x256xf32>
    %15 = arith.maximumf %11, %14 : vector<16x256xf32>
    %c0_13 = arith.constant 0 : index
    %c0_14 = arith.constant 0 : index
    %16 = vector.load %arg2[%c0_13, %c0_14] : memref<16x1xf32, #tpu.memory_space<vmem>>, vector<16x1xf32>
    %17 = vector.broadcast %16 : vector<16x1xf32> to vector<16x256xf32>
    %18 = arith.addf %15, %17 : vector<16x256xf32>
    %cst_15 = arith.constant 0.000000e+00 : f32
    %19 = vector.broadcast %cst_15 : f32 to vector<16x256xf32>
    %20 = arith.maximumf %18, %19 : vector<16x256xf32>
    %21 = arith.truncf %20 : vector<16x256xf32> to vector<16x256xbf16>
    %c0_16 = arith.constant 0 : index
    %c0_17 = arith.constant 0 : index
    %22 = vector.load %arg3[%c0_16, %c0_17] : memref<16x256xbf16, #tpu.memory_space<vmem>>, vector<16x256xbf16>
    tpu.vector_store %arg3[%c0_16, %c0_17], %21 {strides = array<i32>} : memref<16x256xbf16, #tpu.memory_space<vmem>>, vector<16x256xbf16>,
    return
  }
}

module attributes {stable_mosaic.version = 11 : i64} {
  func.func @_conv_pool_relu_kernel(%arg0: memref<4x144x64xbf16, #tpu.memory_space<vmem>>, %arg1: memref<32x144xbf16, #tpu.memory_space<vmem>>, %arg2: memref<32x1xf32, #tpu.memory_space<vmem>>, %arg3: memref<32x64xbf16, #tpu.memory_space<vmem>>) attributes {dimension_semantics = [], scalar_prefetch = 0 : i64, scratch_operands = 0 : i64, tpu.core_type = #tpu.core_type<tc>} {
    %c0 = arith.constant 0 : index
    %c0_0 = arith.constant 0 : index
    %0 = vector.load %arg1[%c0, %c0_0] : memref<32x144xbf16, #tpu.memory_space<vmem>>, vector<32x144xbf16>
    %c0_1 = arith.constant 0 : index
    %c0_2 = arith.constant 0 : index
    %c0_3 = arith.constant 0 : index
    %1 = vector.load %arg0[%c0_1, %c0_2, %c0_3] : memref<4x144x64xbf16, #tpu.memory_space<vmem>>, vector<1x144x64xbf16>
    %2 = vector.shape_cast %1 : vector<1x144x64xbf16> to vector<144x64xbf16>
    %cst = arith.constant dense<0.000000e+00> : vector<32x64xf32>
    %3 = tpu.matmul %0, %2, %cst {dimension_numbers = #tpu.dot_dimension_numbers<[1], [0], [0], [1], [0, 0, 1, 1], [], []>} : vector<32x144xbf16>, vector<144x64xbf16>, vector<32x64xf32> -> vector<32x64xf32>
    %c1 = arith.constant 1 : index
    %c0_4 = arith.constant 0 : index
    %c0_5 = arith.constant 0 : index
    %4 = vector.load %arg0[%c1, %c0_4, %c0_5] : memref<4x144x64xbf16, #tpu.memory_space<vmem>>, vector<1x144x64xbf16>
    %5 = vector.shape_cast %4 : vector<1x144x64xbf16> to vector<144x64xbf16>
    %cst_6 = arith.constant dense<0.000000e+00> : vector<32x64xf32>
    %6 = tpu.matmul %0, %5, %cst_6 {dimension_numbers = #tpu.dot_dimension_numbers<[1], [0], [0], [1], [0, 0, 1, 1], [], []>} : vector<32x144xbf16>, vector<144x64xbf16>, vector<32x64xf32> -> vector<32x64xf32>
    %7 = arith.maximumf %3, %6 : vector<32x64xf32>
    %c2 = arith.constant 2 : index
    %c0_7 = arith.constant 0 : index
    %c0_8 = arith.constant 0 : index
    %8 = vector.load %arg0[%c2, %c0_7, %c0_8] : memref<4x144x64xbf16, #tpu.memory_space<vmem>>, vector<1x144x64xbf16>
    %9 = vector.shape_cast %8 : vector<1x144x64xbf16> to vector<144x64xbf16>
    %cst_9 = arith.constant dense<0.000000e+00> : vector<32x64xf32>
    %10 = tpu.matmul %0, %9, %cst_9 {dimension_numbers = #tpu.dot_dimension_numbers<[1], [0], [0], [1], [0, 0, 1, 1], [], []>} : vector<32x144xbf16>, vector<144x64xbf16>, vector<32x64xf32> -> vector<32x64xf32>
    %11 = arith.maximumf %7, %10 : vector<32x64xf32>
    %c3 = arith.constant 3 : index
    %c0_10 = arith.constant 0 : index
    %c0_11 = arith.constant 0 : index
    %12 = vector.load %arg0[%c3, %c0_10, %c0_11] : memref<4x144x64xbf16, #tpu.memory_space<vmem>>, vector<1x144x64xbf16>
    %13 = vector.shape_cast %12 : vector<1x144x64xbf16> to vector<144x64xbf16>
    %cst_12 = arith.constant dense<0.000000e+00> : vector<32x64xf32>
    %14 = tpu.matmul %0, %13, %cst_12 {dimension_numbers = #tpu.dot_dimension_numbers<[1], [0], [0], [1], [0, 0, 1, 1], [], []>} : vector<32x144xbf16>, vector<144x64xbf16>, vector<32x64xf32> -> vector<32x64xf32>
    %15 = arith.maximumf %11, %14 : vector<32x64xf32>
    %c0_13 = arith.constant 0 : index
    %c0_14 = arith.constant 0 : index
    %16 = vector.load %arg2[%c0_13, %c0_14] : memref<32x1xf32, #tpu.memory_space<vmem>>, vector<32x1xf32>
    %17 = vector.broadcast %16 : vector<32x1xf32> to vector<32x64xf32>
    %18 = arith.addf %15, %17 : vector<32x64xf32>
    %cst_15 = arith.constant 0.000000e+00 : f32
    %19 = vector.broadcast %cst_15 : f32 to vector<32x64xf32>
    %20 = arith.maximumf %18, %19 : vector<32x64xf32>
    %21 = arith.truncf %20 : vector<32x64xf32> to vector<32x64xbf16>
    %c0_16 = arith.constant 0 : index
    %c0_17 = arith.constant 0 : index
    %22 = vector.load %arg3[%c0_16, %c0_17] : memref<32x64xbf16, #tpu.memory_space<vmem>>, vector<32x64xbf16>
    tpu.vector_store %arg3[%c0_16, %c0_17], %21 {strides = array<i32>} : memref<32x64xbf16, #tpu.memory_space<vmem>>, vector<32x64xbf16>,
    return
  }
}

module attributes {stable_mosaic.version = 11 : i64} {
  func.func @_conv_pool_relu_kernel(%arg0: memref<4x288x16xbf16, #tpu.memory_space<vmem>>, %arg1: memref<64x288xbf16, #tpu.memory_space<vmem>>, %arg2: memref<64x1xf32, #tpu.memory_space<vmem>>, %arg3: memref<64x16xbf16, #tpu.memory_space<vmem>>) attributes {dimension_semantics = [], scalar_prefetch = 0 : i64, scratch_operands = 0 : i64, tpu.core_type = #tpu.core_type<tc>} {
    %c0 = arith.constant 0 : index
    %c0_0 = arith.constant 0 : index
    %0 = vector.load %arg1[%c0, %c0_0] : memref<64x288xbf16, #tpu.memory_space<vmem>>, vector<64x288xbf16>
    %c0_1 = arith.constant 0 : index
    %c0_2 = arith.constant 0 : index
    %c0_3 = arith.constant 0 : index
    %1 = vector.load %arg0[%c0_1, %c0_2, %c0_3] : memref<4x288x16xbf16, #tpu.memory_space<vmem>>, vector<1x288x16xbf16>
    %2 = vector.shape_cast %1 : vector<1x288x16xbf16> to vector<288x16xbf16>
    %cst = arith.constant dense<0.000000e+00> : vector<64x16xf32>
    %3 = tpu.matmul %0, %2, %cst {dimension_numbers = #tpu.dot_dimension_numbers<[1], [0], [0], [1], [0, 0, 1, 1], [], []>} : vector<64x288xbf16>, vector<288x16xbf16>, vector<64x16xf32> -> vector<64x16xf32>
    %c1 = arith.constant 1 : index
    %c0_4 = arith.constant 0 : index
    %c0_5 = arith.constant 0 : index
    %4 = vector.load %arg0[%c1, %c0_4, %c0_5] : memref<4x288x16xbf16, #tpu.memory_space<vmem>>, vector<1x288x16xbf16>
    %5 = vector.shape_cast %4 : vector<1x288x16xbf16> to vector<288x16xbf16>
    %cst_6 = arith.constant dense<0.000000e+00> : vector<64x16xf32>
    %6 = tpu.matmul %0, %5, %cst_6 {dimension_numbers = #tpu.dot_dimension_numbers<[1], [0], [0], [1], [0, 0, 1, 1], [], []>} : vector<64x288xbf16>, vector<288x16xbf16>, vector<64x16xf32> -> vector<64x16xf32>
    %7 = arith.maximumf %3, %6 : vector<64x16xf32>
    %c2 = arith.constant 2 : index
    %c0_7 = arith.constant 0 : index
    %c0_8 = arith.constant 0 : index
    %8 = vector.load %arg0[%c2, %c0_7, %c0_8] : memref<4x288x16xbf16, #tpu.memory_space<vmem>>, vector<1x288x16xbf16>
    %9 = vector.shape_cast %8 : vector<1x288x16xbf16> to vector<288x16xbf16>
    %cst_9 = arith.constant dense<0.000000e+00> : vector<64x16xf32>
    %10 = tpu.matmul %0, %9, %cst_9 {dimension_numbers = #tpu.dot_dimension_numbers<[1], [0], [0], [1], [0, 0, 1, 1], [], []>} : vector<64x288xbf16>, vector<288x16xbf16>, vector<64x16xf32> -> vector<64x16xf32>
    %11 = arith.maximumf %7, %10 : vector<64x16xf32>
    %c3 = arith.constant 3 : index
    %c0_10 = arith.constant 0 : index
    %c0_11 = arith.constant 0 : index
    %12 = vector.load %arg0[%c3, %c0_10, %c0_11] : memref<4x288x16xbf16, #tpu.memory_space<vmem>>, vector<1x288x16xbf16>
    %13 = vector.shape_cast %12 : vector<1x288x16xbf16> to vector<288x16xbf16>
    %cst_12 = arith.constant dense<0.000000e+00> : vector<64x16xf32>
    %14 = tpu.matmul %0, %13, %cst_12 {dimension_numbers = #tpu.dot_dimension_numbers<[1], [0], [0], [1], [0, 0, 1, 1], [], []>} : vector<64x288xbf16>, vector<288x16xbf16>, vector<64x16xf32> -> vector<64x16xf32>
    %15 = arith.maximumf %11, %14 : vector<64x16xf32>
    %c0_13 = arith.constant 0 : index
    %c0_14 = arith.constant 0 : index
    %16 = vector.load %arg2[%c0_13, %c0_14] : memref<64x1xf32, #tpu.memory_space<vmem>>, vector<64x1xf32>
    %17 = vector.broadcast %16 : vector<64x1xf32> to vector<64x16xf32>
    %18 = arith.addf %15, %17 : vector<64x16xf32>
    %cst_15 = arith.constant 0.000000e+00 : f32
    %19 = vector.broadcast %cst_15 : f32 to vector<64x16xf32>
    %20 = arith.maximumf %18, %19 : vector<64x16xf32>
    %21 = arith.truncf %20 : vector<64x16xf32> to vector<64x16xbf16>
    %c0_16 = arith.constant 0 : index
    %c0_17 = arith.constant 0 : index
    %22 = vector.load %arg3[%c0_16, %c0_17] : memref<64x16xbf16, #tpu.memory_space<vmem>>, vector<64x16xbf16>
    tpu.vector_store %arg3[%c0_16, %c0_17], %21 {strides = array<i32>} : memref<64x16xbf16, #tpu.memory_space<vmem>>, vector<64x16xbf16>,
    return
  }
}

module attributes {stable_mosaic.version = 11 : i64} {
  func.func @_conv_pool_relu_kernel(%arg0: memref<4x576x4xbf16, #tpu.memory_space<vmem>>, %arg1: memref<128x576xbf16, #tpu.memory_space<vmem>>, %arg2: memref<128x1xf32, #tpu.memory_space<vmem>>, %arg3: memref<128x4xbf16, #tpu.memory_space<vmem>>) attributes {dimension_semantics = [], scalar_prefetch = 0 : i64, scratch_operands = 0 : i64, tpu.core_type = #tpu.core_type<tc>} {
    %c0 = arith.constant 0 : index
    %c0_0 = arith.constant 0 : index
    %0 = vector.load %arg1[%c0, %c0_0] : memref<128x576xbf16, #tpu.memory_space<vmem>>, vector<128x576xbf16>
    %c0_1 = arith.constant 0 : index
    %c0_2 = arith.constant 0 : index
    %c0_3 = arith.constant 0 : index
    %1 = vector.load %arg0[%c0_1, %c0_2, %c0_3] : memref<4x576x4xbf16, #tpu.memory_space<vmem>>, vector<1x576x4xbf16>
    %2 = vector.shape_cast %1 : vector<1x576x4xbf16> to vector<576x4xbf16>
    %cst = arith.constant dense<0.000000e+00> : vector<128x4xf32>
    %3 = tpu.matmul %0, %2, %cst {dimension_numbers = #tpu.dot_dimension_numbers<[1], [0], [0], [1], [0, 0, 1, 1], [], []>} : vector<128x576xbf16>, vector<576x4xbf16>, vector<128x4xf32> -> vector<128x4xf32>
    %c1 = arith.constant 1 : index
    %c0_4 = arith.constant 0 : index
    %c0_5 = arith.constant 0 : index
    %4 = vector.load %arg0[%c1, %c0_4, %c0_5] : memref<4x576x4xbf16, #tpu.memory_space<vmem>>, vector<1x576x4xbf16>
    %5 = vector.shape_cast %4 : vector<1x576x4xbf16> to vector<576x4xbf16>
    %cst_6 = arith.constant dense<0.000000e+00> : vector<128x4xf32>
    %6 = tpu.matmul %0, %5, %cst_6 {dimension_numbers = #tpu.dot_dimension_numbers<[1], [0], [0], [1], [0, 0, 1, 1], [], []>} : vector<128x576xbf16>, vector<576x4xbf16>, vector<128x4xf32> -> vector<128x4xf32>
    %7 = arith.maximumf %3, %6 : vector<128x4xf32>
    %c2 = arith.constant 2 : index
    %c0_7 = arith.constant 0 : index
    %c0_8 = arith.constant 0 : index
    %8 = vector.load %arg0[%c2, %c0_7, %c0_8] : memref<4x576x4xbf16, #tpu.memory_space<vmem>>, vector<1x576x4xbf16>
    %9 = vector.shape_cast %8 : vector<1x576x4xbf16> to vector<576x4xbf16>
    %cst_9 = arith.constant dense<0.000000e+00> : vector<128x4xf32>
    %10 = tpu.matmul %0, %9, %cst_9 {dimension_numbers = #tpu.dot_dimension_numbers<[1], [0], [0], [1], [0, 0, 1, 1], [], []>} : vector<128x576xbf16>, vector<576x4xbf16>, vector<128x4xf32> -> vector<128x4xf32>
    %11 = arith.maximumf %7, %10 : vector<128x4xf32>
    %c3 = arith.constant 3 : index
    %c0_10 = arith.constant 0 : index
    %c0_11 = arith.constant 0 : index
    %12 = vector.load %arg0[%c3, %c0_10, %c0_11] : memref<4x576x4xbf16, #tpu.memory_space<vmem>>, vector<1x576x4xbf16>
    %13 = vector.shape_cast %12 : vector<1x576x4xbf16> to vector<576x4xbf16>
    %cst_12 = arith.constant dense<0.000000e+00> : vector<128x4xf32>
    %14 = tpu.matmul %0, %13, %cst_12 {dimension_numbers = #tpu.dot_dimension_numbers<[1], [0], [0], [1], [0, 0, 1, 1], [], []>} : vector<128x576xbf16>, vector<576x4xbf16>, vector<128x4xf32> -> vector<128x4xf32>
    %15 = arith.maximumf %11, %14 : vector<128x4xf32>
    %c0_13 = arith.constant 0 : index
    %c0_14 = arith.constant 0 : index
    %16 = vector.load %arg2[%c0_13, %c0_14] : memref<128x1xf32, #tpu.memory_space<vmem>>, vector<128x1xf32>
    %17 = vector.broadcast %16 : vector<128x1xf32> to vector<128x4xf32>
    %18 = arith.addf %15, %17 : vector<128x4xf32>
    %cst_15 = arith.constant 0.000000e+00 : f32
    %19 = vector.broadcast %cst_15 : f32 to vector<128x4xf32>
    %20 = arith.maximumf %18, %19 : vector<128x4xf32>
    %21 = arith.truncf %20 : vector<128x4xf32> to vector<128x4xbf16>
    %c0_16 = arith.constant 0 : index
    %c0_17 = arith.constant 0 : index
    %22 = vector.load %arg3[%c0_16, %c0_17] : memref<128x4xbf16, #tpu.memory_space<vmem>>, vector<128x4xbf16>
    tpu.vector_store %arg3[%c0_16, %c0_17], %21 {strides = array<i32>} : memref<128x4xbf16, #tpu.memory_space<vmem>>, vector<128x4xbf16>,
    return
  }
}

module attributes {stable_mosaic.version = 11 : i64} {
  func.func @_mlp_kernel(%arg0: memref<2x256xbf16, #tpu.memory_space<vmem>>, %arg1: memref<256x128xbf16, #tpu.memory_space<vmem>>, %arg2: memref<1x128xf32, #tpu.memory_space<vmem>>, %arg3: memref<128x10xbf16, #tpu.memory_space<vmem>>, %arg4: memref<1x10xf32, #tpu.memory_space<vmem>>, %arg5: memref<2x10xf32, #tpu.memory_space<vmem>>) attributes {dimension_semantics = [], scalar_prefetch = 0 : i64, scratch_operands = 0 : i64, tpu.core_type = #tpu.core_type<tc>} {
    %c0 = arith.constant 0 : index
    %c0_0 = arith.constant 0 : index
    %0 = vector.load %arg0[%c0, %c0_0] : memref<2x256xbf16, #tpu.memory_space<vmem>>, vector<2x256xbf16>
    %c0_1 = arith.constant 0 : index
    %c0_2 = arith.constant 0 : index
    %1 = vector.load %arg1[%c0_1, %c0_2] : memref<256x128xbf16, #tpu.memory_space<vmem>>, vector<256x128xbf16>
    %cst = arith.constant dense<0.000000e+00> : vector<2x128xf32>
    %2 = tpu.matmul %0, %1, %cst {dimension_numbers = #tpu.dot_dimension_numbers<[1], [0], [0], [1], [0, 0, 1, 1], [], []>} : vector<2x256xbf16>, vector<256x128xbf16>, vector<2x128xf32> -> vector<2x128xf32>
    %c0_3 = arith.constant 0 : index
    %c0_4 = arith.constant 0 : index
    %3 = vector.load %arg2[%c0_3, %c0_4] : memref<1x128xf32, #tpu.memory_space<vmem>>, vector<1x128xf32>
    %4 = vector.broadcast %3 : vector<1x128xf32> to vector<2x128xf32>
    %5 = arith.addf %2, %4 : vector<2x128xf32>
    %cst_5 = arith.constant 0.000000e+00 : f32
    %6 = vector.broadcast %cst_5 : f32 to vector<2x128xf32>
    %7 = arith.maximumf %5, %6 : vector<2x128xf32>
    %8 = arith.truncf %7 : vector<2x128xf32> to vector<2x128xbf16>
    %c0_6 = arith.constant 0 : index
    %c0_7 = arith.constant 0 : index
    %9 = vector.load %arg3[%c0_6, %c0_7] : memref<128x10xbf16, #tpu.memory_space<vmem>>, vector<128x10xbf16>
    %cst_8 = arith.constant dense<0.000000e+00> : vector<2x10xf32>
    %10 = tpu.matmul %8, %9, %cst_8 {dimension_numbers = #tpu.dot_dimension_numbers<[1], [0], [0], [1], [0, 0, 1, 1], [], []>} : vector<2x128xbf16>, vector<128x10xbf16>, vector<2x10xf32> -> vector<2x10xf32>
    %c0_9 = arith.constant 0 : index
    %c0_10 = arith.constant 0 : index
    %11 = vector.load %arg4[%c0_9, %c0_10] : memref<1x10xf32, #tpu.memory_space<vmem>>, vector<1x10xf32>
    %12 = vector.broadcast %11 : vector<1x10xf32> to vector<2x10xf32>
    %13 = arith.addf %10, %12 : vector<2x10xf32>
    %c0_11 = arith.constant 0 : index
    %c0_12 = arith.constant 0 : index
    %14 = vector.load %arg5[%c0_11, %c0_12] : memref<2x10xf32, #tpu.memory_space<vmem>>, vector<2x10xf32>
    tpu.vector_store %arg5[%c0_11, %c0_12], %13 {strides = array<i32>} : memref<2x10xf32, #tpu.memory_space<vmem>>, vector<2x10xf32>,
    return
  }
}

</mosaic_0001>

<bundles_post_ra>
// kernel: convnet_model1_forward.5
= control target key start
LH: loop header
LB: loop body
LE: loop exit
PB: predicated region body
PF: predicated region fallthrough
CT: control target
= control target key end

     0   :  { %vm48_vm0 = vcmask 1044480   ;;  %vm49_vm1 = vcmask 1045504   ;;  %v432_v1 = vmov 65535   ;;  %v433_v3 = vmov 0   ;;  %s521_s0 = inlined_call_operand.vmem [shape: bf16[4,27,256], index: 0, kind: input, shape index: {}]   ;;  %s522_s1 = inlined_call_operand.vmem [shape: bf16[16,27], index: 1, kind: input, shape index: {}]   ;;  %s523_s2 = inlined_call_operand.vmem [shape: f32[16,1], index: 2, kind: input, shape index: {}]   ;;  %s524_s3 = inlined_call_operand.vmem [shape: bf16[16,256], index: 3, kind: output, shape index: {}]  }
   0x1   :  { %v407_v0 = vld [vmem:[%s521_s0 + $0x4] ss:$8 sps:$4 sm:$0xff]   ;;  %v50_v2 = vsel %vm48_vm0, 4294967295, %v432_v1  ;;  %90 = vmatprep.mubr.bf16.mxu0 %v433_v3  ;;  %162 = vmatprep.mubr.bf16.mxu1 %v433_v3  ;;  %v411_v5 = vld [vmem:[%s521_s0] ss:$8 sps:$4 sm:$0xff]   ;;  %vm44_vm2 = vcmask 220160  }
   0x2   :  { %v409_v4 = vld [vmem:[%s521_s0 + $0x24] ss:$8 sps:$4 sm:$0xff]   ;;  %406 = vset.pattern.permute.xlu0 %v433_v3  ;;  %58 = vmatprep.subr.bf16.mxu0 %v407_v0  ;;  %v412_v6 = vld [vmem:[%s521_s0 + $0x20] ss:$8 sps:$4 sm:$0xff]   ;;  %v51_v7 = vsel %vm49_vm1, %v50_v2, 0 }
   0x3   :  { %130 = vmatprep.subr.bf16.mxu1 %v409_v4  ;;  %v413_v8 = vld [vmem:[%s521_s0 + $0x14] ss:$8 sps:$4 sm:$0x3f]   ;;  %59 = vmatpush1.bf16.msra.mxu0 %v411_v5  ;;  %v417_v11 = vld [vmem:[%s521_s0 + $0x10] ss:$8 sps:$4 sm:$0x3f]  }
   0x4   :  { %131 = vmatpush1.bf16.msra.mxu1 %v412_v6  ;;  %v415_v9 = vld [vmem:[%s521_s0 + $0x34] ss:$8 sps:$4 sm:$0x3f]   ;;  %v56_v10 = vand.u32 %v413_v8, %v51_v7  ;;  %v418_v12 = vld [vmem:[%s521_s0 + $0x30] ss:$8 sps:$4 sm:$0x3f]   ;;  %v53_v15 = vand.u32 %v417_v11, %v51_v7 }
   0x5   :  { %v128_v13 = vand.u32 %v415_v9, %v51_v7  ;;  %v419_v14 = vld [vmem:[%s522_s1] sm:$0xff]   ;;  %v125_v16 = vand.u32 %v418_v12, %v51_v7  ;;  %v426_v21 = vld [vmem:[%s521_s0 + $0x50] ss:$8 sps:$4 sm:$0x3f]   ;;  %v330_v30 = vld [vmem:[%s523_s2 + $0x8] sm:$0xff] }
   0x6   :  { %60 = vmatprep.subr.bf16.mxu0 %v56_v10  ;;  %v420_v17 = vld [vmem:[%s521_s0 + $0x40] ss:$8 sps:$4 sm:$0xff]   ;;  %v422_v18 = vld [vmem:[%s521_s0 + $0x44] ss:$8 sps:$4 sm:$0xff]   ;;  %v201_v27 = vand.u32 %v426_v21, %v51_v7 }
   0x7   :  { %132 = vmatprep.subr.bf16.mxu1 %v128_v13  ;;  %v423_v19 = vld [vmem:[%s521_s0 + $0x60] ss:$8 sps:$4 sm:$0xff]   ;;  %61 = vmatpush1.bf16.msra.mxu0 %v53_v15  ;;  %v425_v20 = vld [vmem:[%s521_s0 + $0x64] ss:$8 sps:$4 sm:$0xff]  }
   0x8   :  { %133 = vmatpush1.bf16.msra.mxu1 %v125_v16  ;;  %206 = vmatprep.subr.bf16.mxu0 %v422_v18  ;;  %v428_v22 = vld [vmem:[%s521_s0 + $0x54] ss:$8 sps:$4 sm:$0x3f]   ;;  %v429_v23 = vld [vmem:[%s521_s0 + $0x70] ss:$8 sps:$4 sm:$0x3f]  }
   0x9   :  { %282 = vmatprep.subr.bf16.mxu1 %v425_v20  ;;  %v204_v24 = vand.u32 %v428_v22, %v51_v7  ;;  %v431_v25 = vld [vmem:[%s521_s0 + $0x74] ss:$8 sps:$4 sm:$0x3f]   ;;  %v329_v26 = vld [vmem:[%s523_s2] sm:$0xff]  ;;  %v277_v28 = vand.u32 %v429_v23, %v51_v7 }
   0xa   :  { %372 = vmatmul.mubr.msk.bf16.vlgmr.msra.gmra.mrb[0].mxu0 %vm44_vm2, %v419_v14  ;;  %v280_v29 = vand.u32 %v431_v25, %v51_v7  ;;  %333 = vperm.xlu0 %406, %v329_v26  }
   0xb   :  { %381 = vmatmul.mubr.msk.bf16.vlgmr.msra.gmra.mrb[0].mxu1 %vm44_vm2, %v419_v14  ;;  %207 = vmatpush1.bf16.msra.mxu0 %v420_v17 }
   0xc   :  { %283 = vmatpush1.bf16.msra.mxu1 %v423_v19  ;;  %208 = vmatprep.subr.bf16.mxu0 %v204_v24 }
   0xd   :  { %238 = vmatprep.mubr.bf16.mxu0 %v433_v3  ;;  %314 = vmatprep.mubr.bf16.mxu1 %v433_v3 }
   0xe   :  { %284 = vmatprep.subr.bf16.mxu1 %v280_v29  ;;  %338 = vperm.xlu0 %406, %v330_v30  }
   0xf   :  { %209 = vmatpush1.bf16.msra.mxu0 %v201_v27 }
  0x10   :  { %285 = vmatpush1.bf16.msra.mxu1 %v277_v28 }
  0x12   :  { %390 = vmatmul.mubr.msk.bf16.vlgmr.msra.gmra.mrb[4].mxu0 %vm44_vm2, %v419_v14 }
  0x13   :  { %399 = vmatmul.mubr.msk.bf16.vlgmr.msra.gmra.mrb[4].mxu1 %vm44_vm2, %v419_v14 }
  0x89   :  { %v334_v43 = vpop.permute.xlu0 %333 }
  0x8d   :  { %v339_v62 = vpop.permute.xlu0 %338 }
  0xdd   :  { %v92_v31 = vpop.f32.mrb[0].mxu0 }
  0xde   :  { %v164_v32 = vpop.f32.mrb[0].mxu1  ;;  %v94_v34 = vpop.f32.mrb[1].mxu0 }
  0xdf   :  { %v173_v33 = vmax.f32 %v92_v31, %v164_v32  ;;  %v166_v35 = vpop.f32.mrb[1].mxu1  ;;  %v96_v37 = vpop.f32.mrb[2].mxu0 }
  0xe0   :  { %v174_v36 = vmax.f32 %v94_v34, %v166_v35  ;;  %v168_v38 = vpop.f32.mrb[2].mxu1  ;;  %v98_v40 = vpop.f32.mrb[3].mxu0 }
  0xe1   :  { %v175_v39 = vmax.f32 %v96_v37, %v168_v38  ;;  %v170_v41 = vpop.f32.mrb[3].mxu1 }
  0xe2   :  { %v176_v42 = vmax.f32 %v98_v40, %v170_v41 }
  0xe5   :  { %v240_v44 = vpop.f32.mrb[4].mxu0 }
  0xe6   :  { %v316_v45 = vpop.f32.mrb[4].mxu1  ;;  %v249_v46 = vmax.f32 %v173_v33, %v240_v44  ;;  %v242_v47 = vpop.f32.mrb[5].mxu0 }
  0xe7   :  { %v318_v48 = vpop.f32.mrb[5].mxu1  ;;  %v250_v49 = vmax.f32 %v174_v36, %v242_v47  ;;  %v244_v50 = vpop.f32.mrb[6].mxu0 }
  0xe8   :  { %v320_v51 = vpop.f32.mrb[6].mxu1  ;;  %v325_v52 = vmax.f32 %v249_v46, %v316_v45  ;;  %v251_v53 = vmax.f32 %v175_v39, %v244_v50  ;;  %v246_v54 = vpop.f32.mrb[7].mxu0 }
  0xe9   :  { %v322_v55 = vpop.f32.mrb[7].mxu1  ;;  %v326_v56 = vmax.f32 %v250_v49, %v318_v48  ;;  %v252_v57 = vmax.f32 %v176_v42, %v246_v54 }
  0xea   :  { %v341_v58 = vadd.f32 %v334_v43, %v325_v52  ;;  %v327_v59 = vmax.f32 %v251_v53, %v320_v51 }
  0xeb   :  { %v342_v60 = vadd.f32 %v334_v43, %v326_v56  ;;  %v328_v61 = vmax.f32 %v252_v57, %v322_v55 }
  0xec   :  { %v345_v63 = vmax.f32 %v341_v58, 0.0  ;;  %v343_v0 = vadd.f32 %v339_v62, %v327_v59 }
  0xed   :  { %v346_v1 = vmax.f32 %v342_v60, 0.0  ;;  %v344_v2 = vadd.f32 %v339_v62, %v328_v61 }
  0xee   :  { %v347_v3 = vmax.f32 %v343_v0, 0.0 }
  0xef   :  { %v402_v4 = vpack.c.bf16 %v346_v1, %v345_v63  ;;  %v348_v5 = vmax.f32 %v344_v2, 0.0 }
  0xf1   :  { %v403_v6 = vpack.c.bf16 %v348_v5, %v347_v3  ;;  %361 = vst [vmem:[%s524_s3] sm:$0xff] %v402_v4 }
  0xf3   :  { %362 = vst [vmem:[%s524_s3 + $0x8] sm:$0xff] %v403_v6 }

// kernel: convnet_model1_forward.6
= control target key start
LH: loop header
LB: loop body
LE: loop exit
PB: predicated region body
PF: predicated region fallthrough
CT: control target
= control target key end

     0   :  { %v755_v0 = vmov 0   ;;  %vm109_vm0 = vcmask 130048   ;;  %vm591_vm1 = vcmask 519168   ;;  %s988_s0 = inlined_call_operand.vmem [shape: bf16[4,144,64], index: 0, kind: input, shape index: {}]   ;;  %s989_s1 = inlined_call_operand.vmem [shape: bf16[32,144], index: 1, kind: input, shape index: {}]   ;;  %s990_s2 = inlined_call_operand.vmem [shape: f32[32,1], index: 2, kind: input, shape index: {}]   ;;  %s991_s3 = inlined_call_operand.vmem [shape: bf16[32,64], index: 3, kind: output, shape index: {}]  }
   0x1   :  { %116 = vmatprep.subr.bf16.mxu0 %v755_v0  ;;  %238 = vmatprep.subr.bf16.mxu1 %v755_v0  ;;  %v713_v1 = vld [vmem:[%s988_s0] sm:$0xff]   ;;  %v714_v2 = vld [vmem:[%s988_s0 + $0x48] sm:$0xff]   ;;  %v716_v4 = vld [vmem:[%s988_s0 + $0x50] sm:$0xff]  }
   0x2   :  { %711 = vset.pattern.permute.xlu0 %v755_v0  ;;  %712 = vset.pattern.permute.xlu1 %v755_v0  ;;  %v715_v3 = vld [vmem:[%s988_s0 + $0x8] sm:$0xff]   ;;  %v717_v5 = vld [vmem:[%s988_s0 + $0x10] sm:$0xff]   ;;  %v718_v6 = vld [vmem:[%s988_s0 + $0x58] sm:$0xff]  }
   0x3   :  { %117 = vmatpush1.bf16.msra.mxu0 %v713_v1  ;;  %239 = vmatpush1.bf16.msra.mxu1 %v714_v2  ;;  %v719_v7 = vld [vmem:[%s988_s0 + $0x18] sm:$0xff]   ;;  %v720_v8 = vld [vmem:[%s988_s0 + $0x60] sm:$0xff]   ;;  %v722_v10 = vld [vmem:[%s988_s0 + $0x68] sm:$0xff]  }
   0x4   :  { %118 = vmatprep.subr.bf16.mxu0 %v755_v0  ;;  %240 = vmatprep.subr.bf16.mxu1 %v755_v0  ;;  %v721_v9 = vld [vmem:[%s988_s0 + $0x20] sm:$0xff]   ;;  %v723_v11 = vld [vmem:[%s988_s0 + $0x28] sm:$0xff]   ;;  %v724_v13 = vld [vmem:[%s988_s0 + $0x70] sm:$0xff]  }
   0x5   :  { %v824_v12 = vld [vmem:[%s989_s1 + $0x4] ss:$8 sps:$4 sm:$0xff]   ;;  %v725_v14 = vld [vmem:[%s988_s0 + $0x30] sm:$0xff]   ;;  %v726_v15 = vld [vmem:[%s988_s0 + $0x78] sm:$0xff]  }
   0x6   :  { %613 = vmatprep.mubr.msk.bf16.mxu0 %vm109_vm0, %v824_v12  ;;  %642 = vmatprep.mubr.msk.bf16.mxu1 %vm109_vm0, %v824_v12  ;;  %v727_v16 = vld [vmem:[%s988_s0 + $0x38] sm:$0xff]   ;;  %v728_v17 = vld [vmem:[%s988_s0 + $0x80] sm:$0xff]   ;;  %v730_v19 = vld [vmem:[%s988_s0 + $0x88] sm:$0xff]  }
   0x7   :  { %119 = vmatpush1.bf16.msra.mxu0 %v715_v3  ;;  %241 = vmatpush1.bf16.msra.mxu1 %v716_v4  ;;  %v729_v18 = vld [vmem:[%s988_s0 + $0x40] sm:$0xff]   ;;  %v734_v21 = vld [vmem:[%s988_s0 + $0x90] sm:$0xff]   ;;  %v735_v22 = vld [vmem:[%s988_s0 + $0xd8] sm:$0xff]  }
   0x8   :  { %120 = vmatprep.subr.bf16.mxu0 %v755_v0  ;;  %242 = vmatprep.subr.bf16.mxu1 %v755_v0  ;;  %v862_v20 = vld [vmem:[%s989_s1] ss:$8 sps:$4 sm:$0xff]   ;;  %v875_v23 = vld [vmem:[%s989_s1 + $0x14] ss:$8 sps:$4 sm:$0xff]   ;;  %v748_v28 = vld [vmem:[%s989_s1 + $0x10] ss:$8 sps:$4 sm:$0xff]  }
   0x9   :  { %v736_v24 = vld [vmem:[%s988_s0 + $0x98] sm:$0xff]   ;;  %v543_v25 = vld [vmem:[%s990_s2] sm:$0xff]  ;;  %v545_v27 = vld [vmem:[%s990_s2 + $0x10] sm:$0xff] }
   0xa   :  { %v737_v26 = vld [vmem:[%s988_s0 + $0xe0] sm:$0xff]   ;;  %549 = vperm.xlu0 %711, %v543_v25   ;;  %559 = vperm.xlu1 %712, %v545_v27   ;;  %v544_v30 = vld [vmem:[%s990_s2 + $0x8] sm:$0xff]  ;;  %v546_v33 = vld [vmem:[%s990_s2 + $0x18] sm:$0xff] }
   0xb   :  { %121 = vmatpush1.bf16.msra.mxu0 %v717_v5  ;;  %243 = vmatpush1.bf16.msra.mxu1 %v718_v6  ;;  %v738_v29 = vld [vmem:[%s988_s0 + $0xa0] sm:$0xff]   ;;  %v739_v31 = vld [vmem:[%s988_s0 + $0xe8] sm:$0xff]   ;;  %v741_v34 = vld [vmem:[%s988_s0 + $0xf0] sm:$0xff]  }
   0xc   :  { %122 = vmatprep.subr.bf16.mxu0 %v755_v0  ;;  %244 = vmatprep.subr.bf16.mxu1 %v755_v0  ;;  %v740_v32 = vld [vmem:[%s988_s0 + $0xa8] sm:$0xff]   ;;  %v742_v35 = vld [vmem:[%s988_s0 + $0xb0] sm:$0xff]   ;;  %v743_v36 = vld [vmem:[%s988_s0 + $0xf8] sm:$0xff]  }
   0xd   :  { %v744_v37 = vld [vmem:[%s988_s0 + $0xb8] sm:$0xff]   ;;  %v745_v38 = vld [vmem:[%s988_s0 + $0x100] sm:$0xff]   ;;  %v750_v40 = vld [vmem:[%s988_s0 + $0x108] sm:$0xff]  }
   0xe   :  { %554 = vperm.xlu0 %711, %v544_v30   ;;  %564 = vperm.xlu1 %712, %v546_v33   ;;  %v749_v39 = vld [vmem:[%s988_s0 + $0xc0] sm:$0xff]   ;;  %v751_v41 = vld [vmem:[%s988_s0 + $0xc8] sm:$0xff]   ;;  %v752_v42 = vld [vmem:[%s988_s0 + $0x110] sm:$0xff]  }
   0xf   :  { %123 = vmatpush1.bf16.msra.mxu0 %v719_v7  ;;  %245 = vmatpush1.bf16.msra.mxu1 %v720_v8  ;;  %v753_v43 = vld [vmem:[%s988_s0 + $0xd0] sm:$0xff]   ;;  %v754_v44 = vld [vmem:[%s988_s0 + $0x118] sm:$0xff]  }
  0x10   :  { %124 = vmatprep.subr.bf16.mxu0 %v755_v0  ;;  %246 = vmatprep.subr.bf16.mxu1 %v755_v0 }
  0x13   :  { %125 = vmatpush1.bf16.msra.mxu0 %v721_v9  ;;  %247 = vmatpush1.bf16.msra.mxu1 %v722_v10 }
  0x14   :  { %126 = vmatprep.subr.bf16.mxu0 %v755_v0  ;;  %248 = vmatprep.subr.bf16.mxu1 %v755_v0 }
  0x17   :  { %127 = vmatpush1.bf16.msra.mxu0 %v723_v11  ;;  %249 = vmatpush1.bf16.msra.mxu1 %v724_v13 }
  0x18   :  { %128 = vmatprep.subr.bf16.mxu0 %v755_v0  ;;  %250 = vmatprep.subr.bf16.mxu1 %v755_v0 }
  0x1b   :  { %129 = vmatpush1.bf16.msra.mxu0 %v725_v14  ;;  %251 = vmatpush1.bf16.msra.mxu1 %v726_v15 }
  0x1c   :  { %130 = vmatprep.subr.bf16.mxu0 %v755_v0  ;;  %252 = vmatprep.subr.bf16.mxu1 %v755_v0 }
  0x1f   :  { %131 = vmatpush1.bf16.msra.mxu0 %v727_v16  ;;  %253 = vmatpush1.bf16.msra.mxu1 %v728_v17 }
  0x20   :  { %132 = vmatprep.subr.bf16.mxu0 %v755_v0  ;;  %254 = vmatprep.subr.bf16.mxu1 %v755_v0 }
  0x23   :  { %133 = vmatpush1.bf16.msra.mxu0 %v729_v18  ;;  %255 = vmatpush1.bf16.msra.mxu1 %v730_v19 }
  0x24   :  { %364 = vmatprep.subr.bf16.mxu0 %v755_v0  ;;  %490 = vmatprep.subr.bf16.mxu1 %v755_v0 }
  0x26   :  { %149 = vmatmul.mubr.bf16.vlgmr.msra.gmra.mrb[0].mxu0 %v862_v20  ;;  %271 = vmatmul.mubr.bf16.vlgmr.msra.gmra.mrb[0].mxu1 %v862_v20 }
  0x27   :  { %365 = vmatpush1.bf16.msra.mxu0 %v734_v21  ;;  %491 = vmatpush1.bf16.msra.mxu1 %v735_v22 }
  0x28   :  { %366 = vmatprep.subr.bf16.mxu0 %v755_v0  ;;  %492 = vmatprep.subr.bf16.mxu1 %v755_v0 }
  0x29   :  { %614 = vmatprep.mubr.msk.bf16.mxu0 %vm109_vm0, %v875_v23  ;;  %643 = vmatprep.mubr.msk.bf16.mxu1 %vm109_vm0, %v875_v23 }
  0x2b   :  { %367 = vmatpush1.bf16.msra.mxu0 %v736_v24  ;;  %493 = vmatpush1.bf16.msra.mxu1 %v737_v26 }
  0x2c   :  { %368 = vmatprep.subr.bf16.mxu0 %v755_v0  ;;  %494 = vmatprep.subr.bf16.mxu1 %v755_v0 }
  0x2e   :  { %157 = vmatmul.mubr.bf16.gmra.mrb[4].mxu0 %v748_v28  ;;  %279 = vmatmul.mubr.bf16.gmra.mrb[4].mxu1 %v748_v28 }
  0x2f   :  { %369 = vmatpush1.bf16.msra.mxu0 %v738_v29  ;;  %495 = vmatpush1.bf16.msra.mxu1 %v739_v31 }
  0x30   :  { %370 = vmatprep.subr.bf16.mxu0 %v755_v0  ;;  %496 = vmatprep.subr.bf16.mxu1 %v755_v0 }
  0x31   :  { %671 = vmatprep.mubr.msk.bf16.mxu0 %vm109_vm0, %v824_v12  ;;  %700 = vmatprep.mubr.msk.bf16.mxu1 %vm109_vm0, %v824_v12 }
  0x33   :  { %371 = vmatpush1.bf16.msra.mxu0 %v740_v32  ;;  %497 = vmatpush1.bf16.msra.mxu1 %v741_v34 }
  0x34   :  { %372 = vmatprep.subr.bf16.mxu0 %v755_v0  ;;  %498 = vmatprep.subr.bf16.mxu1 %v755_v0 }
  0x37   :  { %373 = vmatpush1.bf16.msra.mxu0 %v742_v35  ;;  %499 = vmatpush1.bf16.msra.mxu1 %v743_v36 }
  0x38   :  { %374 = vmatprep.subr.bf16.mxu0 %v755_v0  ;;  %500 = vmatprep.subr.bf16.mxu1 %v755_v0 }
  0x3b   :  { %375 = vmatpush1.bf16.msra.mxu0 %v744_v37  ;;  %501 = vmatpush1.bf16.msra.mxu1 %v745_v38 }
  0x3c   :  { %376 = vmatprep.subr.bf16.mxu0 %v755_v0  ;;  %502 = vmatprep.subr.bf16.mxu1 %v755_v0 }
  0x3f   :  { %377 = vmatpush1.bf16.msra.mxu0 %v749_v39  ;;  %503 = vmatpush1.bf16.msra.mxu1 %v750_v40 }
  0x40   :  { %378 = vmatprep.subr.bf16.mxu0 %v755_v0  ;;  %504 = vmatprep.subr.bf16.mxu1 %v755_v0 }
  0x43   :  { %379 = vmatpush1.bf16.msra.mxu0 %v751_v41  ;;  %505 = vmatpush1.bf16.msra.mxu1 %v752_v42 }
  0x44   :  { %380 = vmatprep.subr.bf16.mxu0 %v755_v0  ;;  %506 = vmatprep.subr.bf16.mxu1 %v755_v0 }
  0x47   :  { %381 = vmatpush1.bf16.msra.mxu0 %v753_v43  ;;  %507 = vmatpush1.bf16.msra.mxu1 %v754_v44 }
  0x4a   :  { %397 = vmatmul.mubr.bf16.vlgmr.msra.gmra.mrb[8].mxu0 %v862_v20  ;;  %523 = vmatmul.mubr.bf16.vlgmr.msra.gmra.mrb[8].mxu1 %v862_v20 }
  0x4b   :  { %672 = vmatprep.mubr.msk.bf16.mxu0 %vm109_vm0, %v875_v23  ;;  %701 = vmatprep.mubr.msk.bf16.mxu1 %vm109_vm0, %v875_v23 }
  0x52   :  { %405 = vmatmul.mubr.bf16.gmra.mrb[12].mxu0 %v748_v28  ;;  %531 = vmatmul.mubr.bf16.gmra.mrb[12].mxu1 %v748_v28 }
  0x89   :  { %v550_v1 = vpop.permute.xlu0 %549  ;;  %v560_v18 = vpop.permute.xlu1 %559 }
  0x8d   :  { %v555_v13 = vpop.permute.xlu0 %554  ;;  %v565_v35 = vpop.permute.xlu1 %564 }
  0xf9   :  { %v150_v45 = vpop.f32.mrb[0].mxu0  ;;  %v272_v46 = vpop.f32.mrb[0].mxu1 }
  0xfa   :  { %v152_v47 = vpop.f32.mrb[1].mxu0  ;;  %v287_v48 = vmax.f32 %v150_v45, %v272_v46  ;;  %v274_v49 = vpop.f32.mrb[1].mxu1 }
  0xfb   :  { %v153_v50 = vpop.f32.mrb[2].mxu0  ;;  %v275_v51 = vpop.f32.mrb[2].mxu1 }
  0xfc   :  { %v155_v52 = vpop.f32.mrb[3].mxu0  ;;  %v288_v53 = vmax.f32 %v153_v50, %v275_v51  ;;  %v277_v54 = vpop.f32.mrb[3].mxu1 }
 0x101   :  { %v158_v55 = vpop.f32.mrb[4].mxu0  ;;  %v280_v57 = vpop.f32.mrb[4].mxu1 }
 0x102   :  { %v160_v56 = vpop.f32.mrb[5].mxu0  ;;  %v289_v58 = vmax.f32 %v158_v55, %v280_v57  ;;  %v282_v60 = vpop.f32.mrb[5].mxu1 }
 0x103   :  { %v161_v59 = vpop.f32.mrb[6].mxu0  ;;  %v283_v62 = vpop.f32.mrb[6].mxu1 }
 0x104   :  { %v163_v61 = vpop.f32.mrb[7].mxu0  ;;  %v290_v63 = vmax.f32 %v161_v59, %v283_v62  ;;  %v285_v0 = vpop.f32.mrb[7].mxu1 }
 0x11d   :  { %v398_v2 = vpop.f32.mrb[8].mxu0  ;;  %v524_v4 = vpop.f32.mrb[8].mxu1 }
 0x11e   :  { %v413_v3 = vmax.f32 %v287_v48, %v398_v2  ;;  %v400_v5 = vpop.f32.mrb[9].mxu0  ;;  %v526_v6 = vpop.f32.mrb[9].mxu1 }
 0x11f   :  { %v401_v7 = vpop.f32.mrb[10].mxu0  ;;  %v527_v10 = vpop.f32.mrb[10].mxu1 }
 0x120   :  { %v539_v8 = vmax.f32 %v413_v3, %v524_v4  ;;  %v414_v9 = vmax.f32 %v288_v53, %v401_v7  ;;  %v403_v11 = vpop.f32.mrb[11].mxu0  ;;  %v529_v12 = vpop.f32.mrb[11].mxu1 }
 0x122   :  { %v567_v14 = vadd.f32 %v550_v1, %v539_v8  ;;  %v540_v15 = vmax.f32 %v414_v9, %v527_v10 }
 0x124   :  { %v571_v16 = vmax.f32 %v567_v14, 0.0  ;;  %v568_v17 = vadd.f32 %v555_v13, %v540_v15 }
 0x125   :  { %v406_v19 = vpop.f32.mrb[12].mxu0  ;;  %v532_v23 = vpop.f32.mrb[12].mxu1 }
 0x126   :  { %v706_v20 = vpack.c.bf16 %v571_v16, %v571_v16  ;;  %v572_v21 = vmax.f32 %v568_v17, 0.0  ;;  %v415_v22 = vmax.f32 %v289_v58, %v406_v19  ;;  %v408_v24 = vpop.f32.mrb[13].mxu0  ;;  %v534_v25 = vpop.f32.mrb[13].mxu1 }
 0x127   :  { %v409_v26 = vpop.f32.mrb[14].mxu0  ;;  %v535_v30 = vpop.f32.mrb[14].mxu1 }
 0x128   :  { %592 = vst.msk [vmem:[%s991_s3] sm:$0xf] %vm591_vm1, %v706_v20  ;;  %v707_v27 = vpack.c.bf16 %v572_v21, %v572_v21  ;;  %v541_v28 = vmax.f32 %v415_v22, %v532_v23  ;;  %v416_v29 = vmax.f32 %v290_v63, %v409_v26  ;;  %v411_v31 = vpop.f32.mrb[15].mxu0  ;;  %v537_v32 = vpop.f32.mrb[15].mxu1 }
 0x12a   :  { %593 = vst.msk [vmem:[%s991_s3 + $0x4] sm:$0xf] %vm591_vm1, %v707_v27  ;;  %v569_v33 = vadd.f32 %v560_v18, %v541_v28  ;;  %v542_v34 = vmax.f32 %v416_v29, %v535_v30 }
 0x12c   :  { %v573_v36 = vmax.f32 %v569_v33, 0.0  ;;  %v570_v37 = vadd.f32 %v565_v35, %v542_v34 }
 0x12e   :  { %v708_v38 = vpack.c.bf16 %v573_v36, %v573_v36  ;;  %v574_v39 = vmax.f32 %v570_v37, 0.0 }
 0x130   :  { %594 = vst.msk [vmem:[%s991_s3 + $0x8] sm:$0xf] %vm591_vm1, %v708_v38  ;;  %v709_v40 = vpack.c.bf16 %v574_v39, %v574_v39 }
 0x132   :  { %595 = vst.msk [vmem:[%s991_s3 + $0xc] sm:$0xf] %vm591_vm1, %v709_v40 }

// kernel: convnet_model1_forward.7
= control target key start
LH: loop header
LB: loop body
LE: loop exit
PB: predicated region body
PF: predicated region fallthrough
CT: control target
= control target key end

     0   :  { %v1883_v1 = vmov 0   ;;  %vm235_vm0 = vcmask 261120   ;;  %vm1323_vm1 = vcmask 125952   ;;  %s2348_s0 = inlined_call_operand.vmem [shape: bf16[4,288,16], index: 0, kind: input, shape index: {}]   ;;  %s2349_s1 = inlined_call_operand.vmem [shape: bf16[64,288], index: 1, kind: input, shape index: {}]   ;;  %s2350_s2 = inlined_call_operand.vmem [shape: f32[64,1], index: 2, kind: input, shape index: {}]   ;;  %s2351_s3 = inlined_call_operand.vmem [shape: bf16[64,16], index: 3, kind: output, shape index: {}]  }
   0x1   :  { %v1795_v0 = vld [vmem:[%s2348_s0 + $0x40] sm:$0xff]   ;;  %1794 = vset.pattern.permute.xlu1 %v1883_v1  ;;  %1793 = vset.pattern.permute.xlu0 %v1883_v1  ;;  %v1796_v2 = vld [vmem:[%s2348_s0 + $0xd0] sm:$0xff]   ;;  %v1799_v5 = vld [vmem:[%s2348_s0 + $0x48] sm:$0xff]  }
   0x2   :  { %1560 = vmatprep.subr.bf16.mxu0 %v1795_v0  ;;  %v1797_v3 = vld [vmem:[%s2348_s0] sm:$0xff]   ;;  %1606 = vmatprep.subr.bf16.mxu1 %v1796_v2  ;;  %v1798_v4 = vld [vmem:[%s2348_s0 + $0x90] sm:$0xff]   ;;  %v1800_v6 = vld [vmem:[%s2348_s0 + $0xd8] sm:$0xff]  }
   0x3   :  { %1561 = vmatpush3.bf16.msra.mxu0 %v1797_v3  ;;  %1607 = vmatpush3.bf16.msra.mxu1 %v1798_v4  ;;  %v1801_v7 = vld [vmem:[%s2348_s0 + $0x8] sm:$0xff]   ;;  %v1802_v8 = vld [vmem:[%s2348_s0 + $0x98] sm:$0xff]   ;;  %v1803_v9 = vld [vmem:[%s2348_s0 + $0x50] sm:$0xff]  }
   0x4   :  { %1562 = vmatprep.subr.bf16.mxu0 %v1799_v5  ;;  %1608 = vmatprep.subr.bf16.mxu1 %v1800_v6  ;;  %v1804_v10 = vld [vmem:[%s2348_s0 + $0xe0] sm:$0xff]   ;;  %v1805_v11 = vld [vmem:[%s2348_s0 + $0x10] sm:$0xff]   ;;  %v1807_v13 = vld [vmem:[%s2348_s0 + $0x58] sm:$0xff]  }
   0x5   :  { %v1806_v12 = vld [vmem:[%s2348_s0 + $0xa0] sm:$0xff]   ;;  %v1808_v14 = vld [vmem:[%s2348_s0 + $0xe8] sm:$0xff]   ;;  %v1809_v15 = vld [vmem:[%s2348_s0 + $0x18] sm:$0xff]  }
   0x6   :  { %v1810_v16 = vld [vmem:[%s2348_s0 + $0xa8] sm:$0xff]   ;;  %v1811_v17 = vld [vmem:[%s2348_s0 + $0x60] sm:$0xff]   ;;  %v1812_v18 = vld [vmem:[%s2348_s0 + $0xf0] sm:$0xff]  }
   0x7   :  { %1563 = vmatpush3.bf16.msra.mxu0 %v1801_v7  ;;  %1609 = vmatpush3.bf16.msra.mxu1 %v1802_v8  ;;  %v1813_v19 = vld [vmem:[%s2348_s0 + $0x20] sm:$0xff]   ;;  %v1814_v20 = vld [vmem:[%s2348_s0 + $0xb0] sm:$0xff]   ;;  %v1815_v21 = vld [vmem:[%s2348_s0 + $0x68] sm:$0xff]  }
   0x8   :  { %1564 = vmatprep.subr.bf16.mxu0 %v1803_v9  ;;  %1610 = vmatprep.subr.bf16.mxu1 %v1804_v10  ;;  %v1816_v22 = vld [vmem:[%s2348_s0 + $0xf8] sm:$0xff]   ;;  %v1817_v23 = vld [vmem:[%s2348_s0 + $0x28] sm:$0xff]   ;;  %v1819_v25 = vld [vmem:[%s2348_s0 + $0x70] sm:$0xff]  }
   0x9   :  { %v1818_v24 = vld [vmem:[%s2348_s0 + $0xb8] sm:$0xff]   ;;  %v1820_v26 = vld [vmem:[%s2348_s0 + $0x100] sm:$0xff]   ;;  %v1821_v27 = vld [vmem:[%s2348_s0 + $0x30] sm:$0xff]  }
   0xa   :  { %v1822_v28 = vld [vmem:[%s2348_s0 + $0xc0] sm:$0xff]   ;;  %v1823_v29 = vld [vmem:[%s2348_s0 + $0x78] sm:$0xff]   ;;  %v1824_v30 = vld [vmem:[%s2348_s0 + $0x108] sm:$0xff]  }
   0xb   :  { %1565 = vmatpush3.bf16.msra.mxu0 %v1805_v11  ;;  %1611 = vmatpush3.bf16.msra.mxu1 %v1806_v12  ;;  %v1825_v31 = vld [vmem:[%s2348_s0 + $0x38] sm:$0xff]   ;;  %v1826_v32 = vld [vmem:[%s2348_s0 + $0xc8] sm:$0xff]   ;;  %v2003_v33 = vld [vmem:[%s2349_s1 + $0x4] ss:$12 sps:$4 sm:$0xff]  }
   0xc   :  { %1566 = vmatprep.subr.bf16.mxu0 %v1807_v13  ;;  %1612 = vmatprep.subr.bf16.mxu1 %v1808_v14  ;;  %v2008_v34 = vld [vmem:[%s2349_s1] ss:$12 sps:$4 sm:$0xff]   ;;  %v2032_v40 = vld [vmem:[%s2349_s1 + $0x1c] ss:$12 sps:$4 sm:$0xff]   ;;  %v2037_v41 = vld [vmem:[%s2349_s1 + $0x18] ss:$12 sps:$4 sm:$0xff]  }
   0xd   :  { %280 = vmatprep.mubr.bf16.mxu0 %v2003_v33  ;;  %555 = vmatprep.mubr.bf16.mxu1 %v2003_v33  ;;  %v1830_v35 = vld [vmem:[%s2348_s0 + $0x160] sm:$0xff]   ;;  %v1833_v38 = vld [vmem:[%s2348_s0 + $0x168] sm:$0xff]   ;;  %v1838_v42 = vld [vmem:[%s2348_s0 + $0x170] sm:$0xff]  }
   0xe   :  { %v1831_v36 = vld [vmem:[%s2348_s0 + $0x120] sm:$0xff]   ;;  %v1834_v39 = vld [vmem:[%s2348_s0 + $0x128] sm:$0xff]   ;;  %v1839_v43 = vld [vmem:[%s2348_s0 + $0x130] sm:$0xff]  }
   0xf   :  { %1567 = vmatpush3.bf16.msra.mxu0 %v1809_v15  ;;  %1613 = vmatpush3.bf16.msra.mxu1 %v1810_v16  ;;  %v1832_v37 = vld [vmem:[%s2348_s0 + $0x80] sm:$0xff]   ;;  %v1840_v44 = vld [vmem:[%s2348_s0 + $0x178] sm:$0xff]   ;;  %v1847_v49 = vld [vmem:[%s2348_s0 + $0x88] sm:$0xff]  }
  0x10   :  { %1568 = vmatprep.subr.bf16.mxu0 %v1811_v17  ;;  %1614 = vmatprep.subr.bf16.mxu1 %v1812_v18  ;;  %v1841_v45 = vld [vmem:[%s2348_s0 + $0x138] sm:$0xff]   ;;  %v2058_v46 = vld [vmem:[%s2349_s1 + $0x34] ss:$12 sps:$4 sm:$0xff]   ;;  %v1848_v51 = vld [vmem:[%s2348_s0 + $0x188] sm:$0xff]  }
  0x11   :  { %v2063_v47 = vld [vmem:[%s2349_s1 + $0x30] ss:$12 sps:$4 sm:$0xff]   ;;  %v1845_v48 = vld [vmem:[%s2348_s0 + $0x180] sm:$0xff]   ;;  %v2082_v52 = vld [vmem:[%s2349_s1 + $0x4c] ss:$12 sps:$4 sm:$0xff]  }
  0x12   :  { %v1846_v50 = vld [vmem:[%s2348_s0 + $0x140] sm:$0xff]   ;;  %v1849_v53 = vld [vmem:[%s2348_s0 + $0x148] sm:$0xff]   ;;  %v1853_v54 = vld [vmem:[%s2348_s0 + $0x190] sm:$0xff]  }
  0x13   :  { %1569 = vmatpush3.bf16.msra.mxu0 %v1813_v19  ;;  %1615 = vmatpush3.bf16.msra.mxu1 %v1814_v20  ;;  %v2097_v55 = vld [vmem:[%s2349_s1 + $0x48] ss:$12 sps:$4 sm:$0xff]   ;;  %v1855_v58 = vld [vmem:[%s2348_s0 + $0x198] sm:$0xff]   ;;  %v2127_v62 = vld [vmem:[%s2349_s1 + $0x20] ss:$12 sps:$4 sm:$0xff]  }
  0x14   :  { %1570 = vmatprep.subr.bf16.mxu0 %v1815_v21  ;;  %1616 = vmatprep.subr.bf16.mxu1 %v1816_v22  ;;  %v2102_v56 = vld [vmem:[%s2349_s1 + $0x8] ss:$12 sps:$4 sm:$0xff]   ;;  %v1856_v60 = vld [vmem:[%s2348_s0 + $0x158] sm:$0xff]   ;;  %v1866_v4 = vld [vmem:[%s2348_s0 + $0x200] sm:$0xff]  }
  0x15   :  { %v1854_v57 = vld [vmem:[%s2348_s0 + $0x150] sm:$0xff]   ;;  %v2135_v0 = vld [vmem:[%s2349_s1 + $0x38] ss:$12 sps:$4 sm:$0xff]   ;;  %v1869_v8 = vld [vmem:[%s2348_s0 + $0x208] sm:$0xff]  }
  0x16   :  { %v1861_v59 = vld [vmem:[%s2348_s0 + $0x110] sm:$0xff]   ;;  %v1862_v1 = vld [vmem:[%s2348_s0 + $0x1f8] sm:$0xff]   ;;  %v1873_v6 = vld [vmem:[%s2348_s0 + $0x1a0] sm:$0xff]  }
  0x17   :  { %1571 = vmatpush3.bf16.msra.mxu0 %v1817_v23  ;;  %1617 = vmatpush3.bf16.msra.mxu1 %v1818_v24  ;;  %v1859_v61 = vld [vmem:[%s2348_s0 + $0x1f0] sm:$0xff]   ;;  %v1868_v2 = vld [vmem:[%s2348_s0 + $0x118] sm:$0xff]   ;;  %v1867_v7 = vld [vmem:[%s2348_s0 + $0x1c0] sm:$0xff]  }
  0x18   :  { %1572 = vmatprep.subr.bf16.mxu0 %v1819_v25  ;;  %1618 = vmatprep.subr.bf16.mxu1 %v1820_v26  ;;  %v1860_v63 = vld [vmem:[%s2348_s0 + $0x1b0] sm:$0xff]   ;;  %v1863_v3 = vld [vmem:[%s2348_s0 + $0x1b8] sm:$0xff]   ;;  %v1870_v9 = vld [vmem:[%s2348_s0 + $0x1c8] sm:$0xff]  }
  0x19   :  { %v2158_v5 = vld [vmem:[%s2349_s1 + $0x50] ss:$12 sps:$4 sm:$0xff]   ;;  %v1227_v13 = vld [vmem:[%s2350_s2] sm:$0xff]  ;;  %v1878_v15 = vld [vmem:[%s2348_s0 + $0x1a8] sm:$0xff]  }
  0x1a   :  { %v1871_v10 = vld [vmem:[%s2348_s0 + $0x210] sm:$0xff]   ;;  %v1874_v14 = vld [vmem:[%s2348_s0 + $0x218] sm:$0xff]   ;;  %1237 = vperm.xlu0 %1793, %v1227_v13   ;;  %v1228_v19 = vld [vmem:[%s2350_s2 + $0x8] sm:$0xff] }
  0x1b   :  { %1573 = vmatpush3.bf16.msra.mxu0 %v1821_v27  ;;  %1619 = vmatpush3.bf16.msra.mxu1 %v1822_v28  ;;  %v1872_v11 = vld [vmem:[%s2348_s0 + $0x1d0] sm:$0xff]   ;;  %v1230_v16 = vld [vmem:[%s2350_s2 + $0x18] sm:$0xff]  ;;  %v1876_v20 = vld [vmem:[%s2348_s0 + $0x220] sm:$0xff]  }
  0x1c   :  { %1574 = vmatprep.subr.bf16.mxu0 %v1823_v29  ;;  %1620 = vmatprep.subr.bf16.mxu1 %v1824_v30  ;;  %v1229_v12 = vld [vmem:[%s2350_s2 + $0x10] sm:$0xff]  ;;  %v1875_v17 = vld [vmem:[%s2348_s0 + $0x1d8] sm:$0xff]   ;;  %v1232_v21 = vld [vmem:[%s2350_s2 + $0x28] sm:$0xff] }
  0x1d   :  { %1247 = vperm.xlu1 %1794, %v1229_v12   ;;  %v1881_v18 = vld [vmem:[%s2348_s0 + $0x230] sm:$0xff]   ;;  %v1877_v22 = vld [vmem:[%s2348_s0 + $0x1e0] sm:$0xff]   ;;  %v1879_v23 = vld [vmem:[%s2348_s0 + $0x228] sm:$0xff]  }
  0x1e   :  { %1242 = vperm.xlu0 %1793, %v1228_v19   ;;  %v1231_v24 = vld [vmem:[%s2350_s2 + $0x20] sm:$0xff]  ;;  %v1234_v25 = vld [vmem:[%s2350_s2 + $0x38] sm:$0xff]  ;;  %v1880_v26 = vld [vmem:[%s2348_s0 + $0x1e8] sm:$0xff]  }
  0x1f   :  { %1575 = vmatpush3.bf16.msra.mxu0 %v1825_v31  ;;  %1621 = vmatpush3.bf16.msra.mxu1 %v1826_v32  ;;  %v1233_v27 = vld [vmem:[%s2350_s2 + $0x30] sm:$0xff]  ;;  %v1882_v28 = vld [vmem:[%s2348_s0 + $0x238] sm:$0xff]  }
  0x20   :  { %1652 = vmatprep.subr.bf16.mxu1 %v1830_v35  ;;  %1744 = vmatprep.subr.bf16.mxu0 %v1832_v37 }
  0x21   :  { %1252 = vperm.xlu1 %1794, %v1230_v16  }
  0x22   :  { %281 = vmatmul.mubr.bf16.vlgmr.msra.gmra.mrb[0].mxu0 %v2008_v34  ;;  %556 = vmatmul.mubr.bf16.vlgmr.msra.gmra.mrb[0].mxu1 %v2008_v34 }
  0x23   :  { %1653 = vmatpush3.bf16.msra.mxu1 %v1831_v36  ;;  %1745 = vmatpush3.bf16.msra.mxu0 %v1832_v37 }
  0x24   :  { %1654 = vmatprep.subr.bf16.mxu1 %v1833_v38  ;;  %288 = vmatprep.mubr.bf16.mxu0 %v2032_v40 }
  0x25   :  { %563 = vmatprep.mubr.bf16.mxu1 %v2032_v40  ;;  %1746 = vmatprep.subr.bf16.mxu0 %v1847_v49 }
  0x26   :  { %1262 = vperm.xlu1 %1794, %v1232_v21   ;;  %1257 = vperm.xlu0 %1793, %v1231_v24  }
  0x27   :  { %1655 = vmatpush3.bf16.msra.mxu1 %v1834_v39  ;;  %1747 = vmatpush3.bf16.msra.mxu0 %v1847_v49 }
  0x28   :  { %1656 = vmatprep.subr.bf16.mxu1 %v1838_v42  ;;  %1756 = vmatprep.subr.bf16.mxu0 %v1861_v59 }
  0x2a   :  { %289 = vmatmul.mubr.bf16.gmra.mrb[4].mxu0 %v2037_v41  ;;  %564 = vmatmul.mubr.bf16.gmra.mrb[4].mxu1 %v2037_v41 }
  0x2b   :  { %1657 = vmatpush3.bf16.msra.mxu1 %v1839_v43  ;;  %296 = vmatprep.mubr.bf16.mxu0 %v2058_v46 }
  0x2c   :  { %1658 = vmatprep.subr.bf16.mxu1 %v1840_v44  ;;  %571 = vmatprep.mubr.bf16.mxu1 %v2058_v46 }
  0x2d   :  { %1272 = vperm.xlu1 %1794, %v1234_v25   ;;  %1267 = vperm.xlu0 %1793, %v1233_v27  }
  0x2f   :  { %1659 = vmatpush3.bf16.msra.mxu1 %v1841_v45 }
  0x30   :  { %1660 = vmatprep.subr.bf16.mxu1 %v1845_v48 }
  0x32   :  { %297 = vmatmul.mubr.bf16.gmra.mrb[8].mxu0 %v2063_v47  ;;  %572 = vmatmul.mubr.bf16.gmra.mrb[8].mxu1 %v2063_v47 }
  0x33   :  { %304 = vmatprep.mubr.bf16.mxu0 %v2082_v52  ;;  %1661 = vmatpush3.bf16.msra.mxu1 %v1846_v50 }
  0x34   :  { %579 = vmatprep.mubr.bf16.mxu1 %v2082_v52  ;;  %1662 = vmatprep.subr.bf16.mxu1 %v1848_v51 }
  0x37   :  { %1663 = vmatpush3.bf16.msra.mxu1 %v1849_v53 }
  0x38   :  { %1664 = vmatprep.subr.bf16.mxu1 %v1853_v54 }
  0x3a   :  { %305 = vmatmul.mubr.bf16.gmra.mrb[12].mxu0 %v2097_v55  ;;  %580 = vmatmul.mubr.bf16.gmra.mrb[12].mxu1 %v2097_v55 }
  0x3b   :  { %1748 = vmatprep.mubr.msk.bf16.mxu0 %vm235_vm0, %v2102_v56  ;;  %1665 = vmatpush3.bf16.msra.mxu1 %v1854_v57 }
  0x3c   :  { %838 = vmatprep.mubr.bf16.mxu1 %v2003_v33  ;;  %1666 = vmatprep.subr.bf16.mxu1 %v1855_v58 }
  0x3f   :  { %1667 = vmatpush3.bf16.msra.mxu1 %v1856_v60 }
  0x40   :  { %1698 = vmatprep.subr.bf16.mxu1 %v1859_v61 }
  0x42   :  { %1749 = vmatmul.mubr.msk.bf16.vlgmr.msra.gmra.mrb[16].mxu0 %vm235_vm0, %v2127_v62  ;;  %839 = vmatmul.mubr.bf16.vlgmr.msra.gmra.mrb[16].mxu1 %v2008_v34 }
  0x43   :  { %1757 = vmatpush3.bf16.msra.mxu0 %v1861_v59  ;;  %1699 = vmatpush3.bf16.msra.mxu1 %v1860_v63 }
  0x44   :  { %1752 = vmatprep.mubr.msk.bf16.mxu0 %vm235_vm0, %v2135_v0  ;;  %1700 = vmatprep.subr.bf16.mxu1 %v1862_v1 }
  0x45   :  { %846 = vmatprep.mubr.bf16.mxu1 %v2032_v40  ;;  %1758 = vmatprep.subr.bf16.mxu0 %v1868_v2 }
  0x47   :  { %1759 = vmatpush3.bf16.msra.mxu0 %v1868_v2  ;;  %1701 = vmatpush3.bf16.msra.mxu1 %v1863_v3 }
  0x48   :  { %1702 = vmatprep.subr.bf16.mxu1 %v1866_v4  ;;  %1768 = vmatprep.subr.bf16.mxu0 %v1873_v6 }
  0x4a   :  { %1753 = vmatmul.mubr.msk.bf16.gmra.mrb[20].mxu0 %vm235_vm0, %v2158_v5  ;;  %847 = vmatmul.mubr.bf16.gmra.mrb[20].mxu1 %v2037_v41 }
  0x4b   :  { %1760 = vmatprep.mubr.msk.bf16.mxu0 %vm235_vm0, %v2102_v56  ;;  %1703 = vmatpush3.bf16.msra.mxu1 %v1867_v7 }
  0x4c   :  { %854 = vmatprep.mubr.bf16.mxu1 %v2058_v46  ;;  %1704 = vmatprep.subr.bf16.mxu1 %v1869_v8 }
  0x4f   :  { %1705 = vmatpush3.bf16.msra.mxu1 %v1870_v9 }
  0x50   :  { %1706 = vmatprep.subr.bf16.mxu1 %v1871_v10 }
  0x52   :  { %1761 = vmatmul.mubr.msk.bf16.vlgmr.msra.gmra.mrb[24].mxu0 %vm235_vm0, %v2127_v62  ;;  %855 = vmatmul.mubr.bf16.gmra.mrb[24].mxu1 %v2063_v47 }
  0x53   :  { %1769 = vmatpush3.bf16.msra.mxu0 %v1873_v6  ;;  %1707 = vmatpush3.bf16.msra.mxu1 %v1872_v11 }
  0x54   :  { %1764 = vmatprep.mubr.msk.bf16.mxu0 %vm235_vm0, %v2135_v0  ;;  %1708 = vmatprep.subr.bf16.mxu1 %v1874_v14 }
  0x55   :  { %862 = vmatprep.mubr.bf16.mxu1 %v2082_v52  ;;  %1770 = vmatprep.subr.bf16.mxu0 %v1878_v15 }
  0x57   :  { %1771 = vmatpush3.bf16.msra.mxu0 %v1878_v15  ;;  %1709 = vmatpush3.bf16.msra.mxu1 %v1875_v17 }
  0x58   :  { %1780 = vmatprep.subr.bf16.mxu0 %v1881_v18  ;;  %1710 = vmatprep.subr.bf16.mxu1 %v1876_v20 }
  0x5a   :  { %1765 = vmatmul.mubr.msk.bf16.gmra.mrb[28].mxu0 %vm235_vm0, %v2158_v5  ;;  %863 = vmatmul.mubr.bf16.gmra.mrb[28].mxu1 %v2097_v55 }
  0x5b   :  { %1772 = vmatprep.mubr.msk.bf16.mxu0 %vm235_vm0, %v2102_v56  ;;  %1711 = vmatpush3.bf16.msra.mxu1 %v1877_v22 }
  0x5c   :  { %1121 = vmatprep.mubr.bf16.mxu1 %v2003_v33  ;;  %1712 = vmatprep.subr.bf16.mxu1 %v1879_v23 }
  0x5f   :  { %1713 = vmatpush3.bf16.msra.mxu1 %v1880_v26 }
  0x62   :  { %1773 = vmatmul.mubr.msk.bf16.vlgmr.msra.gmra.mrb[32].mxu0 %vm235_vm0, %v2127_v62  ;;  %1122 = vmatmul.mubr.bf16.vlgmr.msra.gmra.mrb[32].mxu1 %v2008_v34 }
  0x63   :  { %1781 = vmatpush3.bf16.msra.mxu0 %v1881_v18  ;;  %1776 = vmatprep.mubr.msk.bf16.mxu0 %vm235_vm0, %v2135_v0 }
  0x64   :  { %1129 = vmatprep.mubr.bf16.mxu1 %v2032_v40  ;;  %1782 = vmatprep.subr.bf16.mxu0 %v1882_v28 }
  0x67   :  { %1783 = vmatpush3.bf16.msra.mxu0 %v1882_v28 }
  0x6a   :  { %1777 = vmatmul.mubr.msk.bf16.gmra.mrb[36].mxu0 %vm235_vm0, %v2158_v5  ;;  %1130 = vmatmul.mubr.bf16.gmra.mrb[36].mxu1 %v2037_v41 }
  0x6b   :  { %1784 = vmatprep.mubr.msk.bf16.mxu0 %vm235_vm0, %v2102_v56  ;;  %1137 = vmatprep.mubr.bf16.mxu1 %v2058_v46 }
  0x72   :  { %1785 = vmatmul.mubr.msk.bf16.vlgmr.msra.gmra.mrb[40].mxu0 %vm235_vm0, %v2127_v62  ;;  %1138 = vmatmul.mubr.bf16.gmra.mrb[40].mxu1 %v2063_v47 }
  0x73   :  { %1788 = vmatprep.mubr.msk.bf16.mxu0 %vm235_vm0, %v2135_v0  ;;  %1145 = vmatprep.mubr.bf16.mxu1 %v2082_v52 }
  0x7a   :  { %1789 = vmatmul.mubr.msk.bf16.gmra.mrb[44].mxu0 %vm235_vm0, %v2158_v5  ;;  %1146 = vmatmul.mubr.bf16.gmra.mrb[44].mxu1 %v2097_v55 }
  0xf5   :  { %v1576_v29 = vpop.f32.mrb[0].mxu0  ;;  %v1622_v30 = vpop.f32.mrb[0].mxu1 }
  0xf6   :  { %v1577_v31 = vpop.f32.mrb[1].mxu0  ;;  %v1623_v33 = vpop.f32.mrb[1].mxu1 }
  0xf7   :  { %v1578_v32 = vadd.f32 %v1577_v31, %v1576_v29  ;;  %v1579_v34 = vpop.f32.mrb[2].mxu0  ;;  %v2268_v35 = vadd.f32 %v1623_v33, %v1622_v30  ;;  %v1625_v36 = vpop.f32.mrb[2].mxu1 }
  0xf8   :  { %v1580_v37 = vpop.f32.mrb[3].mxu0  ;;  %v1626_v39 = vpop.f32.mrb[3].mxu1 }
  0xf9   :  { %v1581_v38 = vadd.f32 %v1580_v37, %v1579_v34  ;;  %v2270_v40 = vadd.f32 %v1626_v39, %v1625_v36 }
  0xfd   :  { %v1582_v41 = vpop.f32.mrb[4].mxu0  ;;  %v1628_v42 = vpop.f32.mrb[4].mxu1 }
  0xfe   :  { %v1583_v43 = vpop.f32.mrb[5].mxu0  ;;  %v1629_v45 = vpop.f32.mrb[5].mxu1 }
  0xff   :  { %v1584_v44 = vadd.f32 %v1583_v43, %v1582_v41  ;;  %v1585_v46 = vpop.f32.mrb[6].mxu0  ;;  %v1630_v47 = vadd.f32 %v1629_v45, %v1628_v42  ;;  %v1631_v48 = vpop.f32.mrb[6].mxu1 }
 0x100   :  { %v1586_v49 = vpop.f32.mrb[7].mxu0  ;;  %v1632_v51 = vpop.f32.mrb[7].mxu1 }
 0x101   :  { %v1587_v50 = vadd.f32 %v1586_v49, %v1585_v46  ;;  %v1633_v52 = vadd.f32 %v1632_v51, %v1631_v48 }
 0x105   :  { %v1588_v53 = vpop.f32.mrb[8].mxu0  ;;  %v1634_v54 = vpop.f32.mrb[8].mxu1 }
 0x106   :  { %v1589_v55 = vpop.f32.mrb[9].mxu0  ;;  %v1635_v57 = vpop.f32.mrb[9].mxu1 }
 0x107   :  { %v1590_v56 = vadd.f32 %v1589_v55, %v1588_v53  ;;  %v1591_v58 = vpop.f32.mrb[10].mxu0  ;;  %v2272_v59 = vadd.f32 %v1635_v57, %v1634_v54  ;;  %v1637_v60 = vpop.f32.mrb[10].mxu1 }
 0x108   :  { %v1592_v61 = vpop.f32.mrb[11].mxu0  ;;  %v1638_v63 = vpop.f32.mrb[11].mxu1 }
 0x109   :  { %v1593_v62 = vadd.f32 %v1592_v61, %v1591_v58  ;;  %v2274_v0 = vadd.f32 %v1638_v63, %v1637_v60 }
 0x10d   :  { %v1594_v1 = vpop.f32.mrb[12].mxu0  ;;  %v1640_v2 = vpop.f32.mrb[12].mxu1 }
 0x10e   :  { %v1595_v3 = vpop.f32.mrb[13].mxu0  ;;  %v1641_v5 = vpop.f32.mrb[13].mxu1 }
 0x10f   :  { %v1596_v4 = vadd.f32 %v1595_v3, %v1594_v1  ;;  %v1597_v6 = vpop.f32.mrb[14].mxu0  ;;  %v1642_v7 = vadd.f32 %v1641_v5, %v1640_v2  ;;  %v1643_v8 = vpop.f32.mrb[14].mxu1 }
 0x110   :  { %v1598_v9 = vpop.f32.mrb[15].mxu0  ;;  %v1644_v11 = vpop.f32.mrb[15].mxu1 }
 0x111   :  { %v1599_v10 = vadd.f32 %v1598_v9, %v1597_v6  ;;  %v1645_v12 = vadd.f32 %v1644_v11, %v1643_v8 }
 0x115   :  { %v1750_v13 = vpop.f32.mrb[16].mxu0  ;;  %v1668_v15 = vpop.f32.mrb[16].mxu1 }
 0x116   :  { %v2276_v14 = vadd.f32 %v1750_v13, %v1584_v44  ;;  %v347_v16 = vpop.f32.mrb[17].mxu0  ;;  %v1669_v18 = vpop.f32.mrb[17].mxu1 }
 0x117   :  { %v2278_v17 = vadd.f32 %v1578_v32, %v347_v16  ;;  %v1751_v19 = vpop.f32.mrb[18].mxu0  ;;  %v1670_v20 = vadd.f32 %v1669_v18, %v1668_v15  ;;  %v1671_v22 = vpop.f32.mrb[18].mxu1 }
 0x118   :  { %v2280_v21 = vadd.f32 %v1751_v19, %v1587_v50  ;;  %v350_v23 = vpop.f32.mrb[19].mxu0  ;;  %v1672_v25 = vpop.f32.mrb[19].mxu1 }
 0x119   :  { %v2282_v24 = vadd.f32 %v1581_v38, %v350_v23  ;;  %v2284_v26 = vadd.f32 %v1672_v25, %v1671_v22 }
 0x11d   :  { %v1754_v27 = vpop.f32.mrb[20].mxu0  ;;  %v1674_v29 = vpop.f32.mrb[20].mxu1 }
 0x11e   :  { %v2286_v28 = vadd.f32 %v1754_v27, %v1596_v4  ;;  %v363_v30 = vpop.f32.mrb[21].mxu0  ;;  %v1675_v32 = vpop.f32.mrb[21].mxu1 }
 0x11f   :  { %v2288_v31 = vadd.f32 %v1590_v56, %v363_v30  ;;  %v1755_v33 = vpop.f32.mrb[22].mxu0  ;;  %v1676_v34 = vadd.f32 %v1675_v32, %v1674_v29  ;;  %v1677_v37 = vpop.f32.mrb[22].mxu1 }
 0x120   :  { %v2290_v36 = vadd.f32 %v1755_v33, %v1599_v10  ;;  %v366_v39 = vpop.f32.mrb[23].mxu0  ;;  %v1678_v38 = vpop.f32.mrb[23].mxu1 }
 0x121   :  { %v2292_v41 = vadd.f32 %v1593_v62, %v366_v39  ;;  %v1679_v42 = vadd.f32 %v1678_v38, %v1677_v37 }
 0x125   :  { %v1762_v43 = vpop.f32.mrb[24].mxu0  ;;  %v1680_v45 = vpop.f32.mrb[24].mxu1 }
 0x126   :  { %v631_v44 = vadd.f32 %v1762_v43, %v1630_v47  ;;  %v622_v46 = vpop.f32.mrb[25].mxu0  ;;  %v1681_v49 = vpop.f32.mrb[25].mxu1 }
 0x127   :  { %v623_v48 = vadd.f32 %v2268_v35, %v622_v46  ;;  %v1763_v50 = vpop.f32.mrb[26].mxu0  ;;  %v1682_v53 = vadd.f32 %v1681_v49, %v1680_v45  ;;  %v1683_v55 = vpop.f32.mrb[26].mxu1 }
 0x128   :  { %v655_v51 = vmax.f32 %v2276_v14, %v631_v44  ;;  %v634_v54 = vadd.f32 %v1763_v50, %v1633_v52  ;;  %v625_v56 = vpop.f32.mrb[27].mxu0  ;;  %v1684_v60 = vpop.f32.mrb[27].mxu1 }
 0x129   :  { %v653_v57 = vmax.f32 %v2278_v17, %v623_v48  ;;  %v626_v58 = vadd.f32 %v2270_v40, %v625_v56  ;;  %v1685_v47 = vadd.f32 %v1684_v60, %v1683_v55  ;;  %v1248_v55 = vpop.permute.xlu1 %1247 }
 0x12a   :  { %v656_v61 = vmax.f32 %v2280_v21, %v634_v54 }
 0x12b   :  { %v654_v62 = vmax.f32 %v2282_v24, %v626_v58 }
 0x12d   :  { %v1766_v63 = vpop.f32.mrb[28].mxu0  ;;  %v1686_v1 = vpop.f32.mrb[28].mxu1 }
 0x12e   :  { %v647_v35 = vadd.f32 %v1766_v63, %v1642_v7  ;;  %v638_v2 = vpop.f32.mrb[29].mxu0  ;;  %v1687_v4 = vpop.f32.mrb[29].mxu1 }
 0x12f   :  { %v639_v3 = vadd.f32 %v2272_v59, %v638_v2  ;;  %v1767_v52 = vpop.f32.mrb[30].mxu0  ;;  %v1688_v6 = vadd.f32 %v1687_v4, %v1686_v1  ;;  %v1689_v9 = vpop.f32.mrb[30].mxu1 }
 0x130   :  { %v659_v5 = vmax.f32 %v2286_v28, %v647_v35  ;;  %v650_v8 = vadd.f32 %v1767_v52, %v1645_v12  ;;  %v641_v40 = vpop.f32.mrb[31].mxu0  ;;  %v1690_v13 = vpop.f32.mrb[31].mxu1 }
 0x131   :  { %v657_v10 = vmax.f32 %v2288_v31, %v639_v3  ;;  %v642_v11 = vadd.f32 %v2274_v0, %v641_v40  ;;  %v1691_v7 = vadd.f32 %v1690_v13, %v1689_v9  ;;  %v1253_v40 = vpop.permute.xlu1 %1252 }
 0x132   :  { %v660_v14 = vmax.f32 %v2290_v36, %v650_v8  ;;  %v1238_v36 = vpop.permute.xlu0 %1237 }
 0x133   :  { %v658_v15 = vmax.f32 %v2292_v41, %v642_v11 }
 0x135   :  { %v1774_v16 = vpop.f32.mrb[32].mxu0  ;;  %v1714_v17 = vpop.f32.mrb[32].mxu1 }
 0x136   :  { %v914_v59 = vadd.f32 %v1774_v16, %v1676_v34  ;;  %v905_v18 = vpop.f32.mrb[33].mxu0  ;;  %v1715_v21 = vpop.f32.mrb[33].mxu1 }
 0x137   :  { %v906_v19 = vadd.f32 %v1670_v20, %v905_v18  ;;  %v1775_v22 = vpop.f32.mrb[34].mxu0  ;;  %v1716_v23 = vadd.f32 %v1715_v21, %v1714_v17  ;;  %v1717_v25 = vpop.f32.mrb[34].mxu1 }
 0x138   :  { %v938_v12 = vmax.f32 %v655_v51, %v914_v59  ;;  %v917_v24 = vadd.f32 %v1775_v22, %v1679_v42  ;;  %v908_v27 = vpop.f32.mrb[35].mxu0  ;;  %v1718_v29 = vpop.f32.mrb[35].mxu1 }
 0x139   :  { %v936_v28 = vmax.f32 %v653_v57, %v906_v19  ;;  %v909_v0 = vadd.f32 %v2284_v26, %v908_v27  ;;  %v1719_v31 = vadd.f32 %v1718_v29, %v1717_v25  ;;  %v1243_v56 = vpop.permute.xlu0 %1242 }
 0x13a   :  { %v939_v30 = vmax.f32 %v656_v61, %v917_v24 }
 0x13b   :  { %v937_v32 = vmax.f32 %v654_v62, %v909_v0 }
 0x13d   :  { %v1778_v33 = vpop.f32.mrb[36].mxu0  ;;  %v1720_v37 = vpop.f32.mrb[36].mxu1 }
 0x13e   :  { %v930_v34 = vadd.f32 %v1778_v33, %v1688_v6  ;;  %v921_v39 = vpop.f32.mrb[37].mxu0  ;;  %v1721_v41 = vpop.f32.mrb[37].mxu1 }
 0x13f   :  { %v922_v20 = vadd.f32 %v1682_v53, %v921_v39  ;;  %v1779_v38 = vpop.f32.mrb[38].mxu0  ;;  %v1722_v42 = vadd.f32 %v1721_v41, %v1720_v37  ;;  %v1723_v45 = vpop.f32.mrb[38].mxu1 }
 0x140   :  { %v2307_v43 = vmax.f32 %v659_v5, %v930_v34  ;;  %v933_v44 = vadd.f32 %v1779_v38, %v1691_v7  ;;  %v924_v46 = vpop.f32.mrb[39].mxu0  ;;  %v1724_v49 = vpop.f32.mrb[39].mxu1 }
 0x141   :  { %v940_v48 = vmax.f32 %v657_v10, %v922_v20  ;;  %v925_v26 = vadd.f32 %v1685_v47, %v924_v46  ;;  %v1725_v51 = vadd.f32 %v1724_v49, %v1723_v45 }
 0x142   :  { %v2309_v50 = vmax.f32 %v660_v14, %v933_v44 }
 0x143   :  { %v2311_v54 = vmax.f32 %v658_v15, %v925_v26  ;;  %v1258_v15 = vpop.permute.xlu0 %1257 }
 0x145   :  { %v1786_v57 = vpop.f32.mrb[40].mxu0  ;;  %v1726_v53 = vpop.f32.mrb[40].mxu1 }
 0x146   :  { %v1197_v58 = vadd.f32 %v1786_v57, %v1722_v42  ;;  %v1188_v60 = vpop.f32.mrb[41].mxu0  ;;  %v1727_v61 = vpop.f32.mrb[41].mxu1 }
 0x147   :  { %v1189_v62 = vadd.f32 %v1716_v23, %v1188_v60  ;;  %v1787_v63 = vpop.f32.mrb[42].mxu0  ;;  %v1728_v1 = vadd.f32 %v1727_v61, %v1726_v53  ;;  %v1729_v2 = vpop.f32.mrb[42].mxu1 }
 0x148   :  { %v1221_v35 = vmax.f32 %v938_v12, %v1197_v58  ;;  %v1200_v3 = vadd.f32 %v1787_v63, %v1725_v51  ;;  %v1191_v47 = vpop.f32.mrb[43].mxu0  ;;  %v1730_v52 = vpop.f32.mrb[43].mxu1 }
 0x149   :  { %v1219_v4 = vmax.f32 %v936_v28, %v1189_v62  ;;  %v1192_v5 = vadd.f32 %v1719_v31, %v1191_v47  ;;  %v1731_v9 = vadd.f32 %v1730_v52, %v1729_v2  ;;  %v1268_v42 = vpop.permute.xlu0 %1267 }
 0x14a   :  { %v1277_v6 = vadd.f32 %v1248_v55, %v1221_v35  ;;  %v1222_v8 = vmax.f32 %v939_v30, %v1200_v3  ;;  %v1263_v30 = vpop.permute.xlu1 %1262 }
 0x14b   :  { %v1275_v10 = vadd.f32 %v1238_v36, %v1219_v4  ;;  %v1220_v11 = vmax.f32 %v937_v32, %v1192_v5 }
 0x14c   :  { %v1285_v13 = vmax.f32 %v1277_v6, 0.0  ;;  %v1278_v14 = vadd.f32 %v1253_v40, %v1222_v8 }
 0x14d   :  { %v1283_v7 = vmax.f32 %v1275_v10, 0.0  ;;  %v1276_v16 = vadd.f32 %v1243_v56, %v1220_v11  ;;  %v1790_v59 = vpop.f32.mrb[44].mxu0  ;;  %v1732_v19 = vpop.f32.mrb[44].mxu1 }
 0x14e   :  { %v1554_v17 = vpack.c.bf16 %v1285_v13, %v1285_v13  ;;  %v1286_v18 = vmax.f32 %v1278_v14, 0.0  ;;  %v1204_v21 = vpop.f32.mrb[45].mxu0  ;;  %v1733_v23 = vpop.f32.mrb[45].mxu1 }
 0x14f   :  { %v1552_v22 = vpack.c.bf16 %v1283_v7, %v1283_v7  ;;  %v1284_v12 = vmax.f32 %v1276_v16, 0.0  ;;  %v1205_v24 = vadd.f32 %v1728_v1, %v1204_v21  ;;  %v1791_v25 = vpop.f32.mrb[46].mxu0  ;;  %v1734_v28 = vadd.f32 %v1733_v23, %v1732_v19  ;;  %v1735_v0 = vpop.f32.mrb[46].mxu1 }
 0x150   :  { %1326 = vst.msk [vmem:[%s2351_s3 + $0x8] sm:$0xf] %vm1323_vm1, %v1554_v17  ;;  %v1555_v27 = vpack.c.bf16 %v1286_v18, %v1286_v18  ;;  %v1207_v29 = vpop.f32.mrb[47].mxu0  ;;  %v1736_v33 = vpop.f32.mrb[47].mxu1 }
 0x151   :  { %1324 = vst.msk [vmem:[%s2351_s3] sm:$0xf] %vm1323_vm1, %v1552_v22  ;;  %v1553_v31 = vpack.c.bf16 %v1284_v12, %v1284_v12  ;;  %v1223_v32 = vmax.f32 %v940_v48, %v1205_v24  ;;  %v1208_v36 = vadd.f32 %v1731_v9, %v1207_v29  ;;  %v1213_v34 = vadd.f32 %v1790_v59, %v1734_v28  ;;  %v1273_v26 = vpop.permute.xlu1 %1272 }
 0x152   :  { %1327 = vst.msk [vmem:[%s2351_s3 + $0xc] sm:$0xf] %vm1323_vm1, %v1555_v27  ;;  %v1737_v37 = vadd.f32 %v1736_v33, %v1735_v0 }
 0x153   :  { %1325 = vst.msk [vmem:[%s2351_s3 + $0x4] sm:$0xf] %vm1323_vm1, %v1553_v31  ;;  %v1279_v39 = vadd.f32 %v1258_v15, %v1223_v32  ;;  %v1224_v20 = vmax.f32 %v2311_v54, %v1208_v36  ;;  %v1225_v41 = vmax.f32 %v2307_v43, %v1213_v34 }
 0x154   :  { %v1216_v38 = vadd.f32 %v1791_v25, %v1737_v37 }
 0x155   :  { %v1287_v44 = vmax.f32 %v1279_v39, 0.0  ;;  %v1280_v45 = vadd.f32 %v1263_v30, %v1224_v20  ;;  %v1281_v46 = vadd.f32 %v1268_v42, %v1225_v41 }
 0x156   :  { %v1226_v48 = vmax.f32 %v2309_v50, %v1216_v38 }
 0x157   :  { %v1556_v49 = vpack.c.bf16 %v1287_v44, %v1287_v44  ;;  %v1288_v51 = vmax.f32 %v1280_v45, 0.0  ;;  %v1289_v55 = vmax.f32 %v1281_v46, 0.0 }
 0x158   :  { %v1282_v56 = vadd.f32 %v1273_v26, %v1226_v48 }
 0x159   :  { %1328 = vst.msk [vmem:[%s2351_s3 + $0x10] sm:$0xf] %vm1323_vm1, %v1556_v49  ;;  %v1557_v54 = vpack.c.bf16 %v1288_v51, %v1288_v51  ;;  %v1558_v57 = vpack.c.bf16 %v1289_v55, %v1289_v55 }
 0x15a   :  { %v1290_v43 = vmax.f32 %v1282_v56, 0.0 }
 0x15b   :  { %1329 = vst.msk [vmem:[%s2351_s3 + $0x14] sm:$0xf] %vm1323_vm1, %v1557_v54  ;;  %1330 = vst.msk [vmem:[%s2351_s3 + $0x18] sm:$0xf] %vm1323_vm1, %v1558_v57 }
 0x15c   :  { %v1559_v50 = vpack.c.bf16 %v1290_v43, %v1290_v43 }
 0x15e   :  { %1331 = vst.msk [vmem:[%s2351_s3 + $0x1c] sm:$0xf] %vm1323_vm1, %v1559_v50 }

// kernel: convnet_model1_forward.8
= control target key start
LH: loop header
LB: loop body
LE: loop exit
PB: predicated region body
PF: predicated region fallthrough
CT: control target
= control target key end

     0   :  { %vm551_vm0 = vcmask 523264   ;;  %vm2847_vm1 = vcmask 27648   ;;  %s5718_s0 = inlined_call_operand.vmem [shape: bf16[4,576,4], index: 0, kind: input, shape index: {}]   ;;  %s5719_s1 = inlined_call_operand.vmem [shape: bf16[128,576], index: 1, kind: input, shape index: {}]   ;;  %s5720_s2 = inlined_call_operand.vmem [shape: f32[128,1], index: 2, kind: input, shape index: {}]   ;;  %s5721_s3 = inlined_call_operand.vmem [shape: bf16[128,4], index: 3, kind: output, shape index: {}]  }
   0x1   :  { %v3991_v0 = vld [vmem:[%s5718_s0 + $0x40] sm:$0xff]   ;;  %v3995_v4 = vld [vmem:[%s5718_s0 + $0x48] sm:$0xff]   ;;  %v3999_v8 = vld [vmem:[%s5718_s0 + $0x50] sm:$0xff]  }
   0x2   :  { %v3992_v1 = vld [vmem:[%s5718_s0 + $0xc0] sm:$0xff]   ;;  %3332 = vmatprep.subr.bf16.mxu0 %v3991_v0  ;;  %v3996_v5 = vld [vmem:[%s5718_s0 + $0xc8] sm:$0xff]   ;;  %v4000_v9 = vld [vmem:[%s5718_s0 + $0xd0] sm:$0xff]  }
   0x3   :  { %v3993_v2 = vld [vmem:[%s5718_s0] sm:$0xff]   ;;  %3396 = vmatprep.subr.bf16.mxu1 %v3992_v1  ;;  %v3997_v6 = vld [vmem:[%s5718_s0 + $0x8] sm:$0xff]   ;;  %v4001_v10 = vld [vmem:[%s5718_s0 + $0x10] sm:$0xff]  }
   0x4   :  { %v3994_v3 = vld [vmem:[%s5718_s0 + $0x80] sm:$0xff]   ;;  %3333 = vmatpush3.bf16.msra.mxu0 %v3993_v2  ;;  %v3998_v7 = vld [vmem:[%s5718_s0 + $0x88] sm:$0xff]   ;;  %v4002_v11 = vld [vmem:[%s5718_s0 + $0x90] sm:$0xff]  }
   0x5   :  { %3397 = vmatpush3.bf16.msra.mxu1 %v3994_v3  ;;  %3334 = vmatprep.subr.bf16.mxu0 %v3995_v4  ;;  %v4003_v12 = vld [vmem:[%s5718_s0 + $0x58] sm:$0xff]   ;;  %v4007_v16 = vld [vmem:[%s5718_s0 + $0x60] sm:$0xff]   ;;  %v4011_v20 = vld [vmem:[%s5718_s0 + $0x68] sm:$0xff]  }
   0x6   :  { %3398 = vmatprep.subr.bf16.mxu1 %v3996_v5  ;;  %v4004_v13 = vld [vmem:[%s5718_s0 + $0xd8] sm:$0xff]   ;;  %v4008_v17 = vld [vmem:[%s5718_s0 + $0xe0] sm:$0xff]   ;;  %v4012_v21 = vld [vmem:[%s5718_s0 + $0xe8] sm:$0xff]  }
   0x7   :  { %v4005_v14 = vld [vmem:[%s5718_s0 + $0x18] sm:$0xff]   ;;  %v4009_v18 = vld [vmem:[%s5718_s0 + $0x20] sm:$0xff]   ;;  %v4013_v22 = vld [vmem:[%s5718_s0 + $0x28] sm:$0xff]  }
   0x8   :  { %3335 = vmatpush3.bf16.msra.mxu0 %v3997_v6  ;;  %v4006_v15 = vld [vmem:[%s5718_s0 + $0x98] sm:$0xff]   ;;  %v4010_v19 = vld [vmem:[%s5718_s0 + $0xa0] sm:$0xff]   ;;  %v4014_v23 = vld [vmem:[%s5718_s0 + $0xa8] sm:$0xff]  }
   0x9   :  { %3399 = vmatpush3.bf16.msra.mxu1 %v3998_v7  ;;  %3336 = vmatprep.subr.bf16.mxu0 %v3999_v8  ;;  %v4015_v24 = vld [vmem:[%s5718_s0 + $0x70] sm:$0xff]   ;;  %v4019_v28 = vld [vmem:[%s5718_s0 + $0x78] sm:$0xff]   ;;  %v4356_v33 = vld [vmem:[%s5719_s1 + $0xc] ss:$20 sps:$4 sm:$0xff]  }
   0xa   :  { %3400 = vmatprep.subr.bf16.mxu1 %v4000_v9  ;;  %v4016_v25 = vld [vmem:[%s5718_s0 + $0xf0] sm:$0xff]   ;;  %v4020_v29 = vld [vmem:[%s5718_s0 + $0xf8] sm:$0xff]   ;;  %705 = vmatprep.mubr.bf16.mxu1 %v4356_v33  ;;  %v4029_v36 = vld [vmem:[%s5718_s0 + $0x100] sm:$0xff]  }
   0xb   :  { %v4017_v26 = vld [vmem:[%s5718_s0 + $0x30] sm:$0xff]   ;;  %v4021_v30 = vld [vmem:[%s5718_s0 + $0x38] sm:$0xff]   ;;  %v4030_v37 = vld [vmem:[%s5718_s0 + $0x160] sm:$0xff]  }
   0xc   :  { %3337 = vmatpush3.bf16.msra.mxu0 %v4001_v10  ;;  %v4018_v27 = vld [vmem:[%s5718_s0 + $0xb0] sm:$0xff]   ;;  %v4022_v31 = vld [vmem:[%s5718_s0 + $0xb8] sm:$0xff]   ;;  %v4031_v38 = vld [vmem:[%s5718_s0 + $0x120] sm:$0xff]  }
   0xd   :  { %3401 = vmatpush3.bf16.msra.mxu1 %v4002_v11  ;;  %3338 = vmatprep.subr.bf16.mxu0 %v4003_v12  ;;  %v4351_v32 = vld [vmem:[%s5719_s1 + $0x4] ss:$20 sps:$4 sm:$0xff]   ;;  %v4362_v34 = vld [vmem:[%s5719_s1] ss:$20 sps:$4 sm:$0xff]   ;;  %v4367_v35 = vld [vmem:[%s5719_s1 + $0x8] ss:$20 sps:$4 sm:$0xff]  }
   0xe   :  { %3402 = vmatprep.subr.bf16.mxu1 %v4004_v13  ;;  %608 = vmatprep.mubr.bf16.mxu0 %v4351_v32  ;;  %v4384_v39 = vld [vmem:[%s5719_s1 + $0x2c] ss:$20 sps:$4 sm:$0xff]   ;;  %v4389_v40 = vld [vmem:[%s5719_s1 + $0x34] ss:$20 sps:$4 sm:$0xff]   ;;  %v4400_v42 = vld [vmem:[%s5719_s1 + $0x30] ss:$20 sps:$4 sm:$0xff]  }
   0xf   :  { %v4394_v41 = vld [vmem:[%s5719_s1 + $0x28] ss:$20 sps:$4 sm:$0xff]   ;;  %v4429_v48 = vld [vmem:[%s5719_s1 + $0x50] ss:$20 sps:$4 sm:$0xff]   ;;  %v4434_v49 = vld [vmem:[%s5719_s1 + $0x58] ss:$20 sps:$4 sm:$0xff]  }
  0x10   :  { %3339 = vmatpush3.bf16.msra.mxu0 %v4005_v14  ;;  %v4038_v43 = vld [vmem:[%s5718_s0 + $0x168] sm:$0xff]   ;;  %v4419_v46 = vld [vmem:[%s5719_s1 + $0x5c] ss:$20 sps:$4 sm:$0xff]   ;;  %v4450_v53 = vld [vmem:[%s5719_s1 + $0x84] ss:$20 sps:$4 sm:$0xff]  }
  0x11   :  { %3403 = vmatpush3.bf16.msra.mxu1 %v4006_v15  ;;  %3340 = vmatprep.subr.bf16.mxu0 %v4007_v16  ;;  %v4039_v44 = vld [vmem:[%s5718_s0 + $0x128] sm:$0xff]   ;;  %v4047_v50 = vld [vmem:[%s5718_s0 + $0x170] sm:$0xff]   ;;  %v4055_v54 = vld [vmem:[%s5718_s0 + $0x178] sm:$0xff]  }
  0x12   :  { %3404 = vmatprep.subr.bf16.mxu1 %v4008_v17  ;;  %v4412_v45 = vld [vmem:[%s5719_s1 + $0x54] ss:$20 sps:$4 sm:$0xff]   ;;  %v4445_v52 = vld [vmem:[%s5719_s1 + $0x7c] ss:$20 sps:$4 sm:$0xff]   ;;  %v4465_v56 = vld [vmem:[%s5719_s1 + $0x78] ss:$20 sps:$4 sm:$0xff]  }
  0x13   :  { %v4046_v47 = vld [vmem:[%s5718_s0 + $0x108] sm:$0xff]   ;;  %v4048_v51 = vld [vmem:[%s5718_s0 + $0x130] sm:$0xff]   ;;  %v4056_v55 = vld [vmem:[%s5718_s0 + $0x138] sm:$0xff]  }
  0x14   :  { %3341 = vmatpush3.bf16.msra.mxu0 %v4009_v18  ;;  %v4470_v57 = vld [vmem:[%s5719_s1 + $0x80] ss:$20 sps:$4 sm:$0xff]   ;;  %v4475_v58 = vld [vmem:[%s5719_s1 + $0xa4] ss:$20 sps:$4 sm:$0xff]   ;;  %v4072_v63 = vld [vmem:[%s5718_s0 + $0x188] sm:$0xff]  }
  0x15   :  { %3405 = vmatpush3.bf16.msra.mxu1 %v4010_v19  ;;  %3342 = vmatprep.subr.bf16.mxu0 %v4011_v20  ;;  %v4480_v59 = vld [vmem:[%s5719_s1 + $0xac] ss:$20 sps:$4 sm:$0xff]   ;;  %v4063_v60 = vld [vmem:[%s5718_s0 + $0x110] sm:$0xff]   ;;  %v4509_v2 = vld [vmem:[%s5719_s1 + $0xa8] ss:$20 sps:$4 sm:$0xff]  }
  0x16   :  { %3406 = vmatprep.subr.bf16.mxu1 %v4012_v21  ;;  %v4064_v61 = vld [vmem:[%s5718_s0 + $0x180] sm:$0xff]   ;;  %v4073_v0 = vld [vmem:[%s5718_s0 + $0x148] sm:$0xff]   ;;  %v4080_v5 = vld [vmem:[%s5718_s0 + $0x118] sm:$0xff]  }
  0x17   :  { %v4065_v62 = vld [vmem:[%s5718_s0 + $0x140] sm:$0xff]   ;;  %v4519_v4 = vld [vmem:[%s5719_s1 + $0xd4] ss:$20 sps:$4 sm:$0xff]   ;;  %v4552_v11 = vld [vmem:[%s5719_s1 + $0xfc] ss:$20 sps:$4 sm:$0xff]  }
  0x18   :  { %3343 = vmatpush3.bf16.msra.mxu0 %v4013_v22  ;;  %v4504_v1 = vld [vmem:[%s5719_s1 + $0xa0] ss:$20 sps:$4 sm:$0xff]   ;;  %v4537_v8 = vld [vmem:[%s5719_s1 + $0xc8] ss:$20 sps:$4 sm:$0xff]   ;;  %v4542_v9 = vld [vmem:[%s5719_s1 + $0xd0] ss:$20 sps:$4 sm:$0xff]  }
  0x19   :  { %3407 = vmatpush3.bf16.msra.mxu1 %v4014_v23  ;;  %3344 = vmatprep.subr.bf16.mxu0 %v4015_v24  ;;  %v4514_v3 = vld [vmem:[%s5719_s1 + $0xcc] ss:$20 sps:$4 sm:$0xff]   ;;  %v4081_v6 = vld [vmem:[%s5718_s0 + $0x190] sm:$0xff]   ;;  %v4089_v12 = vld [vmem:[%s5718_s0 + $0x198] sm:$0xff]  }
  0x1a   :  { %3408 = vmatprep.subr.bf16.mxu1 %v4016_v25  ;;  %v4082_v7 = vld [vmem:[%s5718_s0 + $0x150] sm:$0xff]   ;;  %v4090_v13 = vld [vmem:[%s5718_s0 + $0x158] sm:$0xff]   ;;  %v4093_v14 = vld [vmem:[%s5718_s0 + $0x1e0] sm:$0xff]  }
  0x1b   :  { %v4547_v10 = vld [vmem:[%s5719_s1 + $0xf4] ss:$20 sps:$4 sm:$0xff]   ;;  %v4570_v15 = vld [vmem:[%s5719_s1 + $0xf0] ss:$20 sps:$4 sm:$0xff]   ;;  %v4575_v16 = vld [vmem:[%s5719_s1 + $0xf8] ss:$20 sps:$4 sm:$0xff]  }
  0x1c   :  { %3345 = vmatpush3.bf16.msra.mxu0 %v4017_v26  ;;  %v4096_v17 = vld [vmem:[%s5718_s0 + $0x220] sm:$0xff]   ;;  %v4583_v18 = vld [vmem:[%s5719_s1 + $0x11c] ss:$20 sps:$4 sm:$0xff]   ;;  %v4597_v20 = vld [vmem:[%s5719_s1 + $0x118] ss:$20 sps:$4 sm:$0xff]  }
  0x1d   :  { %3409 = vmatpush3.bf16.msra.mxu1 %v4018_v27  ;;  %3346 = vmatprep.subr.bf16.mxu0 %v4019_v28  ;;  %v4588_v19 = vld [vmem:[%s5719_s1 + $0x124] ss:$20 sps:$4 sm:$0xff]   ;;  %v4602_v21 = vld [vmem:[%s5719_s1 + $0x120] ss:$20 sps:$4 sm:$0xff]   ;;  %v4095_v25 = vld [vmem:[%s5718_s0 + $0x1e8] sm:$0xff]  }
  0x1e   :  { %3410 = vmatprep.subr.bf16.mxu1 %v4020_v29  ;;  %v4607_v22 = vld [vmem:[%s5719_s1 + $0x10] ss:$20 sps:$4 sm:$0xff]   ;;  %v4617_v23 = vld [vmem:[%s5719_s1 + $0x38] ss:$20 sps:$4 sm:$0xff]   ;;  %v4628_v26 = vld [vmem:[%s5719_s1 + $0x60] ss:$20 sps:$4 sm:$0xff]  }
  0x1f   :  { %v4094_v24 = vld [vmem:[%s5718_s0 + $0x1a0] sm:$0xff]   ;;  %v4109_v27 = vld [vmem:[%s5718_s0 + $0x228] sm:$0xff]   ;;  %v4100_v29 = vld [vmem:[%s5718_s0 + $0x1f0] sm:$0xff]  }
  0x20   :  { %3347 = vmatpush3.bf16.msra.mxu0 %v4021_v30  ;;  %v4097_v28 = vld [vmem:[%s5718_s0 + $0x1a8] sm:$0xff]   ;;  %v4119_v30 = vld [vmem:[%s5718_s0 + $0x230] sm:$0xff]  }
  0x21   :  { %3411 = vmatpush3.bf16.msra.mxu1 %v4022_v31  ;;  %3892 = vmatprep.subr.bf16.mxu0 %v4029_v36  ;;  %v4651_v31 = vld [vmem:[%s5719_s1 + $0x88] ss:$20 sps:$4 sm:$0xff]  }
  0x22   :  { %3472 = vmatprep.subr.bf16.mxu1 %v4030_v37  ;;  %v4124_v37 = vld [vmem:[%s5718_s0 + $0x238] sm:$0xff]  }
  0x23   :  { %609 = vmatmul.mubr.bf16.vlgmr.msra.gmra.mrb[0].mxu0 %v4362_v34 }
  0x24   :  { %706 = vmatmul.mubr.bf16.vlgmr.msra.gmra.mrb[0].mxu1 %v4367_v35  ;;  %3893 = vmatpush3.bf16.msra.mxu0 %v4029_v36  ;;  %v4102_v36 = vld [vmem:[%s5718_s0 + $0x1f8] sm:$0xff]  }
  0x25   :  { %3473 = vmatpush3.bf16.msra.mxu1 %v4031_v38  ;;  %616 = vmatprep.mubr.bf16.mxu0 %v4384_v39  ;;  %v4103_v38 = vld [vmem:[%s5718_s0 + $0x1b8] sm:$0xff]  }
  0x26   :  { %713 = vmatprep.mubr.bf16.mxu1 %v4389_v40  ;;  %3474 = vmatprep.subr.bf16.mxu1 %v4038_v43  ;;  %v4107_v43 = vld [vmem:[%s5718_s0 + $0x1c0] sm:$0xff]  }
  0x27   :  { %3894 = vmatprep.subr.bf16.mxu0 %v4046_v47 }
  0x28   :  { %3895 = vmatpush3.bf16.msra.mxu0 %v4046_v47  ;;  %v4128_v47 = vld [vmem:[%s5718_s0 + $0x300] sm:$0xff]  }
  0x29   :  { %3475 = vmatpush3.bf16.msra.mxu1 %v4039_v44  ;;  %3896 = vmatprep.subr.bf16.mxu0 %v4063_v60  ;;  %v4690_v44 = vld [vmem:[%s5719_s1 + $0x100] ss:$20 sps:$4 sm:$0xff]  }
  0x2a   :  { %3476 = vmatprep.subr.bf16.mxu1 %v4047_v50  ;;  %v4110_v50 = vld [vmem:[%s5718_s0 + $0x1c8] sm:$0xff]  }
  0x2b   :  { %617 = vmatmul.mubr.bf16.gmra.mrb[4].mxu0 %v4394_v41 }
  0x2c   :  { %714 = vmatmul.mubr.bf16.gmra.mrb[4].mxu1 %v4400_v42  ;;  %624 = vmatprep.mubr.bf16.mxu0 %v4412_v45 }
  0x2d   :  { %721 = vmatprep.mubr.bf16.mxu1 %v4419_v46  ;;  %3477 = vmatpush3.bf16.msra.mxu1 %v4048_v51  ;;  %v4113_v51 = vld [vmem:[%s5718_s0 + $0x210] sm:$0xff]  }
  0x2e   :  { %3478 = vmatprep.subr.bf16.mxu1 %v4055_v54  ;;  %3897 = vmatpush3.bf16.msra.mxu0 %v4063_v60  ;;  %v4114_v54 = vld [vmem:[%s5718_s0 + $0x1d0] sm:$0xff]   ;;  %v4117_v60 = vld [vmem:[%s5718_s0 + $0x280] sm:$0xff]  }
  0x2f   :  { %3898 = vmatprep.subr.bf16.mxu0 %v4080_v5 }
  0x31   :  { %3479 = vmatpush3.bf16.msra.mxu1 %v4056_v55  ;;  %v4116_v55 = vld [vmem:[%s5718_s0 + $0x1d8] sm:$0xff]  }
  0x32   :  { %3480 = vmatprep.subr.bf16.mxu1 %v4064_v61  ;;  %3899 = vmatpush3.bf16.msra.mxu0 %v4080_v5  ;;  %v4118_v61 = vld [vmem:[%s5718_s0 + $0x240] sm:$0xff]  }
  0x33   :  { %625 = vmatmul.mubr.bf16.gmra.mrb[8].mxu0 %v4429_v48  ;;  %3536 = vmatprep.subr.bf16.mxu0 %v4093_v14  ;;  %v4129_v5 = vld [vmem:[%s5718_s0 + $0x260] sm:$0xff]   ;;  %v4132_v14 = vld [vmem:[%s5718_s0 + $0x2c8] sm:$0xff]  }
  0x34   :  { %722 = vmatmul.mubr.bf16.gmra.mrb[8].mxu1 %v4434_v49  ;;  %632 = vmatprep.mubr.bf16.mxu0 %v4445_v52 }
  0x35   :  { %729 = vmatprep.mubr.bf16.mxu1 %v4450_v53  ;;  %3481 = vmatpush3.bf16.msra.mxu1 %v4065_v62  ;;  %v4122_v62 = vld [vmem:[%s5718_s0 + $0x290] sm:$0xff]  }
  0x36   :  { %3482 = vmatprep.subr.bf16.mxu1 %v4072_v63  ;;  %v4125_v63 = vld [vmem:[%s5718_s0 + $0x298] sm:$0xff]  }
  0x39   :  { %3483 = vmatpush3.bf16.msra.mxu1 %v4073_v0  ;;  %v4127_v0 = vld [vmem:[%s5718_s0 + $0x2a0] sm:$0xff]  }
  0x3a   :  { %3484 = vmatprep.subr.bf16.mxu1 %v4081_v6  ;;  %v4139_v6 = vld [vmem:[%s5718_s0 + $0x2b0] sm:$0xff]  }
  0x3b   :  { %633 = vmatmul.mubr.bf16.gmra.mrb[12].mxu0 %v4465_v56 }
  0x3c   :  { %730 = vmatmul.mubr.bf16.gmra.mrb[12].mxu1 %v4470_v57  ;;  %640 = vmatprep.mubr.bf16.mxu0 %v4475_v58 }
  0x3d   :  { %737 = vmatprep.mubr.bf16.mxu1 %v4480_v59  ;;  %3485 = vmatpush3.bf16.msra.mxu1 %v4082_v7  ;;  %v4141_v7 = vld [vmem:[%s5718_s0 + $0x270] sm:$0xff]  }
  0x3e   :  { %3486 = vmatprep.subr.bf16.mxu1 %v4089_v12  ;;  %v4151_v12 = vld [vmem:[%s5718_s0 + $0x340] sm:$0xff]  }
  0x41   :  { %3487 = vmatpush3.bf16.msra.mxu1 %v4090_v13  ;;  %v4130_v13 = vld [vmem:[%s5718_s0 + $0x2c0] sm:$0xff]  }
  0x42   :  { %3916 = vmatprep.subr.bf16.mxu1 %v4096_v17 }
  0x43   :  { %641 = vmatmul.mubr.bf16.gmra.mrb[16].mxu0 %v4504_v1 }
  0x44   :  { %738 = vmatmul.mubr.bf16.gmra.mrb[16].mxu1 %v4509_v2  ;;  %648 = vmatprep.mubr.bf16.mxu0 %v4514_v3 }
  0x45   :  { %745 = vmatprep.mubr.bf16.mxu1 %v4519_v4 }
  0x4b   :  { %649 = vmatmul.mubr.bf16.gmra.mrb[20].mxu0 %v4537_v8 }
  0x4c   :  { %746 = vmatmul.mubr.bf16.gmra.mrb[20].mxu1 %v4542_v9  ;;  %656 = vmatprep.mubr.bf16.mxu0 %v4547_v10 }
  0x4d   :  { %753 = vmatprep.mubr.bf16.mxu1 %v4552_v11 }
  0x53   :  { %657 = vmatmul.mubr.bf16.gmra.mrb[24].mxu0 %v4570_v15 }
  0x54   :  { %754 = vmatmul.mubr.bf16.gmra.mrb[24].mxu1 %v4575_v16  ;;  %664 = vmatprep.mubr.bf16.mxu0 %v4583_v18 }
  0x55   :  { %761 = vmatprep.mubr.bf16.mxu1 %v4588_v19 }
  0x5b   :  { %665 = vmatmul.mubr.bf16.gmra.mrb[28].mxu0 %v4597_v20 }
  0x5c   :  { %762 = vmatmul.mubr.bf16.gmra.mrb[28].mxu1 %v4602_v21  ;;  %3900 = vmatprep.mubr.msk.bf16.mxu0 %vm551_vm0, %v4607_v22 }
  0x5d   :  { %1188 = vmatprep.mubr.bf16.mxu1 %v4351_v32  ;;  %v4101_v32 = vld [vmem:[%s5718_s0 + $0x1b0] sm:$0xff]  }
  0x63   :  { %3901 = vmatmul.mubr.msk.bf16.vlgmr.msra.gmra.mrb[32].mxu0 %vm551_vm0, %v4617_v23 }
  0x64   :  { %1189 = vmatmul.mubr.bf16.vlgmr.msra.gmra.mrb[32].mxu1 %v4362_v34  ;;  %3537 = vmatpush3.bf16.msra.mxu0 %v4094_v24  ;;  %v4659_v34 = vld [vmem:[%s5719_s1 + $0xb0] ss:$20 sps:$4 sm:$0xff]  }
  0x65   :  { %3917 = vmatpush3.bf16.msra.mxu1 %v4096_v17  ;;  %3538 = vmatprep.subr.bf16.mxu0 %v4095_v25  ;;  %v4134_v17 = vld [vmem:[%s5718_s0 + $0x310] sm:$0xff]   ;;  %v4137_v25 = vld [vmem:[%s5718_s0 + $0x318] sm:$0xff]  }
  0x66   :  { %3904 = vmatprep.mubr.msk.bf16.mxu0 %vm551_vm0, %v4628_v26  ;;  %1196 = vmatprep.mubr.bf16.mxu1 %v4384_v39  ;;  %v4106_v39 = vld [vmem:[%s5718_s0 + $0x200] sm:$0xff]   ;;  %v4136_v24 = vld [vmem:[%s5718_s0 + $0x2d0] sm:$0xff]  }
  0x67   :  { %3918 = vmatprep.subr.bf16.mxu1 %v4109_v27 }
  0x68   :  { %3539 = vmatpush3.bf16.msra.mxu0 %v4097_v28  ;;  %v4140_v28 = vld [vmem:[%s5718_s0 + $0x320] sm:$0xff]  }
  0x69   :  { %3919 = vmatpush3.bf16.msra.mxu1 %v4109_v27  ;;  %3540 = vmatprep.subr.bf16.mxu0 %v4100_v29  ;;  %v4138_v27 = vld [vmem:[%s5718_s0 + $0x2d8] sm:$0xff]   ;;  %v4142_v29 = vld [vmem:[%s5718_s0 + $0x2e0] sm:$0xff]  }
  0x6a   :  { %3920 = vmatprep.subr.bf16.mxu1 %v4119_v30 }
  0x6b   :  { %3905 = vmatmul.mubr.msk.bf16.gmra.mrb[36].mxu0 %vm551_vm0, %v4651_v31 }
  0x6c   :  { %1197 = vmatmul.mubr.bf16.gmra.mrb[36].mxu1 %v4394_v41  ;;  %3541 = vmatpush3.bf16.msra.mxu0 %v4101_v32  ;;  %v4682_v41 = vld [vmem:[%s5719_s1 + $0xd8] ss:$20 sps:$4 sm:$0xff]  }
  0x6d   :  { %3908 = vmatprep.mubr.msk.bf16.mxu0 %vm551_vm0, %v4659_v34  ;;  %3542 = vmatprep.subr.bf16.mxu0 %v4102_v36  ;;  %v4144_v32 = vld [vmem:[%s5718_s0 + $0x2e8] sm:$0xff]   ;;  %v4146_v36 = vld [vmem:[%s5718_s0 + $0x330] sm:$0xff]  }
  0x6e   :  { %1204 = vmatprep.mubr.bf16.mxu1 %v4412_v45  ;;  %3921 = vmatpush3.bf16.msra.mxu1 %v4119_v30  ;;  %v4108_v45 = vld [vmem:[%s5718_s0 + $0x208] sm:$0xff]  }
  0x6f   :  { %3922 = vmatprep.subr.bf16.mxu1 %v4124_v37  ;;  %v4143_v30 = vld [vmem:[%s5718_s0 + $0x328] sm:$0xff]  }
  0x70   :  { %3543 = vmatpush3.bf16.msra.mxu0 %v4103_v38  ;;  %v4149_v38 = vld [vmem:[%s5718_s0 + $0x338] sm:$0xff]  }
  0x71   :  { %3544 = vmatprep.subr.bf16.mxu0 %v4106_v39  ;;  %v4150_v39 = vld [vmem:[%s5718_s0 + $0x2f8] sm:$0xff]  }
  0x72   :  { %3923 = vmatpush3.bf16.msra.mxu1 %v4124_v37  ;;  %v4148_v37 = vld [vmem:[%s5718_s0 + $0x2f0] sm:$0xff]  }
  0x73   :  { %3909 = vmatmul.mubr.msk.bf16.gmra.mrb[40].mxu0 %vm551_vm0, %v4682_v41  ;;  %3676 = vmatprep.subr.bf16.mxu1 %v4128_v47  ;;  %v4152_v47 = vld [vmem:[%s5718_s0 + $0x3a0] sm:$0xff]  }
  0x74   :  { %1205 = vmatmul.mubr.bf16.gmra.mrb[40].mxu1 %v4429_v48  ;;  %3545 = vmatpush3.bf16.msra.mxu0 %v4107_v43  ;;  %v4713_v48 = vld [vmem:[%s5719_s1 + $0x128] ss:$20 sps:$4 sm:$0xff]   ;;  %v4866_v43 = vld [vmem:[%s5719_s1 + $0x4] ss:$20 sps:$4 sm:$0xff]  }
  0x75   :  { %3912 = vmatprep.mubr.msk.bf16.mxu0 %vm551_vm0, %v4690_v44  ;;  %3546 = vmatprep.subr.bf16.mxu0 %v4108_v45  ;;  %v4872_v45 = vld [vmem:[%s5719_s1 + $0xc] ss:$20 sps:$4 sm:$0xff]  }
  0x76   :  { %1212 = vmatprep.mubr.bf16.mxu1 %v4445_v52  ;;  %v4115_v52 = vld [vmem:[%s5718_s0 + $0x218] sm:$0xff]  }
  0x78   :  { %3547 = vmatpush3.bf16.msra.mxu0 %v4110_v50  ;;  %v4153_v50 = vld [vmem:[%s5718_s0 + $0x360] sm:$0xff]  }
  0x79   :  { %3548 = vmatprep.subr.bf16.mxu0 %v4113_v51  ;;  %v4154_v51 = vld [vmem:[%s5718_s0 + $0x3a8] sm:$0xff]  }
  0x7b   :  { %3913 = vmatmul.mubr.msk.bf16.gmra.mrb[44].mxu0 %vm551_vm0, %v4713_v48 }
  0x7c   :  { %1213 = vmatmul.mubr.bf16.gmra.mrb[44].mxu1 %v4465_v56  ;;  %3549 = vmatpush3.bf16.msra.mxu0 %v4114_v54  ;;  %v4120_v56 = vld [vmem:[%s5718_s0 + $0x288] sm:$0xff]  }
  0x7d   :  { %1220 = vmatprep.mubr.bf16.mxu1 %v4475_v58  ;;  %3550 = vmatprep.subr.bf16.mxu0 %v4115_v52  ;;  %v4156_v54 = vld [vmem:[%s5718_s0 + $0x348] sm:$0xff]   ;;  %v4890_v52 = vld [vmem:[%s5719_s1] ss:$20 sps:$4 sm:$0xff]  }
  0x7e   :  { %1285 = vmatprep.mubr.bf16.mxu0 %v4356_v33  ;;  %v4121_v33 = vld [vmem:[%s5718_s0 + $0x248] sm:$0xff]  }
  0x80   :  { %3551 = vmatpush3.bf16.msra.mxu0 %v4116_v55  ;;  %v4896_v55 = vld [vmem:[%s5719_s1 + $0x8] ss:$20 sps:$4 sm:$0xff]  }
  0x81   :  { %3612 = vmatprep.subr.bf16.mxu0 %v4117_v60  ;;  %v4155_v60 = vld [vmem:[%s5718_s0 + $0x368] sm:$0xff]  }
  0x83   :  { %1286 = vmatmul.mubr.bf16.vlgmr.msra.gmra.mrb[48].mxu0 %v4367_v35  ;;  %v4123_v35 = vld [vmem:[%s5718_s0 + $0x250] sm:$0xff]  }
  0x84   :  { %1221 = vmatmul.mubr.bf16.gmra.mrb[48].mxu1 %v4504_v1  ;;  %3613 = vmatpush3.bf16.msra.mxu0 %v4118_v61  ;;  %v4905_v61 = vld [vmem:[%s5719_s1 + $0x2c] ss:$20 sps:$4 sm:$0xff]  }
  0x85   :  { %1228 = vmatprep.mubr.bf16.mxu1 %v4514_v3  ;;  %1293 = vmatprep.mubr.bf16.mxu0 %v4389_v40  ;;  %v4126_v40 = vld [vmem:[%s5718_s0 + $0x258] sm:$0xff]  }
  0x86   :  { %3614 = vmatprep.subr.bf16.mxu0 %v4120_v56  ;;  %v4911_v56 = vld [vmem:[%s5719_s1 + $0x34] ss:$20 sps:$4 sm:$0xff]  }
  0x88   :  { %3615 = vmatpush3.bf16.msra.mxu0 %v4121_v33  ;;  %v4157_v33 = vld [vmem:[%s5718_s0 + $0x3b0] sm:$0xff]  }
  0x89   :  { %3616 = vmatprep.subr.bf16.mxu0 %v4122_v62  ;;  %v4161_v62 = vld [vmem:[%s5718_s0 + $0x350] sm:$0xff]  }
  0x8b   :  { %1294 = vmatmul.mubr.bf16.gmra.mrb[52].mxu0 %v4400_v42  ;;  %v4133_v42 = vld [vmem:[%s5718_s0 + $0x2a8] sm:$0xff]  }
  0x8c   :  { %1229 = vmatmul.mubr.bf16.gmra.mrb[52].mxu1 %v4537_v8  ;;  %1301 = vmatprep.mubr.bf16.mxu0 %v4419_v46  ;;  %v4135_v46 = vld [vmem:[%s5718_s0 + $0x268] sm:$0xff]  }
  0x8d   :  { %1236 = vmatprep.mubr.bf16.mxu1 %v4547_v10  ;;  %3617 = vmatpush3.bf16.msra.mxu0 %v4123_v35  ;;  %v4158_v35 = vld [vmem:[%s5718_s0 + $0x370] sm:$0xff]  }
  0x8e   :  { %3618 = vmatprep.subr.bf16.mxu0 %v4125_v63  ;;  %v4159_v63 = vld [vmem:[%s5718_s0 + $0x3b8] sm:$0xff]  }
  0x91   :  { %3619 = vmatpush3.bf16.msra.mxu0 %v4126_v40  ;;  %v4166_v40 = vld [vmem:[%s5718_s0 + $0x358] sm:$0xff]  }
  0x92   :  { %3620 = vmatprep.subr.bf16.mxu0 %v4127_v0  ;;  %v4932_v0 = vld [vmem:[%s5719_s1 + $0x28] ss:$20 sps:$4 sm:$0xff]  }
  0x93   :  { %1302 = vmatmul.mubr.bf16.gmra.mrb[56].mxu0 %v4434_v49  ;;  %v4145_v49 = vld [vmem:[%s5718_s0 + $0x2b8] sm:$0xff]  }
  0x94   :  { %1237 = vmatmul.mubr.bf16.gmra.mrb[56].mxu1 %v4570_v15  ;;  %1309 = vmatprep.mubr.bf16.mxu0 %v4450_v53  ;;  %v4147_v53 = vld [vmem:[%s5718_s0 + $0x278] sm:$0xff]  }
  0x95   :  { %1244 = vmatprep.mubr.bf16.mxu1 %v4583_v18  ;;  %3621 = vmatpush3.bf16.msra.mxu0 %v4129_v5  ;;  %v4938_v5 = vld [vmem:[%s5719_s1 + $0x30] ss:$20 sps:$4 sm:$0xff]  }
  0x96   :  { %3622 = vmatprep.subr.bf16.mxu0 %v4133_v42  ;;  %v4944_v42 = vld [vmem:[%s5719_s1 + $0x54] ss:$20 sps:$4 sm:$0xff]  }
  0x99   :  { %3623 = vmatpush3.bf16.msra.mxu0 %v4135_v46  ;;  %v4950_v46 = vld [vmem:[%s5719_s1 + $0x5c] ss:$20 sps:$4 sm:$0xff]  }
  0x9a   :  { %3624 = vmatprep.subr.bf16.mxu0 %v4139_v6  ;;  %v4160_v6 = vld [vmem:[%s5718_s0 + $0x378] sm:$0xff]  }
  0x9b   :  { %1310 = vmatmul.mubr.bf16.gmra.mrb[60].mxu0 %v4470_v57  ;;  %v4131_v57 = vld [vmem:[%s5718_s0 + $0x308] sm:$0xff]  }
  0x9c   :  { %1245 = vmatmul.mubr.bf16.gmra.mrb[60].mxu1 %v4597_v20  ;;  %1317 = vmatprep.mubr.bf16.mxu0 %v4480_v59 }
  0x9d   :  { %3924 = vmatprep.mubr.msk.bf16.mxu1 %vm551_vm0, %v4607_v22  ;;  %3625 = vmatpush3.bf16.msra.mxu0 %v4141_v7  ;;  %v4162_v7 = vld [vmem:[%s5718_s0 + $0x3c0] sm:$0xff]  }
  0x9e   :  { %3626 = vmatprep.subr.bf16.mxu0 %v4145_v49  ;;  %v4171_v49 = vld [vmem:[%s5718_s0 + $0x420] sm:$0xff]  }
  0xa1   :  { %3627 = vmatpush3.bf16.msra.mxu0 %v4147_v53  ;;  %v4163_v53 = vld [vmem:[%s5718_s0 + $0x380] sm:$0xff]  }
  0xa2   :  { %3940 = vmatprep.subr.bf16.mxu0 %v4151_v12 }
  0xa3   :  { %1318 = vmatmul.mubr.bf16.gmra.mrb[64].mxu0 %v4509_v2 }
  0xa4   :  { %3925 = vmatmul.mubr.msk.bf16.vlgmr.msra.gmra.mrb[64].mxu1 %vm551_vm0, %v4617_v23  ;;  %1325 = vmatprep.mubr.bf16.mxu0 %v4519_v4 }
  0xa5   :  { %3677 = vmatpush3.bf16.msra.mxu1 %v4130_v13  ;;  %3928 = vmatprep.mubr.msk.bf16.mxu1 %vm551_vm0, %v4628_v26  ;;  %v4971_v13 = vld [vmem:[%s5719_s1 + $0x50] ss:$20 sps:$4 sm:$0xff]  }
  0xa6   :  { %3678 = vmatprep.subr.bf16.mxu1 %v4131_v57  ;;  %v4977_v57 = vld [vmem:[%s5719_s1 + $0x58] ss:$20 sps:$4 sm:$0xff]  }
  0xa9   :  { %3679 = vmatpush3.bf16.msra.mxu1 %v4132_v14  ;;  %v4983_v14 = vld [vmem:[%s5719_s1 + $0x7c] ss:$20 sps:$4 sm:$0xff]  }
  0xaa   :  { %3680 = vmatprep.subr.bf16.mxu1 %v4134_v17  ;;  %v4989_v17 = vld [vmem:[%s5719_s1 + $0x84] ss:$20 sps:$4 sm:$0xff]  }
  0xab   :  { %1326 = vmatmul.mubr.bf16.gmra.mrb[68].mxu0 %v4542_v9 }
  0xac   :  { %3929 = vmatmul.mubr.msk.bf16.gmra.mrb[68].mxu1 %vm551_vm0, %v4651_v31  ;;  %1333 = vmatprep.mubr.bf16.mxu0 %v4552_v11 }
  0xad   :  { %3681 = vmatpush3.bf16.msra.mxu1 %v4136_v24  ;;  %3932 = vmatprep.mubr.msk.bf16.mxu1 %vm551_vm0, %v4659_v34  ;;  %v4165_v24 = vld [vmem:[%s5718_s0 + $0x388] sm:$0xff]  }
  0xae   :  { %3682 = vmatprep.subr.bf16.mxu1 %v4137_v25  ;;  %v4167_v25 = vld [vmem:[%s5718_s0 + $0x3d0] sm:$0xff]  }
  0xb1   :  { %3683 = vmatpush3.bf16.msra.mxu1 %v4138_v27  ;;  %v4168_v27 = vld [vmem:[%s5718_s0 + $0x390] sm:$0xff]  }
  0xb2   :  { %3684 = vmatprep.subr.bf16.mxu1 %v4140_v28  ;;  %v4169_v28 = vld [vmem:[%s5718_s0 + $0x3d8] sm:$0xff]  }
  0xb3   :  { %1334 = vmatmul.mubr.bf16.gmra.mrb[72].mxu0 %v4575_v16 }
  0xb4   :  { %3933 = vmatmul.mubr.msk.bf16.gmra.mrb[72].mxu1 %vm551_vm0, %v4682_v41  ;;  %1341 = vmatprep.mubr.bf16.mxu0 %v4588_v19 }
  0xb5   :  { %3685 = vmatpush3.bf16.msra.mxu1 %v4142_v29  ;;  %3936 = vmatprep.mubr.msk.bf16.mxu1 %vm551_vm0, %v4690_v44  ;;  %v5007_v29 = vld [vmem:[%s5719_s1 + $0x78] ss:$20 sps:$4 sm:$0xff]  }
  0xb6   :  { %3686 = vmatprep.subr.bf16.mxu1 %v4143_v30  ;;  %v5013_v30 = vld [vmem:[%s5719_s1 + $0x80] ss:$20 sps:$4 sm:$0xff]  }
  0xb9   :  { %3687 = vmatpush3.bf16.msra.mxu1 %v4144_v32  ;;  %v4170_v32 = vld [vmem:[%s5718_s0 + $0x398] sm:$0xff]  }
  0xba   :  { %3688 = vmatprep.subr.bf16.mxu1 %v4146_v36  ;;  %v4174_v36 = vld [vmem:[%s5718_s0 + $0x460] sm:$0xff]  }
  0xbb   :  { %1342 = vmatmul.mubr.bf16.gmra.mrb[76].mxu0 %v4602_v21 }
  0xbc   :  { %3937 = vmatmul.mubr.msk.bf16.gmra.mrb[76].mxu1 %vm551_vm0, %v4713_v48  ;;  %1784 = vmatprep.mubr.bf16.mxu0 %v4866_v43 }
  0xbd   :  { %3689 = vmatpush3.bf16.msra.mxu1 %v4148_v37  ;;  %1881 = vmatprep.mubr.bf16.mxu1 %v4872_v45 }
  0xbe   :  { %3690 = vmatprep.subr.bf16.mxu1 %v4149_v38 }
  0xc1   :  { %3691 = vmatpush3.bf16.msra.mxu1 %v4150_v39 }
  0xc2   :  { %3752 = vmatprep.subr.bf16.mxu1 %v4152_v47 }
  0xc3   :  { %1785 = vmatmul.mubr.bf16.vlgmr.msra.gmra.mrb[80].mxu0 %v4890_v52 }
  0xc4   :  { %1882 = vmatmul.mubr.bf16.vlgmr.msra.gmra.mrb[80].mxu1 %v4896_v55  ;;  %3941 = vmatpush3.bf16.msra.mxu0 %v4151_v12  ;;  %v4164_v12 = vld [vmem:[%s5718_s0 + $0x3c8] sm:$0xff]  }
  0xc5   :  { %3753 = vmatpush3.bf16.msra.mxu1 %v4153_v50  ;;  %1792 = vmatprep.mubr.bf16.mxu0 %v4905_v61 }
  0xc6   :  { %1889 = vmatprep.mubr.bf16.mxu1 %v4911_v56  ;;  %3754 = vmatprep.subr.bf16.mxu1 %v4154_v51 }
  0xc7   :  { %3942 = vmatprep.subr.bf16.mxu0 %v4156_v54 }
  0xc8   :  { %3943 = vmatpush3.bf16.msra.mxu0 %v4156_v54 }
  0xc9   :  { %3755 = vmatpush3.bf16.msra.mxu1 %v4155_v60  ;;  %3944 = vmatprep.subr.bf16.mxu0 %v4161_v62 }
  0xca   :  { %3756 = vmatprep.subr.bf16.mxu1 %v4157_v33 }
  0xcb   :  { %1793 = vmatmul.mubr.bf16.gmra.mrb[84].mxu0 %v4932_v0 }
  0xcc   :  { %1890 = vmatmul.mubr.bf16.gmra.mrb[84].mxu1 %v4938_v5  ;;  %1800 = vmatprep.mubr.bf16.mxu0 %v4944_v42 }
  0xcd   :  { %1897 = vmatprep.mubr.bf16.mxu1 %v4950_v46  ;;  %3757 = vmatpush3.bf16.msra.mxu1 %v4158_v35  ;;  %v2655_v35 = vld [vmem:[%s5720_s2] sm:$0xff] }
  0xce   :  { %3945 = vmatpush3.bf16.msra.mxu0 %v4161_v62  ;;  %3758 = vmatprep.subr.bf16.mxu1 %v4159_v63  ;;  %v2657_v62 = vld [vmem:[%s5720_s2 + $0x10] sm:$0xff] }
  0xcf   :  { %3946 = vmatprep.subr.bf16.mxu0 %v4166_v40 }
  0xd1   :  { %3759 = vmatpush3.bf16.msra.mxu1 %v4160_v6  ;;  %v4183_v6 = vld [vmem:[%s5718_s0 + $0x468] sm:$0xff]  }
  0xd2   :  { %3947 = vmatpush3.bf16.msra.mxu0 %v4166_v40  ;;  %3760 = vmatprep.subr.bf16.mxu1 %v4162_v7 }
  0xd3   :  { %3816 = vmatprep.subr.bf16.mxu0 %v4171_v49  ;;  %1801 = vmatmul.mubr.bf16.gmra.mrb[88].mxu0 %v4971_v13  ;;  %v4175_v49 = vld [vmem:[%s5718_s0 + $0x3e8] sm:$0xff]  }
  0xd4   :  { %1898 = vmatmul.mubr.bf16.gmra.mrb[88].mxu1 %v4977_v57  ;;  %1808 = vmatprep.mubr.bf16.mxu0 %v4983_v14 }
  0xd5   :  { %1905 = vmatprep.mubr.bf16.mxu1 %v4989_v17  ;;  %3761 = vmatpush3.bf16.msra.mxu1 %v4163_v53  ;;  %v4176_v53 = vld [vmem:[%s5718_s0 + $0x430] sm:$0xff]  }
  0xd6   :  { %3762 = vmatprep.subr.bf16.mxu1 %v4164_v12 }
  0xd9   :  { %3763 = vmatpush3.bf16.msra.mxu1 %v4165_v24  ;;  %v2656_v24 = vld [vmem:[%s5720_s2 + $0x8] sm:$0xff] }
  0xda   :  { %3764 = vmatprep.subr.bf16.mxu1 %v4167_v25 }
  0xdb   :  { %1809 = vmatmul.mubr.bf16.gmra.mrb[92].mxu0 %v5007_v29 }
  0xdc   :  { %1906 = vmatmul.mubr.bf16.gmra.mrb[92].mxu1 %v5013_v30  ;;  %1816 = vmatprep.mubr.bf16.mxu0 %v4475_v58 }
  0xdd   :  { %1913 = vmatprep.mubr.bf16.mxu1 %v4480_v59  ;;  %3765 = vmatpush3.bf16.msra.mxu1 %v4168_v27 }
  0xde   :  { %3766 = vmatprep.subr.bf16.mxu1 %v4169_v28 }
  0xe1   :  { %3767 = vmatpush3.bf16.msra.mxu1 %v4170_v32 }
  0xe2   :  { %3964 = vmatprep.subr.bf16.mxu1 %v4174_v36 }
  0xe3   :  { %1817 = vmatmul.mubr.bf16.gmra.mrb[96].mxu0 %v4504_v1 }
  0xe4   :  { %1914 = vmatmul.mubr.bf16.gmra.mrb[96].mxu1 %v4509_v2  ;;  %1824 = vmatprep.mubr.bf16.mxu0 %v4514_v3 }
  0xe5   :  { %1921 = vmatprep.mubr.bf16.mxu1 %v4519_v4 }
  0xeb   :  { %1825 = vmatmul.mubr.bf16.gmra.mrb[100].mxu0 %v4537_v8 }
  0xec   :  { %1922 = vmatmul.mubr.bf16.gmra.mrb[100].mxu1 %v4542_v9  ;;  %1832 = vmatprep.mubr.bf16.mxu0 %v4547_v10 }
  0xed   :  { %1929 = vmatprep.mubr.bf16.mxu1 %v4552_v11 }
  0xf3   :  { %1833 = vmatmul.mubr.bf16.gmra.mrb[104].mxu0 %v4570_v15 }
  0xf4   :  { %1930 = vmatmul.mubr.bf16.gmra.mrb[104].mxu1 %v4575_v16  ;;  %1840 = vmatprep.mubr.bf16.mxu0 %v4583_v18 }
  0xf5   :  { %1937 = vmatprep.mubr.bf16.mxu1 %v4588_v19 }
  0xf6   :  { %v3348_v58 = vpop.f32.mrb[0].mxu0 }
  0xf7   :  { %v3412_v59 = vpop.f32.mrb[0].mxu1  ;;  %v3349_v1 = vpop.f32.mrb[1].mxu0 }
  0xf8   :  { %v3413_v2 = vpop.f32.mrb[1].mxu1  ;;  %v3350_v3 = vadd.f32 %v3349_v1, %v3348_v58  ;;  %v3351_v8 = vpop.f32.mrb[2].mxu0  ;;  %v4177_v1 = vld [vmem:[%s5718_s0 + $0x3f0] sm:$0xff]  }
  0xf9   :  { %v3414_v4 = vadd.f32 %v3413_v2, %v3412_v59  ;;  %v3415_v9 = vpop.f32.mrb[2].mxu1  ;;  %v3352_v37 = vpop.f32.mrb[3].mxu0 }
  0xfa   :  { %v3416_v10 = vpop.f32.mrb[3].mxu1  ;;  %v3353_v38 = vadd.f32 %v3352_v37, %v3351_v8  ;;  %v4190_v37 = vld [vmem:[%s5718_s0 + $0x478] sm:$0xff]  }
  0xfb   :  { %v3417_v11 = vadd.f32 %v3416_v10, %v3415_v9  ;;  %v5036_v39 = vadd.f32 %v3414_v4, %v3350_v3  ;;  %1841 = vmatmul.mubr.bf16.gmra.mrb[108].mxu0 %v4597_v20  ;;  %v4172_v20 = vld [vmem:[%s5718_s0 + $0x3e0] sm:$0xff]   ;;  %v2660_v10 = vld [vmem:[%s5720_s2 + $0x28] sm:$0xff] }
  0xfc   :  { %1938 = vmatmul.mubr.bf16.gmra.mrb[108].mxu1 %v4602_v21  ;;  %3948 = vmatprep.mubr.msk.bf16.mxu0 %vm551_vm0, %v4607_v22  ;;  %v4173_v22 = vld [vmem:[%s5718_s0 + $0x428] sm:$0xff]  }
  0xfd   :  { %2380 = vmatprep.mubr.bf16.mxu1 %v4866_v43  ;;  %v5043_v15 = vadd.f32 %v3417_v11, %v3353_v38  ;;  %v4231_v43 = vmov 0   ;;  %v4179_v38 = vld [vmem:[%s5718_s0 + $0x3f8] sm:$0xff]  }
  0xfe   :  { %v3354_v16 = vpop.f32.mrb[4].mxu0  ;;  %3990 = vset.pattern.permute.xlu1 %v4231_v43  ;;  %3989 = vset.pattern.permute.xlu0 %v4231_v43 }
  0xff   :  { %v3418_v18 = vpop.f32.mrb[4].mxu1  ;;  %v3355_v19 = vpop.f32.mrb[5].mxu0  ;;  %2683 = vperm.xlu1 %3990, %v2657_v62   ;;  %2673 = vperm.xlu0 %3989, %v2655_v35   ;;  %v2661_v35 = vld [vmem:[%s5720_s2 + $0x30] sm:$0xff] }
 0x100   :  { %v3419_v47 = vpop.f32.mrb[5].mxu1  ;;  %v3356_v50 = vadd.f32 %v3355_v19, %v3354_v16  ;;  %v3357_v54 = vpop.f32.mrb[6].mxu0 }
 0x101   :  { %v3420_v51 = vadd.f32 %v3419_v47, %v3418_v18  ;;  %v3421_v60 = vpop.f32.mrb[6].mxu1  ;;  %v3358_v21 = vpop.f32.mrb[7].mxu0 }
 0x102   :  { %v3422_v33 = vpop.f32.mrb[7].mxu1  ;;  %v3359_v63 = vadd.f32 %v3358_v21, %v3357_v54 }
 0x103   :  { %v3423_v40 = vadd.f32 %v3422_v33, %v3421_v60  ;;  %v5060_v7 = vadd.f32 %v3420_v51, %v3356_v50  ;;  %3949 = vmatmul.mubr.msk.bf16.vlgmr.msra.gmra.mrb[112].mxu0 %vm551_vm0, %v4617_v23  ;;  %v4189_v23 = vld [vmem:[%s5718_s0 + $0x470] sm:$0xff]   ;;  %2678 = vperm.xlu0 %3989, %v2656_v24   ;;  %v4181_v60 = vld [vmem:[%s5718_s0 + $0x400] sm:$0xff]   ;;  %v4182_v33 = vld [vmem:[%s5718_s0 + $0x448] sm:$0xff]  }
 0x104   :  { %2381 = vmatmul.mubr.bf16.vlgmr.msra.gmra.mrb[112].mxu1 %v4890_v52  ;;  %3817 = vmatpush3.bf16.msra.mxu0 %v4172_v20  ;;  %v2658_v52 = vld [vmem:[%s5720_s2 + $0x18] sm:$0xff] }
 0x105   :  { %3965 = vmatpush3.bf16.msra.mxu1 %v4174_v36  ;;  %v5071_v12 = vadd.f32 %v3423_v40, %v3359_v63  ;;  %3818 = vmatprep.subr.bf16.mxu0 %v4173_v22  ;;  %v2664_v63 = vld [vmem:[%s5720_s2 + $0x48] sm:$0xff] }
 0x106   :  { %3952 = vmatprep.mubr.msk.bf16.mxu0 %vm551_vm0, %v4628_v26  ;;  %v3360_v25 = vpop.f32.mrb[8].mxu0  ;;  %2388 = vmatprep.mubr.bf16.mxu1 %v4905_v61  ;;  %v4178_v61 = vld [vmem:[%s5718_s0 + $0x438] sm:$0xff]   ;;  %v4184_v40 = vld [vmem:[%s5718_s0 + $0x408] sm:$0xff]  }
 0x107   :  { %v3424_v27 = vpop.f32.mrb[8].mxu1  ;;  %3966 = vmatprep.subr.bf16.mxu1 %v4183_v6  ;;  %v3361_v28 = vpop.f32.mrb[9].mxu0  ;;  %2688 = vperm.xlu1 %3990, %v2658_v52   ;;  %v2663_v52 = vld [vmem:[%s5720_s2 + $0x40] sm:$0xff] }
 0x108   :  { %v3425_v32 = vpop.f32.mrb[9].mxu1  ;;  %v3362_v26 = vadd.f32 %v3361_v28, %v3360_v25  ;;  %v3363_v58 = vpop.f32.mrb[10].mxu0  ;;  %3819 = vmatpush3.bf16.msra.mxu0 %v4175_v49  ;;  %v4186_v28 = vld [vmem:[%s5718_s0 + $0x410] sm:$0xff]  }
 0x109   :  { %v3426_v36 = vadd.f32 %v3425_v32, %v3424_v27  ;;  %v3427_v59 = vpop.f32.mrb[10].mxu1  ;;  %3967 = vmatpush3.bf16.msra.mxu1 %v4183_v6  ;;  %v3364_v2 = vpop.f32.mrb[11].mxu0  ;;  %3820 = vmatprep.subr.bf16.mxu0 %v4176_v53 }
 0x10a   :  { %v3428_v3 = vpop.f32.mrb[11].mxu1  ;;  %3968 = vmatprep.subr.bf16.mxu1 %v4189_v23  ;;  %v3365_v4 = vadd.f32 %v3364_v2, %v3363_v58  ;;  %v2665_v2 = vld [vmem:[%s5720_s2 + $0x50] sm:$0xff] }
 0x10b   :  { %v3429_v8 = vadd.f32 %v3428_v3, %v3427_v59  ;;  %v5091_v9 = vadd.f32 %v3426_v36, %v3362_v26  ;;  %3953 = vmatmul.mubr.msk.bf16.gmra.mrb[116].mxu0 %vm551_vm0, %v4651_v31  ;;  %v2659_v31 = vld [vmem:[%s5720_s2 + $0x20] sm:$0xff]  ;;  %2698 = vperm.xlu1 %3990, %v2660_v10   ;;  %v4187_v36 = vld [vmem:[%s5718_s0 + $0x458] sm:$0xff]   ;;  %v2668_v3 = vld [vmem:[%s5720_s2 + $0x68] sm:$0xff] }
 0x10c   :  { %2389 = vmatmul.mubr.bf16.gmra.mrb[116].mxu1 %v4932_v0  ;;  %3821 = vmatpush3.bf16.msra.mxu0 %v4177_v1  ;;  %v4180_v0 = vld [vmem:[%s5718_s0 + $0x440] sm:$0xff]  }
 0x10d   :  { %3956 = vmatprep.mubr.msk.bf16.mxu0 %vm551_vm0, %v4659_v34  ;;  %v5107_v11 = vadd.f32 %v3429_v8, %v3365_v4  ;;  %3822 = vmatprep.subr.bf16.mxu0 %v4178_v61  ;;  %v2662_v34 = vld [vmem:[%s5720_s2 + $0x38] sm:$0xff] }
 0x10e   :  { %2396 = vmatprep.mubr.bf16.mxu1 %v4944_v42  ;;  %v3366_v16 = vpop.f32.mrb[12].mxu0  ;;  %3969 = vmatpush3.bf16.msra.mxu1 %v4189_v23  ;;  %v4188_v61 = vld [vmem:[%s5718_s0 + $0x418] sm:$0xff]  }
 0x10f   :  { %v3430_v18 = vpop.f32.mrb[12].mxu1  ;;  %v3367_v19 = vpop.f32.mrb[13].mxu0  ;;  %3970 = vmatprep.subr.bf16.mxu1 %v4190_v37  ;;  %2693 = vperm.xlu0 %3989, %v2659_v31   ;;  %v4207_v4 = vld [vmem:[%s5719_s1 + $0xa4] ss:$20 sps:$4 sm:$0xff]  }
 0x110   :  { %v3431_v47 = vpop.f32.mrb[13].mxu1  ;;  %v3368_v50 = vadd.f32 %v3367_v19, %v3366_v16  ;;  %v3369_v54 = vpop.f32.mrb[14].mxu0  ;;  %3823 = vmatpush3.bf16.msra.mxu0 %v4179_v38  ;;  %2708 = vperm.xlu1 %3990, %v2662_v34   ;;  %v2667_v38 = vld [vmem:[%s5720_s2 + $0x60] sm:$0xff]  ;;  %v2670_v31 = vld [vmem:[%s5720_s2 + $0x78] sm:$0xff] }
 0x111   :  { %v3432_v51 = vadd.f32 %v3431_v47, %v3430_v18  ;;  %v3433_v42 = vpop.f32.mrb[14].mxu1  ;;  %v3370_v20 = vpop.f32.mrb[15].mxu0  ;;  %3824 = vmatprep.subr.bf16.mxu0 %v4180_v0 }
 0x112   :  { %v3434_v21 = vpop.f32.mrb[15].mxu1  ;;  %v3371_v22 = vadd.f32 %v3370_v20, %v3369_v54  ;;  %3971 = vmatpush3.bf16.msra.mxu1 %v4190_v37  ;;  %v4208_v54 = vld [vmem:[%s5719_s1 + $0xa0] ss:$20 sps:$4 sm:$0xff]  }
 0x113   :  { %v3435_v43 = vadd.f32 %v3434_v21, %v3433_v42  ;;  %v5125_v62 = vadd.f32 %v3432_v51, %v3368_v50  ;;  %3957 = vmatmul.mubr.msk.bf16.gmra.mrb[120].mxu0 %vm551_vm0, %v4682_v41  ;;  %v4185_v41 = vld [vmem:[%s5718_s0 + $0x450] sm:$0xff]   ;;  %2703 = vperm.xlu0 %3989, %v2661_v35  }
 0x114   :  { %2397 = vmatmul.mubr.bf16.gmra.mrb[120].mxu1 %v4971_v13  ;;  %3825 = vmatpush3.bf16.msra.mxu0 %v4181_v60  ;;  %v2669_v42 = vld [vmem:[%s5720_s2 + $0x70] sm:$0xff]  ;;  %v4209_v60 = vld [vmem:[%s5719_s1 + $0xcc] ss:$20 sps:$4 sm:$0xff]  }
 0x115   :  { %3960 = vmatprep.mubr.msk.bf16.mxu0 %vm551_vm0, %v4690_v44  ;;  %v5141_v6 = vadd.f32 %v3435_v43, %v3371_v22  ;;  %3826 = vmatprep.subr.bf16.mxu0 %v4182_v33  ;;  %v2666_v44 = vld [vmem:[%s5720_s2 + $0x58] sm:$0xff] }
 0x116   :  { %2404 = vmatprep.mubr.bf16.mxu1 %v4983_v14  ;;  %v3372_v13 = vpop.f32.mrb[16].mxu0  ;;  %2718 = vperm.xlu1 %3990, %v2664_v63  }
 0x117   :  { %v3436_v49 = vpop.f32.mrb[16].mxu1  ;;  %v3373_v53 = vpop.f32.mrb[17].mxu0  ;;  %2713 = vperm.xlu0 %3989, %v2663_v52   ;;  %v4211_v52 = vld [vmem:[%s5719_s1 + $0xf4] ss:$20 sps:$4 sm:$0xff]  }
 0x118   :  { %v3437_v23 = vpop.f32.mrb[17].mxu1  ;;  %v3374_v24 = vadd.f32 %v3373_v53, %v3372_v13  ;;  %v3375_v25 = vpop.f32.mrb[18].mxu0  ;;  %3827 = vmatpush3.bf16.msra.mxu0 %v4184_v40 }
 0x119   :  { %v3438_v14 = vadd.f32 %v3437_v23, %v3436_v49  ;;  %v3439_v27 = vpop.f32.mrb[18].mxu1  ;;  %v3376_v32 = vpop.f32.mrb[19].mxu0  ;;  %3828 = vmatprep.subr.bf16.mxu0 %v4185_v41 }
 0x11a   :  { %v3440_v26 = vpop.f32.mrb[19].mxu1  ;;  %v3377_v58 = vadd.f32 %v3376_v32, %v3375_v25  ;;  %2728 = vperm.xlu1 %3990, %v2666_v44  }
 0x11b   :  { %v3441_v59 = vadd.f32 %v3440_v26, %v3439_v27  ;;  %v5159_v1 = vadd.f32 %v3438_v14, %v3374_v24  ;;  %3961 = vmatmul.mubr.msk.bf16.gmra.mrb[124].mxu0 %vm551_vm0, %v4713_v48  ;;  %2723 = vperm.xlu0 %3989, %v2665_v2  }
 0x11c   :  { %2405 = vmatmul.mubr.bf16.gmra.mrb[124].mxu1 %v5007_v29  ;;  %3829 = vmatpush3.bf16.msra.mxu0 %v4186_v28 }
 0x11d   :  { %2412 = vmatprep.mubr.bf16.mxu1 %v4207_v4  ;;  %v5176_v48 = vadd.f32 %v3441_v59, %v3377_v58  ;;  %3830 = vmatprep.subr.bf16.mxu0 %v4187_v36 }
 0x11e   :  { %2477 = vmatprep.mubr.bf16.mxu0 %v4872_v45  ;;  %v3378_v29 = vpop.f32.mrb[20].mxu0  ;;  %2738 = vperm.xlu1 %3990, %v2668_v3  }
 0x11f   :  { %v3442_v8 = vpop.f32.mrb[20].mxu1  ;;  %v3379_v37 = vpop.f32.mrb[21].mxu0  ;;  %2733 = vperm.xlu0 %3989, %v2667_v38  }
 0x120   :  { %v3443_v10 = vpop.f32.mrb[21].mxu1  ;;  %v3380_v0 = vadd.f32 %v3379_v37, %v3378_v29  ;;  %v3381_v18 = vpop.f32.mrb[22].mxu0  ;;  %3831 = vmatpush3.bf16.msra.mxu0 %v4188_v61  ;;  %v4213_v61 = vld [vmem:[%s5719_s1 + $0x11c] ss:$20 sps:$4 sm:$0xff]  }
 0x121   :  { %v3444_v16 = vadd.f32 %v3443_v10, %v3442_v8  ;;  %v3445_v19 = vpop.f32.mrb[22].mxu1  ;;  %v3382_v45 = vpop.f32.mrb[23].mxu0 }
 0x122   :  { %v3446_v47 = vpop.f32.mrb[23].mxu1  ;;  %v3383_v34 = vadd.f32 %v3382_v45, %v3381_v18  ;;  %2748 = vperm.xlu1 %3990, %v2670_v31  }
 0x123   :  { %v3447_v50 = vadd.f32 %v3446_v47, %v3445_v19  ;;  %v5185_v51 = vadd.f32 %v3444_v16, %v3380_v0  ;;  %2478 = vmatmul.mubr.bf16.vlgmr.msra.gmra.mrb[128].mxu0 %v4896_v55  ;;  %2743 = vperm.xlu0 %3989, %v2669_v42  }
 0x124   :  { %2413 = vmatmul.mubr.bf16.gmra.mrb[128].mxu1 %v4208_v54  ;;  %2485 = vmatprep.mubr.bf16.mxu0 %v4911_v56  ;;  %v4210_v56 = vld [vmem:[%s5719_s1 + $0xc8] ss:$20 sps:$4 sm:$0xff]  }
 0x125   :  { %2420 = vmatprep.mubr.bf16.mxu1 %v4209_v60  ;;  %v5198_v20 = vadd.f32 %v3447_v50, %v3383_v34 }
 0x126   :  { %v3384_v21 = vpop.f32.mrb[24].mxu0 }
 0x127   :  { %v3448_v33 = vpop.f32.mrb[24].mxu1  ;;  %v3385_v22 = vpop.f32.mrb[25].mxu0 }
 0x128   :  { %v3449_v43 = vpop.f32.mrb[25].mxu1  ;;  %v3386_v35 = vadd.f32 %v3385_v22, %v3384_v21  ;;  %v3387_v63 = vpop.f32.mrb[26].mxu0 }
 0x129   :  { %v3450_v55 = vadd.f32 %v3449_v43, %v3448_v33  ;;  %v3451_v40 = vpop.f32.mrb[26].mxu1  ;;  %v3388_v41 = vpop.f32.mrb[27].mxu0 }
 0x12a   :  { %v3452_v13 = vpop.f32.mrb[27].mxu1  ;;  %v3389_v49 = vadd.f32 %v3388_v41, %v3387_v63 }
 0x12b   :  { %v3453_v53 = vadd.f32 %v3452_v13, %v3451_v40  ;;  %v5200_v23 = vadd.f32 %v3450_v55, %v3386_v35  ;;  %2486 = vmatmul.mubr.bf16.gmra.mrb[132].mxu0 %v4938_v5 }
 0x12c   :  { %2421 = vmatmul.mubr.bf16.gmra.mrb[132].mxu1 %v4210_v56  ;;  %2493 = vmatprep.mubr.bf16.mxu0 %v4950_v46  ;;  %v4212_v46 = vld [vmem:[%s5719_s1 + $0xf0] ss:$20 sps:$4 sm:$0xff]  }
 0x12d   :  { %2428 = vmatprep.mubr.bf16.mxu1 %v4211_v52  ;;  %v5210_v44 = vadd.f32 %v3453_v53, %v3389_v49 }
 0x12e   :  { %v3390_v24 = vpop.f32.mrb[28].mxu0 }
 0x12f   :  { %v3454_v14 = vpop.f32.mrb[28].mxu1  ;;  %v3391_v25 = vpop.f32.mrb[29].mxu0 }
 0x130   :  { %v3455_v27 = vpop.f32.mrb[29].mxu1  ;;  %v3392_v28 = vadd.f32 %v3391_v25, %v3390_v24  ;;  %v3393_v26 = vpop.f32.mrb[30].mxu0 }
 0x131   :  { %v3456_v32 = vadd.f32 %v3455_v27, %v3454_v14  ;;  %v3457_v36 = vpop.f32.mrb[30].mxu1  ;;  %v3394_v58 = vpop.f32.mrb[31].mxu0 }
 0x132   :  { %v3458_v59 = vpop.f32.mrb[31].mxu1  ;;  %v3395_v5 = vadd.f32 %v3394_v58, %v3393_v26 }
 0x133   :  { %v3459_v2 = vadd.f32 %v3458_v59, %v3457_v36  ;;  %v5212_v3 = vadd.f32 %v3456_v32, %v3392_v28  ;;  %2494 = vmatmul.mubr.bf16.gmra.mrb[136].mxu0 %v4977_v57 }
 0x134   :  { %2429 = vmatmul.mubr.bf16.gmra.mrb[136].mxu1 %v4212_v46  ;;  %2501 = vmatprep.mubr.bf16.mxu0 %v4989_v17 }
 0x135   :  { %2436 = vmatprep.mubr.bf16.mxu1 %v4213_v61  ;;  %v5222_v4 = vadd.f32 %v3459_v2, %v3395_v5 }
 0x136   :  { %v3902_v29 = vpop.f32.mrb[32].mxu0 }
 0x137   :  { %v3488_v8 = vpop.f32.mrb[32].mxu1  ;;  %v5225_v37 = vadd.f32 %v3902_v29, %v5060_v7  ;;  %v804_v10 = vpop.f32.mrb[33].mxu0  ;;  %v4214_v7 = vld [vmem:[%s5719_s1 + $0x118] ss:$20 sps:$4 sm:$0xff]  }
 0x138   :  { %v3489_v38 = vpop.f32.mrb[33].mxu1  ;;  %v5228_v31 = vadd.f32 %v804_v10, %v5036_v39  ;;  %v3903_v57 = vpop.f32.mrb[34].mxu0  ;;  %v4215_v39 = vld [vmem:[%s5719_s1 + $0xac] ss:$20 sps:$4 sm:$0xff]  }
 0x139   :  { %v5230_v0 = vadd.f32 %v3489_v38, %v3488_v8  ;;  %v3491_v16 = vpop.f32.mrb[34].mxu1  ;;  %v5233_v18 = vadd.f32 %v3903_v57, %v5071_v12  ;;  %v807_v17 = vpop.f32.mrb[35].mxu0  ;;  %v4216_v12 = vld [vmem:[%s5719_s1 + $0x10] ss:$20 sps:$4 sm:$0xff]  }
 0x13a   :  { %v3492_v19 = vpop.f32.mrb[35].mxu1  ;;  %v5236_v45 = vadd.f32 %v807_v17, %v5043_v15 }
 0x13b   :  { %v5238_v47 = vadd.f32 %v3492_v19, %v3491_v16  ;;  %2502 = vmatmul.mubr.bf16.gmra.mrb[140].mxu0 %v5013_v30 }
 0x13c   :  { %2437 = vmatmul.mubr.bf16.gmra.mrb[140].mxu1 %v4214_v7  ;;  %2509 = vmatprep.mubr.bf16.mxu0 %v4215_v39 }
 0x13d   :  { %3972 = vmatprep.mubr.msk.bf16.mxu1 %vm551_vm0, %v4216_v12 }
 0x13e   :  { %v3906_v15 = vpop.f32.mrb[36].mxu0 }
 0x13f   :  { %v3494_v34 = vpop.f32.mrb[36].mxu1  ;;  %v5252_v50 = vadd.f32 %v3906_v15, %v5125_v62  ;;  %v820_v54 = vpop.f32.mrb[37].mxu0  ;;  %v4217_v62 = vld [vmem:[%s5719_s1 + $0xa8] ss:$20 sps:$4 sm:$0xff]  }
 0x140   :  { %v3495_v42 = vpop.f32.mrb[37].mxu1  ;;  %v5255_v30 = vadd.f32 %v820_v54, %v5091_v9  ;;  %v3907_v60 = vpop.f32.mrb[38].mxu0  ;;  %v4218_v9 = vld [vmem:[%s5719_s1 + $0x38] ss:$20 sps:$4 sm:$0xff]  }
 0x141   :  { %v5257_v21 = vadd.f32 %v3495_v42, %v3494_v34  ;;  %v3497_v33 = vpop.f32.mrb[38].mxu1  ;;  %v5260_v22 = vadd.f32 %v3907_v60, %v5141_v6  ;;  %v823_v43 = vpop.f32.mrb[39].mxu0  ;;  %v4219_v6 = vld [vmem:[%s5719_s1 + $0xd4] ss:$20 sps:$4 sm:$0xff]  }
 0x142   :  { %v3498_v35 = vpop.f32.mrb[39].mxu1  ;;  %v5263_v55 = vadd.f32 %v823_v43, %v5107_v11  ;;  %v4220_v11 = vld [vmem:[%s5719_s1 + $0x60] ss:$20 sps:$4 sm:$0xff]  }
 0x143   :  { %v5265_v63 = vadd.f32 %v3498_v35, %v3497_v33  ;;  %2510 = vmatmul.mubr.bf16.gmra.mrb[144].mxu0 %v4217_v62 }
 0x144   :  { %3973 = vmatmul.mubr.msk.bf16.vlgmr.msra.gmra.mrb[144].mxu1 %vm551_vm0, %v4218_v9  ;;  %2517 = vmatprep.mubr.bf16.mxu0 %v4219_v6  ;;  %v4229_v9 = vld [vmem:[%s5719_s1 + $0x120] ss:$20 sps:$4 sm:$0xff]   ;;  %v4230_v6 = vld [vmem:[%s5719_s1 + $0x128] ss:$20 sps:$4 sm:$0xff]  }
 0x145   :  { %3976 = vmatprep.mubr.msk.bf16.mxu1 %vm551_vm0, %v4220_v11 }
 0x146   :  { %v3910_v40 = vpop.f32.mrb[40].mxu0 }
 0x147   :  { %v3500_v41 = vpop.f32.mrb[40].mxu1  ;;  %v5282_v13 = vadd.f32 %v3910_v40, %v5185_v51  ;;  %v836_v49 = vpop.f32.mrb[41].mxu0  ;;  %v4221_v51 = vld [vmem:[%s5719_s1 + $0xd0] ss:$20 sps:$4 sm:$0xff]  }
 0x148   :  { %v3501_v53 = vpop.f32.mrb[41].mxu1  ;;  %v5285_v56 = vadd.f32 %v836_v49, %v5159_v1  ;;  %v3911_v52 = vpop.f32.mrb[42].mxu0  ;;  %v4222_v1 = vld [vmem:[%s5719_s1 + $0x88] ss:$20 sps:$4 sm:$0xff]  }
 0x149   :  { %v5287_v24 = vadd.f32 %v3501_v53, %v3500_v41  ;;  %v3503_v14 = vpop.f32.mrb[42].mxu1  ;;  %v5290_v25 = vadd.f32 %v3911_v52, %v5198_v20  ;;  %v839_v27 = vpop.f32.mrb[43].mxu0  ;;  %v4223_v20 = vld [vmem:[%s5719_s1 + $0xfc] ss:$20 sps:$4 sm:$0xff]  }
 0x14a   :  { %v3504_v28 = vpop.f32.mrb[43].mxu1  ;;  %v5293_v32 = vadd.f32 %v839_v27, %v5176_v48  ;;  %v4224_v48 = vld [vmem:[%s5719_s1 + $0xb0] ss:$20 sps:$4 sm:$0xff]  }
 0x14b   :  { %v5295_v26 = vadd.f32 %v3504_v28, %v3503_v14  ;;  %2518 = vmatmul.mubr.bf16.gmra.mrb[148].mxu0 %v4221_v51 }
 0x14c   :  { %3977 = vmatmul.mubr.msk.bf16.gmra.mrb[148].mxu1 %vm551_vm0, %v4222_v1  ;;  %2525 = vmatprep.mubr.bf16.mxu0 %v4223_v20 }
 0x14d   :  { %3980 = vmatprep.mubr.msk.bf16.mxu1 %vm551_vm0, %v4224_v48 }
 0x14e   :  { %v3914_v36 = vpop.f32.mrb[44].mxu0 }
 0x14f   :  { %v3506_v58 = vpop.f32.mrb[44].mxu1  ;;  %v5312_v59 = vadd.f32 %v3914_v36, %v5212_v3  ;;  %v852_v5 = vpop.f32.mrb[45].mxu0  ;;  %v4225_v3 = vld [vmem:[%s5719_s1 + $0xf8] ss:$20 sps:$4 sm:$0xff]  }
 0x150   :  { %v3507_v2 = vpop.f32.mrb[45].mxu1  ;;  %v5315_v46 = vadd.f32 %v852_v5, %v5200_v23  ;;  %v3915_v61 = vpop.f32.mrb[46].mxu0  ;;  %v4226_v23 = vld [vmem:[%s5719_s1 + $0xd8] ss:$20 sps:$4 sm:$0xff]  }
 0x151   :  { %v5317_v29 = vadd.f32 %v3507_v2, %v3506_v58  ;;  %v3509_v8 = vpop.f32.mrb[46].mxu1  ;;  %v5320_v10 = vadd.f32 %v3915_v61, %v5222_v4  ;;  %v855_v38 = vpop.f32.mrb[47].mxu0  ;;  %v4227_v4 = vld [vmem:[%s5719_s1 + $0x124] ss:$20 sps:$4 sm:$0xff]  }
 0x152   :  { %v3510_v57 = vpop.f32.mrb[47].mxu1  ;;  %v5323_v16 = vadd.f32 %v855_v38, %v5210_v44  ;;  %v4228_v44 = vld [vmem:[%s5719_s1 + $0x100] ss:$20 sps:$4 sm:$0xff]  }
 0x153   :  { %5726 = vst [vmem:[#allocation2_spill] sm:$0xff] %v5320_v10  ;;  %v5325_v17 = vadd.f32 %v3510_v57, %v3509_v8  ;;  %2526 = vmatmul.mubr.bf16.gmra.mrb[152].mxu0 %v4225_v3 }
 0x154   :  { %5727 = vst [vmem:[#allocation3_spill] sm:$0xff] %v5323_v16  ;;  %3981 = vmatmul.mubr.msk.bf16.gmra.mrb[152].mxu1 %vm551_vm0, %v4226_v23  ;;  %2533 = vmatprep.mubr.bf16.mxu0 %v4227_v4 }
 0x155   :  { %3984 = vmatprep.mubr.msk.bf16.mxu1 %vm551_vm0, %v4228_v44 }
 0x156   :  { %v3552_v19 = vpop.f32.mrb[48].mxu0 }
 0x157   :  { %v3512_v7 = vpop.f32.mrb[48].mxu1  ;;  %v3553_v39 = vpop.f32.mrb[49].mxu0 }
 0x158   :  { %v3513_v12 = vpop.f32.mrb[49].mxu1  ;;  %v3554_v15 = vadd.f32 %v3553_v39, %v3552_v19  ;;  %v3555_v34 = vpop.f32.mrb[50].mxu0 }
 0x159   :  { %v5341_v54 = vadd.f32 %v3513_v12, %v3512_v7  ;;  %v3515_v42 = vpop.f32.mrb[50].mxu1  ;;  %v3556_v60 = vpop.f32.mrb[51].mxu0 }
 0x15a   :  { %v3516_v33 = vpop.f32.mrb[51].mxu1  ;;  %v3557_v43 = vadd.f32 %v3556_v60, %v3555_v34  ;;  %v1288_v62 = vadd.f32 %v3554_v15, %v5230_v0 }
 0x15b   :  { %v5343_v35 = vadd.f32 %v3516_v33, %v3515_v42  ;;  %2534 = vmatmul.mubr.bf16.gmra.mrb[156].mxu0 %v4229_v9 }
 0x15c   :  { %3985 = vmatmul.mubr.msk.bf16.gmra.mrb[156].mxu1 %vm551_vm0, %v4230_v6  ;;  %v1291_v11 = vadd.f32 %v3557_v43, %v5238_v47 }
 0x15e   :  { %v3558_v40 = vpop.f32.mrb[52].mxu0 }
 0x15f   :  { %v3518_v41 = vpop.f32.mrb[52].mxu1  ;;  %v3559_v49 = vpop.f32.mrb[53].mxu0 }
 0x160   :  { %v3519_v53 = vpop.f32.mrb[53].mxu1  ;;  %v3560_v52 = vadd.f32 %v3559_v49, %v3558_v40  ;;  %v3561_v14 = vpop.f32.mrb[54].mxu0 }
 0x161   :  { %v5354_v0 = vadd.f32 %v3519_v53, %v3518_v41  ;;  %v3521_v27 = vpop.f32.mrb[54].mxu1  ;;  %v3562_v28 = vpop.f32.mrb[55].mxu0 }
 0x162   :  { %v3522_v51 = vpop.f32.mrb[55].mxu1  ;;  %v3563_v1 = vadd.f32 %v3562_v28, %v3561_v14  ;;  %v1296_v48 = vadd.f32 %v3560_v52, %v5257_v21 }
 0x163   :  { %v5356_v20 = vadd.f32 %v3522_v51, %v3521_v27 }
 0x164   :  { %v1299_v36 = vadd.f32 %v3563_v1, %v5265_v63 }
 0x166   :  { %v3564_v58 = vpop.f32.mrb[56].mxu0 }
 0x167   :  { %v3524_v47 = vpop.f32.mrb[56].mxu1  ;;  %v3565_v5 = vpop.f32.mrb[57].mxu0 }
 0x168   :  { %v3525_v2 = vpop.f32.mrb[57].mxu1  ;;  %v3566_v61 = vadd.f32 %v3565_v5, %v3564_v58  ;;  %v3567_v8 = vpop.f32.mrb[58].mxu0 }
 0x169   :  { %v5360_v38 = vadd.f32 %v3525_v2, %v3524_v47  ;;  %v3527_v57 = vpop.f32.mrb[58].mxu1  ;;  %v3568_v3 = vpop.f32.mrb[59].mxu0 }
 0x16a   :  { %v3528_v23 = vpop.f32.mrb[59].mxu1  ;;  %v3569_v4 = vadd.f32 %v3568_v3, %v3567_v8  ;;  %v1304_v19 = vadd.f32 %v3566_v61, %v5287_v24 }
 0x16b   :  { %v5362_v44 = vadd.f32 %v3528_v23, %v3527_v57 }
 0x16c   :  { %v1307_v21 = vadd.f32 %v3569_v4, %v5295_v26 }
 0x16e   :  { %v3570_v7 = vpop.f32.mrb[60].mxu0 }
 0x16f   :  { %v3530_v63 = vpop.f32.mrb[60].mxu1  ;;  %v3571_v39 = vpop.f32.mrb[61].mxu0 }
 0x170   :  { %v3531_v12 = vpop.f32.mrb[61].mxu1  ;;  %v3572_v15 = vadd.f32 %v3571_v39, %v3570_v7  ;;  %v3573_v34 = vpop.f32.mrb[62].mxu0 }
 0x171   :  { %v5366_v42 = vadd.f32 %v3531_v12, %v3530_v63  ;;  %v3533_v60 = vpop.f32.mrb[62].mxu1  ;;  %v3574_v33 = vpop.f32.mrb[63].mxu0 }
 0x172   :  { %v3534_v43 = vpop.f32.mrb[63].mxu1  ;;  %v3575_v9 = vadd.f32 %v3574_v33, %v3573_v34  ;;  %v1312_v40 = vadd.f32 %v3572_v15, %v5317_v29 }
 0x173   :  { %v5368_v6 = vadd.f32 %v3534_v43, %v3533_v60 }
 0x174   :  { %v1315_v24 = vadd.f32 %v3575_v9, %v5325_v17 }
 0x176   :  { %v3576_v41 = vpop.f32.mrb[64].mxu0 }
 0x177   :  { %v3926_v26 = vpop.f32.mrb[64].mxu1  ;;  %v3577_v53 = vpop.f32.mrb[65].mxu0 }
 0x178   :  { %v5372_v49 = vadd.f32 %v3926_v26, %v1296_v48  ;;  %v1384_v52 = vpop.f32.mrb[65].mxu1  ;;  %v3578_v14 = vadd.f32 %v3577_v53, %v3576_v41  ;;  %v3579_v28 = vpop.f32.mrb[66].mxu0 }
 0x179   :  { %v5374_v27 = vadd.f32 %v1384_v52, %v1288_v62  ;;  %v3927_v51 = vpop.f32.mrb[66].mxu1  ;;  %v3580_v47 = vpop.f32.mrb[67].mxu0 }
 0x17a   :  { %v5378_v58 = vadd.f32 %v3927_v51, %v1299_v36  ;;  %v1387_v29 = vpop.f32.mrb[67].mxu1  ;;  %v3581_v5 = vadd.f32 %v3580_v47, %v3579_v28  ;;  %v1320_v2 = vadd.f32 %v3578_v14, %v5341_v54 }
 0x17b   :  { %v5382_v48 = vadd.f32 %v1387_v29, %v1291_v11 }
 0x17c   :  { %v1323_v8 = vadd.f32 %v3581_v5, %v5343_v35 }
 0x17e   :  { %v3582_v36 = vpop.f32.mrb[68].mxu0 }
 0x17f   :  { %v3930_v57 = vpop.f32.mrb[68].mxu1  ;;  %v3583_v23 = vpop.f32.mrb[69].mxu0 }
 0x180   :  { %v5390_v3 = vadd.f32 %v3930_v57, %v1312_v40  ;;  %v1400_v4 = vpop.f32.mrb[69].mxu1  ;;  %v3584_v7 = vadd.f32 %v3583_v23, %v3582_v36  ;;  %v3585_v11 = vpop.f32.mrb[70].mxu0 }
 0x181   :  { %v5392_v63 = vadd.f32 %v1400_v4, %v1304_v19  ;;  %v3931_v39 = vpop.f32.mrb[70].mxu1  ;;  %v3586_v15 = vpop.f32.mrb[71].mxu0 }
 0x182   :  { %v5396_v12 = vadd.f32 %v3931_v39, %v1315_v24  ;;  %v1403_v34 = vpop.f32.mrb[71].mxu1  ;;  %v3587_v60 = vadd.f32 %v3586_v15, %v3585_v11  ;;  %v1328_v43 = vadd.f32 %v3584_v7, %v5354_v0 }
 0x183   :  { %v5400_v33 = vadd.f32 %v1403_v34, %v1307_v21 }
 0x184   :  { %v1331_v40 = vadd.f32 %v3587_v60, %v5356_v20 }
 0x186   :  { %v3588_v24 = vpop.f32.mrb[72].mxu0 }
 0x187   :  { %v3934_v41 = vpop.f32.mrb[72].mxu1  ;;  %v3589_v53 = vpop.f32.mrb[73].mxu0 }
 0x188   :  { %v5408_v26 = vadd.f32 %v3934_v41, %v1328_v43  ;;  %v1416_v52 = vpop.f32.mrb[73].mxu1  ;;  %v3590_v14 = vadd.f32 %v3589_v53, %v3588_v24  ;;  %v3591_v21 = vpop.f32.mrb[74].mxu0 }
 0x189   :  { %v5410_v28 = vadd.f32 %v1416_v52, %v1320_v2  ;;  %v3935_v51 = vpop.f32.mrb[74].mxu1  ;;  %v3592_v29 = vpop.f32.mrb[75].mxu0 }
 0x18a   :  { %v5414_v47 = vadd.f32 %v3935_v51, %v1331_v40  ;;  %v1419_v5 = vpop.f32.mrb[75].mxu1  ;;  %v3593_v36 = vadd.f32 %v3592_v29, %v3591_v21  ;;  %v1336_v23 = vadd.f32 %v3590_v14, %v5360_v38 }
 0x18b   :  { %v5418_v57 = vadd.f32 %v1419_v5, %v1323_v8 }
 0x18c   :  { %v1339_v7 = vadd.f32 %v3593_v36, %v5362_v44 }
 0x18e   :  { %v3594_v11 = vpop.f32.mrb[76].mxu0 }
 0x18f   :  { %v3938_v39 = vpop.f32.mrb[76].mxu1  ;;  %v3595_v15 = vpop.f32.mrb[77].mxu0 }
 0x190   :  { %v1432_v34 = vpop.f32.mrb[77].mxu1  ;;  %v3596_v60 = vadd.f32 %v3595_v15, %v3594_v11  ;;  %v3597_v40 = vpop.f32.mrb[78].mxu0 }
 0x191   :  { %v5426_v43 = vadd.f32 %v1432_v34, %v1336_v23  ;;  %v3939_v8 = vpop.f32.mrb[78].mxu1  ;;  %v3598_v24 = vpop.f32.mrb[79].mxu0 }
 0x192   :  { %v1435_v41 = vpop.f32.mrb[79].mxu1  ;;  %v1344_v38 = vadd.f32 %v3596_v60, %v5366_v42  ;;  %v3599_v52 = vadd.f32 %v3598_v24, %v3597_v40 }
 0x193   :  { %v5431_v14 = vadd.f32 %v1435_v41, %v1339_v7 }
 0x194   :  { %v5433_v44 = vadd.f32 %v3938_v39, %v1344_v38  ;;  %v1347_v21 = vadd.f32 %v3599_v52, %v5368_v6 }
 0x195   :  { %5728 = vst [vmem:[#allocation4_spill] sm:$0xff] %v5431_v14 }
 0x196   :  { %v5438_v29 = vadd.f32 %v3939_v8, %v1347_v21  ;;  %v3628_v5 = vpop.f32.mrb[80].mxu0 }
 0x197   :  { %v3692_v36 = vpop.f32.mrb[80].mxu1  ;;  %v3629_v23 = vpop.f32.mrb[81].mxu0 }
 0x198   :  { %5729 = vst [vmem:[#allocation5_spill] sm:$0xff] %v5438_v29  ;;  %v3693_v11 = vpop.f32.mrb[81].mxu1  ;;  %v3630_v15 = vadd.f32 %v3629_v23, %v3628_v5  ;;  %v3631_v7 = vpop.f32.mrb[82].mxu0 }
 0x199   :  { %v3694_v34 = vadd.f32 %v3693_v11, %v3692_v36  ;;  %v3695_v60 = vpop.f32.mrb[82].mxu1  ;;  %v3632_v6 = vpop.f32.mrb[83].mxu0 }
 0x19a   :  { %v3696_v40 = vpop.f32.mrb[83].mxu1  ;;  %v3633_v24 = vadd.f32 %v3632_v6, %v3631_v7 }
 0x19b   :  { %v3697_v41 = vadd.f32 %v3696_v40, %v3695_v60  ;;  %v5444_v8 = vadd.f32 %v3694_v34, %v3630_v15 }
 0x19d   :  { %v5446_v38 = vadd.f32 %v3697_v41, %v3633_v24 }
 0x19e   :  { %v3634_v52 = vpop.f32.mrb[84].mxu0 }
 0x19f   :  { %v3698_v21 = vpop.f32.mrb[84].mxu1  ;;  %v3635_v51 = vpop.f32.mrb[85].mxu0 }
 0x1a0   :  { %v3699_v53 = vpop.f32.mrb[85].mxu1  ;;  %v3636_v42 = vadd.f32 %v3635_v51, %v3634_v52  ;;  %v3637_v36 = vpop.f32.mrb[86].mxu0 }
 0x1a1   :  { %v3700_v5 = vadd.f32 %v3699_v53, %v3698_v21  ;;  %v3701_v23 = vpop.f32.mrb[86].mxu1  ;;  %v3638_v11 = vpop.f32.mrb[87].mxu0 }
 0x1a2   :  { %v3702_v4 = vpop.f32.mrb[87].mxu1  ;;  %v3639_v2 = vadd.f32 %v3638_v11, %v3637_v36 }
 0x1a3   :  { %v3703_v39 = vadd.f32 %v3702_v4, %v3701_v23  ;;  %v5448_v20 = vadd.f32 %v3700_v5, %v3636_v42 }
 0x1a5   :  { %v5450_v7 = vadd.f32 %v3703_v39, %v3639_v2 }
 0x1a6   :  { %v3640_v15 = vpop.f32.mrb[88].mxu0 }
 0x1a7   :  { %v3704_v34 = vpop.f32.mrb[88].mxu1  ;;  %v3641_v60 = vpop.f32.mrb[89].mxu0 }
 0x1a8   :  { %v3705_v6 = vpop.f32.mrb[89].mxu1  ;;  %v3642_v40 = vadd.f32 %v3641_v60, %v3640_v15  ;;  %v3643_v41 = vpop.f32.mrb[90].mxu0 }
 0x1a9   :  { %v3706_v24 = vadd.f32 %v3705_v6, %v3704_v34  ;;  %v3707_v0 = vpop.f32.mrb[90].mxu1  ;;  %v3644_v51 = vpop.f32.mrb[91].mxu0 }
 0x1aa   :  { %v3708_v53 = vpop.f32.mrb[91].mxu1  ;;  %v3645_v52 = vadd.f32 %v3644_v51, %v3643_v41 }
 0x1ab   :  { %v3709_v21 = vadd.f32 %v3708_v53, %v3707_v0  ;;  %v5452_v9 = vadd.f32 %v3706_v24, %v3642_v40 }
 0x1ad   :  { %v5454_v36 = vadd.f32 %v3709_v21, %v3645_v52 }
 0x1ae   :  { %v3646_v4 = vpop.f32.mrb[92].mxu0 }
 0x1af   :  { %v3710_v42 = vpop.f32.mrb[92].mxu1  ;;  %v3647_v2 = vpop.f32.mrb[93].mxu0 }
 0x1b0   :  { %v3711_v39 = vpop.f32.mrb[93].mxu1  ;;  %v3648_v5 = vadd.f32 %v3647_v2, %v3646_v4  ;;  %v3649_v11 = vpop.f32.mrb[94].mxu0 }
 0x1b1   :  { %v3712_v23 = vadd.f32 %v3711_v39, %v3710_v42  ;;  %v3713_v19 = vpop.f32.mrb[94].mxu1  ;;  %v3650_v15 = vpop.f32.mrb[95].mxu0 }
 0x1b2   :  { %v3714_v34 = vpop.f32.mrb[95].mxu1  ;;  %v3651_v60 = vadd.f32 %v3650_v15, %v3649_v11 }
 0x1b3   :  { %v3715_v6 = vadd.f32 %v3714_v34, %v3713_v19  ;;  %v5456_v35 = vadd.f32 %v3712_v23, %v3648_v5 }
 0x1b5   :  { %v5458_v41 = vadd.f32 %v3715_v6, %v3651_v60 }
 0x1b6   :  { %v3652_v0 = vpop.f32.mrb[96].mxu0 }
 0x1b7   :  { %v3716_v40 = vpop.f32.mrb[96].mxu1  ;;  %v3653_v24 = vpop.f32.mrb[97].mxu0 }
 0x1b8   :  { %v3717_v51 = vpop.f32.mrb[97].mxu1  ;;  %v3654_v53 = vadd.f32 %v3653_v24, %v3652_v0  ;;  %v3655_v21 = vpop.f32.mrb[98].mxu0 }
 0x1b9   :  { %v3718_v52 = vadd.f32 %v3717_v51, %v3716_v40  ;;  %v3719_v54 = vpop.f32.mrb[98].mxu1  ;;  %v3656_v4 = vpop.f32.mrb[99].mxu0 }
 0x1ba   :  { %v3720_v42 = vpop.f32.mrb[99].mxu1  ;;  %v3657_v2 = vadd.f32 %v3656_v4, %v3655_v21 }
 0x1bb   :  { %v3721_v39 = vadd.f32 %v3720_v42, %v3719_v54  ;;  %v5460_v61 = vadd.f32 %v3718_v52, %v3654_v53 }
 0x1bd   :  { %v5462_v11 = vadd.f32 %v3721_v39, %v3657_v2 }
 0x1be   :  { %v3658_v19 = vpop.f32.mrb[100].mxu0 }
 0x1bf   :  { %v3722_v5 = vpop.f32.mrb[100].mxu1  ;;  %v3659_v23 = vpop.f32.mrb[101].mxu0 }
 0x1c0   :  { %v3723_v15 = vpop.f32.mrb[101].mxu1  ;;  %v3660_v34 = vadd.f32 %v3659_v23, %v3658_v19  ;;  %v3661_v6 = vpop.f32.mrb[102].mxu0 }
 0x1c1   :  { %v3724_v60 = vadd.f32 %v3723_v15, %v3722_v5  ;;  %v3725_v62 = vpop.f32.mrb[102].mxu1  ;;  %v3662_v0 = vpop.f32.mrb[103].mxu0 }
 0x1c2   :  { %v3726_v40 = vpop.f32.mrb[103].mxu1  ;;  %v3663_v24 = vadd.f32 %v3662_v0, %v3661_v6 }
 0x1c3   :  { %v3727_v51 = vadd.f32 %v3726_v40, %v3725_v62  ;;  %v5464_v17 = vadd.f32 %v3724_v60, %v3660_v34 }
 0x1c5   :  { %v5466_v21 = vadd.f32 %v3727_v51, %v3663_v24 }
 0x1c6   :  { %v3664_v54 = vpop.f32.mrb[104].mxu0 }
 0x1c7   :  { %v3728_v53 = vpop.f32.mrb[104].mxu1  ;;  %v3665_v52 = vpop.f32.mrb[105].mxu0 }
 0x1c8   :  { %v3729_v4 = vpop.f32.mrb[105].mxu1  ;;  %v3666_v42 = vadd.f32 %v3665_v52, %v3664_v54  ;;  %v3667_v39 = vpop.f32.mrb[106].mxu0 }
 0x1c9   :  { %v3730_v2 = vadd.f32 %v3729_v4, %v3728_v53  ;;  %v3731_v1 = vpop.f32.mrb[106].mxu1  ;;  %v3668_v19 = vpop.f32.mrb[107].mxu0 }
 0x1ca   :  { %v3732_v5 = vpop.f32.mrb[107].mxu1  ;;  %v3669_v23 = vadd.f32 %v3668_v19, %v3667_v39 }
 0x1cb   :  { %v3733_v15 = vadd.f32 %v3732_v5, %v3731_v1  ;;  %v5468_v14 = vadd.f32 %v3730_v2, %v3666_v42 }
 0x1cd   :  { %v5470_v6 = vadd.f32 %v3733_v15, %v3669_v23 }
 0x1ce   :  { %v3670_v62 = vpop.f32.mrb[108].mxu0 }
 0x1cf   :  { %v3734_v34 = vpop.f32.mrb[108].mxu1  ;;  %v3671_v60 = vpop.f32.mrb[109].mxu0 }
 0x1d0   :  { %v3735_v0 = vpop.f32.mrb[109].mxu1  ;;  %v3672_v40 = vadd.f32 %v3671_v60, %v3670_v62  ;;  %v3673_v51 = vpop.f32.mrb[110].mxu0 }
 0x1d1   :  { %v3736_v24 = vadd.f32 %v3735_v0, %v3734_v34  ;;  %v3737_v16 = vpop.f32.mrb[110].mxu1  ;;  %v3674_v54 = vpop.f32.mrb[111].mxu0  ;;  %v5730_v34 = vmax.f32 %v5225_v37, %v5372_v49  ;;  %v5733_v37 = vmax.f32 %v5236_v45, %v5382_v48 }
 0x1d2   :  { %v3738_v53 = vpop.f32.mrb[111].mxu1  ;;  %v3675_v52 = vadd.f32 %v3674_v54, %v3673_v51  ;;  %v5732_v54 = vmax.f32 %v5233_v18, %v5378_v58  ;;  %v5734_v18 = vmax.f32 %v5252_v50, %v5390_v3  ;;  %v5737_v50 = vmax.f32 %v5263_v55, %v5400_v33 }
 0x1d3   :  { %v3739_v4 = vadd.f32 %v3738_v53, %v3737_v16  ;;  %v1940_v29 = vadd.f32 %v3736_v24, %v3672_v40 }
 0x1d5   :  { %v5472_v10 = vadd.f32 %v3739_v4, %v3675_v52 }
 0x1d6   :  { %v3950_v1 = vpop.f32.mrb[112].mxu0 }
 0x1d7   :  { %v3768_v42 = vpop.f32.mrb[112].mxu1  ;;  %v1989_v2 = vadd.f32 %v3950_v1, %v5448_v20  ;;  %v1980_v39 = vpop.f32.mrb[113].mxu0  ;;  %v5731_v20 = vmax.f32 %v5228_v31, %v5374_v27 }
 0x1d8   :  { %v3769_v19 = vpop.f32.mrb[113].mxu1  ;;  %v1981_v5 = vadd.f32 %v1980_v39, %v5444_v8  ;;  %v3951_v23 = vpop.f32.mrb[114].mxu0 }
 0x1d9   :  { %v5476_v15 = vadd.f32 %v3769_v19, %v3768_v42  ;;  %v3771_v62 = vpop.f32.mrb[114].mxu1  ;;  %v5481_v60 = vmax.f32 %v5730_v34, %v1989_v2  ;;  %v1992_v16 = vadd.f32 %v3951_v23, %v5450_v7  ;;  %v1983_v0 = vpop.f32.mrb[115].mxu0  ;;  %v5736_v23 = vmax.f32 %v5260_v22, %v5396_v12 }
 0x1da   :  { %v3772_v40 = vpop.f32.mrb[115].mxu1  ;;  %v5487_v24 = vmax.f32 %v5731_v20, %v1981_v5  ;;  %v1984_v8 = vadd.f32 %v1983_v0, %v5446_v38  ;;  %v5738_v22 = vmax.f32 %v5282_v13, %v5408_v26  ;;  %v5741_v13 = vmax.f32 %v5293_v32, %v5418_v57 }
 0x1db   :  { %v5490_v51 = vadd.f32 %v3772_v40, %v3771_v62  ;;  %v5495_v53 = vmax.f32 %v5732_v54, %v1992_v16 }
 0x1dc   :  { %v5500_v49 = vmax.f32 %v5733_v37, %v1984_v8 }
 0x1de   :  { %v3954_v7 = vpop.f32.mrb[116].mxu0 }
 0x1df   :  { %v3774_v52 = vpop.f32.mrb[116].mxu1  ;;  %v2005_v31 = vadd.f32 %v3954_v7, %v5456_v35  ;;  %v1996_v27 = vpop.f32.mrb[117].mxu0  ;;  %v5735_v35 = vmax.f32 %v5255_v30, %v5392_v63  ;;  %v5740_v7 = vmax.f32 %v5290_v25, %v5414_v47  ;;  %v5742_v25 = vmax.f32 %v5312_v59, %v5433_v44  ;;  %v5747_v59 = vld [vmem:[#allocation3_spill] sm:$0xff]  ;;  %v5748_v44 = vld [vmem:[#allocation4_spill] sm:$0xff] }
 0x1e0   :  { %v3775_v4 = vpop.f32.mrb[117].mxu1  ;;  %v1997_v38 = vadd.f32 %v1996_v27, %v5452_v9  ;;  %v3955_v1 = vpop.f32.mrb[118].mxu0 }
 0x1e1   :  { %v5504_v42 = vadd.f32 %v3775_v4, %v3774_v52  ;;  %v3777_v2 = vpop.f32.mrb[118].mxu1  ;;  %v5509_v58 = vmax.f32 %v5734_v18, %v2005_v31  ;;  %v2008_v45 = vadd.f32 %v3955_v1, %v5458_v41  ;;  %v1999_v48 = vpop.f32.mrb[119].mxu0 }
 0x1e2   :  { %v3778_v39 = vpop.f32.mrb[119].mxu1  ;;  %v5515_v19 = vmax.f32 %v5735_v35, %v1997_v38  ;;  %v2000_v9 = vadd.f32 %v1999_v48, %v5454_v36  ;;  %v5744_v48 = vld [vmem:[#allocation2_spill] sm:$0xff] }
 0x1e3   :  { %v5518_v5 = vadd.f32 %v3778_v39, %v3777_v2  ;;  %v5523_v62 = vmax.f32 %v5736_v23, %v2008_v45  ;;  %v5745_v39 = vld [vmem:[#allocation5_spill] sm:$0xff]  ;;  %v5749_v23 = vmax.f32 %v5747_v59, %v5748_v44 }
 0x1e4   :  { %v5528_v3 = vmax.f32 %v5737_v50, %v2000_v9  ;;  %v5746_v35 = vmax.f32 %v5744_v48, %v5745_v39 }
 0x1e6   :  { %v3958_v41 = vpop.f32.mrb[120].mxu0 }
 0x1e7   :  { %v3780_v34 = vpop.f32.mrb[120].mxu1  ;;  %v2021_v30 = vadd.f32 %v3958_v41, %v5464_v17  ;;  %v2012_v63 = vpop.f32.mrb[121].mxu0  ;;  %v5739_v17 = vmax.f32 %v5285_v56, %v5410_v28 }
 0x1e8   :  { %v3781_v16 = vpop.f32.mrb[121].mxu1  ;;  %v2013_v36 = vadd.f32 %v2012_v63, %v5460_v61  ;;  %v3959_v0 = vpop.f32.mrb[122].mxu0 }
 0x1e9   :  { %v5532_v40 = vadd.f32 %v3781_v16, %v3780_v34  ;;  %v3783_v20 = vpop.f32.mrb[122].mxu1  ;;  %v5537_v12 = vmax.f32 %v5738_v22, %v2021_v30  ;;  %v2024_v55 = vadd.f32 %v3959_v0, %v5466_v21  ;;  %v2015_v33 = vpop.f32.mrb[123].mxu0 }
 0x1ea   :  { %v3784_v8 = vpop.f32.mrb[123].mxu1  ;;  %v5543_v54 = vmax.f32 %v5739_v17, %v2013_v36  ;;  %v2016_v61 = vadd.f32 %v2015_v33, %v5462_v11  ;;  %v5593_v33 = vpop.permute.xlu0 %2673 }
 0x1eb   :  { %v5546_v37 = vadd.f32 %v3784_v8, %v3783_v20  ;;  %v5551_v52 = vmax.f32 %v5740_v7, %v2024_v55 }
 0x1ec   :  { %v5556_v26 = vmax.f32 %v5741_v13, %v2016_v61 }
 0x1ee   :  { %v3962_v21 = vpop.f32.mrb[124].mxu0 }
 0x1ef   :  { %v3786_v31 = vpop.f32.mrb[124].mxu1  ;;  %v2037_v27 = vadd.f32 %v3962_v21, %v1940_v29  ;;  %v2028_v56 = vpop.f32.mrb[125].mxu0  ;;  %v5743_v29 = vmax.f32 %v5315_v46, %v5426_v43 }
 0x1f0   :  { %v3787_v28 = vpop.f32.mrb[125].mxu1  ;;  %v2029_v4 = vadd.f32 %v2028_v56, %v5468_v14  ;;  %v3963_v11 = vpop.f32.mrb[126].mxu0 }
 0x1f1   :  { %v5559_v38 = vadd.f32 %v3787_v28, %v3786_v31  ;;  %v3789_v1 = vpop.f32.mrb[126].mxu1  ;;  %v5564_v47 = vmax.f32 %v5742_v25, %v2037_v27  ;;  %v2040_v32 = vadd.f32 %v3963_v11, %v5472_v10  ;;  %v2031_v57 = vpop.f32.mrb[127].mxu0 }
 0x1f2   :  { %v3790_v2 = vpop.f32.mrb[127].mxu1  ;;  %v5570_v18 = vmax.f32 %v5743_v29, %v2029_v4  ;;  %v2032_v14 = vadd.f32 %v2031_v57, %v5470_v6  ;;  %v2679_v25 = vpop.permute.xlu0 %2678 }
 0x1f3   :  { %v5573_v45 = vadd.f32 %v3790_v2, %v3789_v1  ;;  %v5578_v9 = vmax.f32 %v5746_v35, %v2040_v32  ;;  %v2684_v1 = vpop.permute.xlu1 %2683 }
 0x1f4   :  { %v5583_v10 = vmax.f32 %v5749_v23, %v2032_v14 }
 0x1f6   :  { %v3832_v50 = vpop.f32.mrb[128].mxu0 }
 0x1f7   :  { %v3792_v41 = vpop.f32.mrb[128].mxu1  ;;  %v3833_v34 = vpop.f32.mrb[129].mxu0 }
 0x1f8   :  { %v3793_v46 = vpop.f32.mrb[129].mxu1  ;;  %v3834_v43 = vadd.f32 %v3833_v34, %v3832_v50  ;;  %v3835_v30 = vpop.f32.mrb[130].mxu0 }
 0x1f9   :  { %v5585_v63 = vadd.f32 %v3793_v46, %v3792_v41  ;;  %v3795_v6 = vpop.f32.mrb[130].mxu1  ;;  %v3836_v16 = vpop.f32.mrb[131].mxu0 }
 0x1fa   :  { %v3796_v36 = vpop.f32.mrb[131].mxu1  ;;  %v3837_v0 = vadd.f32 %v3836_v16, %v3835_v30  ;;  %v2480_v22 = vadd.f32 %v3834_v43, %v5476_v15  ;;  %v2689_v41 = vpop.permute.xlu1 %2688 }
 0x1fb   :  { %v5587_v20 = vadd.f32 %v3796_v36, %v3795_v6  ;;  %v5609_v34 = vpop.permute.xlu0 %2693 }
 0x1fc   :  { %v5591_v55 = vadd.f32 %v3837_v0, %v5490_v51 }
 0x1fe   :  { %v3838_v8 = vpop.f32.mrb[132].mxu0 }
 0x1ff   :  { %v3798_v17 = vpop.f32.mrb[132].mxu1  ;;  %v3839_v61 = vpop.f32.mrb[133].mxu0 }
 0x200   :  { %v3799_v7 = vpop.f32.mrb[133].mxu1  ;;  %v3840_v13 = vadd.f32 %v3839_v61, %v3838_v8  ;;  %v3841_v21 = vpop.f32.mrb[134].mxu0 }
 0x201   :  { %v5595_v31 = vadd.f32 %v3799_v7, %v3798_v17  ;;  %v3801_v27 = vpop.f32.mrb[134].mxu1  ;;  %v3842_v56 = vpop.f32.mrb[135].mxu0 }
 0x202   :  { %v3802_v28 = vpop.f32.mrb[135].mxu1  ;;  %v3843_v4 = vadd.f32 %v3842_v56, %v3841_v21  ;;  %v2488_v15 = vadd.f32 %v3840_v13, %v5504_v42  ;;  %v5617_v21 = vpop.permute.xlu1 %2698 }
 0x203   :  { %v5597_v11 = vadd.f32 %v3802_v28, %v3801_v27  ;;  %v2704_v27 = vpop.permute.xlu0 %2703 }
 0x204   :  { %v2491_v51 = vadd.f32 %v3843_v4, %v5518_v5 }
 0x206   :  { %v3844_v32 = vpop.f32.mrb[136].mxu0 }
 0x207   :  { %v3804_v57 = vpop.f32.mrb[136].mxu1  ;;  %v3845_v2 = vpop.f32.mrb[137].mxu0 }
 0x208   :  { %v3805_v29 = vpop.f32.mrb[137].mxu1  ;;  %v3846_v14 = vadd.f32 %v3845_v2, %v3844_v32  ;;  %v3847_v48 = vpop.f32.mrb[138].mxu0 }
 0x209   :  { %v5601_v39 = vadd.f32 %v3805_v29, %v3804_v57  ;;  %v3807_v35 = vpop.f32.mrb[138].mxu1  ;;  %v3848_v59 = vpop.f32.mrb[139].mxu0 }
 0x20a   :  { %v3808_v44 = vpop.f32.mrb[139].mxu1  ;;  %v3849_v23 = vadd.f32 %v3848_v59, %v3847_v48  ;;  %v2496_v42 = vadd.f32 %v3846_v14, %v5532_v40 }
 0x20b   :  { %v5603_v50 = vadd.f32 %v3808_v44, %v3807_v35 }
 0x20c   :  { %v5607_v5 = vadd.f32 %v3849_v23, %v5546_v37 }
 0x20e   :  { %v3850_v46 = vpop.f32.mrb[140].mxu0 }
 0x20f   :  { %v3810_v43 = vpop.f32.mrb[140].mxu1  ;;  %v3851_v30 = vpop.f32.mrb[141].mxu0 }
 0x210   :  { %v3811_v6 = vpop.f32.mrb[141].mxu1  ;;  %v3852_v16 = vadd.f32 %v3851_v30, %v3850_v46  ;;  %v3853_v36 = vpop.f32.mrb[142].mxu0 }
 0x211   :  { %v5611_v0 = vadd.f32 %v3811_v6, %v3810_v43  ;;  %v3813_v8 = vpop.f32.mrb[142].mxu1  ;;  %v3854_v17 = vpop.f32.mrb[143].mxu0 }
 0x212   :  { %v3814_v61 = vpop.f32.mrb[143].mxu1  ;;  %v3855_v7 = vadd.f32 %v3854_v17, %v3853_v36  ;;  %v2504_v40 = vadd.f32 %v3852_v16, %v5559_v38 }
 0x213   :  { %v5613_v13 = vadd.f32 %v3814_v61, %v3813_v8 }
 0x214   :  { %v2507_v37 = vadd.f32 %v3855_v7, %v5573_v45 }
 0x216   :  { %v3856_v56 = vpop.f32.mrb[144].mxu0 }
 0x217   :  { %v3974_v28 = vpop.f32.mrb[144].mxu1  ;;  %v3857_v32 = vpop.f32.mrb[145].mxu0 }
 0x218   :  { %v2585_v4 = vadd.f32 %v3974_v28, %v2488_v15  ;;  %v2576_v57 = vpop.f32.mrb[145].mxu1  ;;  %v3858_v2 = vadd.f32 %v3857_v32, %v3856_v56  ;;  %v3859_v14 = vpop.f32.mrb[146].mxu0 }
 0x219   :  { %v2577_v29 = vadd.f32 %v2576_v57, %v2480_v22  ;;  %v3975_v48 = vpop.f32.mrb[146].mxu1  ;;  %v3860_v44 = vpop.f32.mrb[147].mxu0 }
 0x21a   :  { %v2641_v35 = vmax.f32 %v5481_v60, %v2585_v4  ;;  %v2588_v59 = vadd.f32 %v3975_v48, %v2491_v51  ;;  %v2579_v23 = vpop.f32.mrb[147].mxu1  ;;  %v3861_v45 = vadd.f32 %v3860_v44, %v3859_v14  ;;  %v2512_v43 = vadd.f32 %v3858_v2, %v5585_v63  ;;  %v2709_v60 = vpop.permute.xlu1 %2708 }
 0x21b   :  { %v2639_v38 = vmax.f32 %v5487_v24, %v2577_v29  ;;  %v2580_v46 = vadd.f32 %v2579_v23, %v5591_v55  ;;  %v5629_v51 = vpop.permute.xlu0 %2713 }
 0x21c   :  { %v2753_v30 = vadd.f32 %v2684_v1, %v2641_v35  ;;  %v2642_v15 = vmax.f32 %v5495_v53, %v2588_v59  ;;  %v5627_v16 = vadd.f32 %v3861_v45, %v5587_v20 }
 0x21d   :  { %v2751_v6 = vadd.f32 %v5593_v33, %v2639_v38  ;;  %v2640_v22 = vmax.f32 %v5500_v49, %v2580_v46 }
 0x21e   :  { %v2769_v36 = vmax.f32 %v2753_v30, 0.0  ;;  %v2754_v24 = vadd.f32 %v2689_v41, %v2642_v15  ;;  %v3862_v17 = vpop.f32.mrb[148].mxu0  ;;  %v2719_v44 = vpop.permute.xlu1 %2718 }
 0x21f   :  { %v2767_v8 = vmax.f32 %v2751_v6, 0.0  ;;  %v2752_v55 = vadd.f32 %v2679_v25, %v2640_v22  ;;  %v3978_v63 = vpop.f32.mrb[148].mxu1  ;;  %v3863_v7 = vpop.f32.mrb[149].mxu0 }
 0x220   :  { %v3318_v1 = vpack.c.bf16 %v2769_v36, %v2769_v36  ;;  %v2770_v61 = vmax.f32 %v2754_v24, 0.0  ;;  %v2601_v53 = vadd.f32 %v3978_v63, %v2504_v40  ;;  %v2592_v33 = vpop.f32.mrb[149].mxu1  ;;  %v3864_v28 = vadd.f32 %v3863_v7, %v3862_v17  ;;  %v3865_v4 = vpop.f32.mrb[150].mxu0 }
 0x221   :  { %v3316_v56 = vpack.c.bf16 %v2767_v8, %v2767_v8  ;;  %v2768_v49 = vmax.f32 %v2752_v55, 0.0  ;;  %v2593_v20 = vadd.f32 %v2592_v33, %v2496_v42  ;;  %v3979_v32 = vpop.f32.mrb[150].mxu1  ;;  %v3866_v2 = vpop.f32.mrb[151].mxu0 }
 0x222   :  { %2850 = vst.msk [vmem:[%s5721_s3 + $0x8] sm:$0xf] %vm2847_vm1, %v3318_v1  ;;  %v3319_v41 = vpack.c.bf16 %v2770_v61, %v2770_v61  ;;  %v2645_v25 = vmax.f32 %v5509_v58, %v2601_v53  ;;  %v2604_v57 = vadd.f32 %v3979_v32, %v2507_v37  ;;  %v2595_v29 = vpop.f32.mrb[151].mxu1  ;;  %v3867_v14 = vadd.f32 %v3866_v2, %v3865_v4  ;;  %v2724_v23 = vpop.permute.xlu0 %2723 }
 0x223   :  { %2848 = vst.msk [vmem:[%s5721_s3] sm:$0xf] %vm2847_vm1, %v3316_v56  ;;  %v3317_v40 = vpack.c.bf16 %v2768_v49, %v2768_v49  ;;  %v2643_v42 = vmax.f32 %v5515_v19, %v2593_v20  ;;  %v2596_v48 = vadd.f32 %v2595_v29, %v5607_v5  ;;  %v2520_v35 = vadd.f32 %v3864_v28, %v5595_v31  ;;  %v2729_v49 = vpop.permute.xlu1 %2728 }
 0x224   :  { %2851 = vst.msk [vmem:[%s5721_s3 + $0xc] sm:$0xf] %vm2847_vm1, %v3319_v41  ;;  %v2757_v58 = vadd.f32 %v2704_v27, %v2645_v25  ;;  %v2646_v37 = vmax.f32 %v5523_v62, %v2604_v57  ;;  %v2523_v5 = vadd.f32 %v3867_v14, %v5597_v11 }
 0x225   :  { %2849 = vst.msk [vmem:[%s5721_s3 + $0x4] sm:$0xf] %vm2847_vm1, %v3317_v40  ;;  %v2755_v19 = vadd.f32 %v5609_v34, %v2643_v42  ;;  %v2644_v59 = vmax.f32 %v5528_v3, %v2596_v48 }
 0x226   :  { %v2773_v38 = vmax.f32 %v2757_v58, 0.0  ;;  %v2758_v45 = vadd.f32 %v2709_v60, %v2646_v37  ;;  %v3868_v46 = vpop.f32.mrb[152].mxu0  ;;  %v2734_v20 = vpop.permute.xlu0 %2733 }
 0x227   :  { %v2771_v27 = vmax.f32 %v2755_v19, 0.0  ;;  %v2756_v62 = vadd.f32 %v5617_v21, %v2644_v59  ;;  %v3982_v31 = vpop.f32.mrb[152].mxu1  ;;  %v3869_v22 = vpop.f32.mrb[153].mxu0 }
 0x228   :  { %v3322_v30 = vpack.c.bf16 %v2773_v38, %v2773_v38  ;;  %v2774_v15 = vmax.f32 %v2758_v45, 0.0  ;;  %v2617_v6 = vadd.f32 %v3982_v31, %v2520_v35  ;;  %v2608_v36 = vpop.f32.mrb[153].mxu1  ;;  %v3870_v8 = vadd.f32 %v3869_v22, %v3868_v46  ;;  %v3871_v55 = vpop.f32.mrb[154].mxu0 }
 0x229   :  { %v3320_v24 = vpack.c.bf16 %v2771_v27, %v2771_v27  ;;  %v2772_v34 = vmax.f32 %v2756_v62, 0.0  ;;  %v2609_v3 = vadd.f32 %v2608_v36, %v2512_v43  ;;  %v3983_v11 = vpop.f32.mrb[154].mxu1  ;;  %v3872_v63 = vpop.f32.mrb[155].mxu0 }
 0x22a   :  { %2854 = vst.msk [vmem:[%s5721_s3 + $0x18] sm:$0xf] %vm2847_vm1, %v3322_v30  ;;  %v3323_v60 = vpack.c.bf16 %v2774_v15, %v2774_v15  ;;  %v2649_v21 = vmax.f32 %v5537_v12, %v2617_v6  ;;  %v2620_v17 = vadd.f32 %v3983_v11, %v2523_v5  ;;  %v2611_v1 = vpop.f32.mrb[155].mxu1  ;;  %v3873_v53 = vadd.f32 %v3872_v63, %v3871_v55  ;;  %v2744_v30 = vpop.permute.xlu0 %2743 }
 0x22b   :  { %2852 = vst.msk [vmem:[%s5721_s3 + $0x10] sm:$0xf] %vm2847_vm1, %v3320_v24  ;;  %v3321_v61 = vpack.c.bf16 %v2772_v34, %v2772_v34  ;;  %v2647_v43 = vmax.f32 %v5543_v54, %v2609_v3  ;;  %v2612_v7 = vadd.f32 %v2611_v1, %v5627_v16  ;;  %v2528_v56 = vadd.f32 %v3870_v8, %v5601_v39 }
 0x22c   :  { %2855 = vst.msk [vmem:[%s5721_s3 + $0x1c] sm:$0xf] %vm2847_vm1, %v3323_v60  ;;  %v2761_v12 = vadd.f32 %v2724_v23, %v2649_v21  ;;  %v2650_v33 = vmax.f32 %v5551_v52, %v2620_v17  ;;  %v2531_v28 = vadd.f32 %v3873_v53, %v5603_v50  ;;  %v2739_v23 = vpop.permute.xlu1 %2738 }
 0x22d   :  { %2853 = vst.msk [vmem:[%s5721_s3 + $0x14] sm:$0xf] %vm2847_vm1, %v3321_v61  ;;  %v2759_v54 = vadd.f32 %v5629_v51, %v2647_v43  ;;  %v2648_v16 = vmax.f32 %v5556_v26, %v2612_v7 }
 0x22e   :  { %v2777_v4 = vmax.f32 %v2761_v12, 0.0  ;;  %v2762_v32 = vadd.f32 %v2729_v49, %v2650_v33  ;;  %v3874_v52 = vpop.f32.mrb[156].mxu0 }
 0x22f   :  { %v2775_v41 = vmax.f32 %v2759_v54, 0.0  ;;  %v2760_v25 = vadd.f32 %v2719_v44, %v2648_v16  ;;  %v3986_v57 = vpop.f32.mrb[156].mxu1  ;;  %v3875_v29 = vpop.f32.mrb[157].mxu0 }
 0x230   :  { %v3326_v39 = vpack.c.bf16 %v2777_v4, %v2777_v4  ;;  %v2778_v2 = vmax.f32 %v2762_v32, 0.0  ;;  %v2624_v40 = vpop.f32.mrb[157].mxu1  ;;  %v3876_v48 = vadd.f32 %v3875_v29, %v3874_v52  ;;  %v3877_v51 = vpop.f32.mrb[158].mxu0 }
 0x231   :  { %v3324_v42 = vpack.c.bf16 %v2775_v41, %v2775_v41  ;;  %v2776_v14 = vmax.f32 %v2760_v25, 0.0  ;;  %v2625_v58 = vadd.f32 %v2624_v40, %v2528_v56  ;;  %v3987_v37 = vpop.f32.mrb[158].mxu1  ;;  %v3878_v50 = vpop.f32.mrb[159].mxu0 }
 0x232   :  { %2858 = vst.msk [vmem:[%s5721_s3 + $0x28] sm:$0xf] %vm2847_vm1, %v3326_v39  ;;  %v3327_v26 = vpack.c.bf16 %v2778_v2, %v2778_v2  ;;  %v2627_v35 = vpop.f32.mrb[159].mxu1  ;;  %v2536_v59 = vadd.f32 %v3876_v48, %v5611_v0  ;;  %v3879_v44 = vadd.f32 %v3878_v50, %v3877_v51  ;;  %v2749_v24 = vpop.permute.xlu1 %2748 }
 0x233   :  { %2856 = vst.msk [vmem:[%s5721_s3 + $0x20] sm:$0xf] %vm2847_vm1, %v3324_v42  ;;  %v3325_v19 = vpack.c.bf16 %v2776_v14, %v2776_v14  ;;  %v2651_v5 = vmax.f32 %v5570_v18, %v2625_v58  ;;  %v2628_v38 = vadd.f32 %v2627_v35, %v2531_v28 }
 0x234   :  { %2859 = vst.msk [vmem:[%s5721_s3 + $0x2c] sm:$0xf] %vm2847_vm1, %v3327_v26  ;;  %v2633_v45 = vadd.f32 %v3986_v57, %v2536_v59  ;;  %v2539_v62 = vadd.f32 %v3879_v44, %v5613_v13 }
 0x235   :  { %2857 = vst.msk [vmem:[%s5721_s3 + $0x24] sm:$0xf] %vm2847_vm1, %v3325_v19  ;;  %v2763_v27 = vadd.f32 %v2734_v20, %v2651_v5  ;;  %v2652_v0 = vmax.f32 %v5583_v10, %v2628_v38 }
 0x236   :  { %v2653_v18 = vmax.f32 %v5564_v47, %v2633_v45  ;;  %v2636_v31 = vadd.f32 %v3987_v37, %v2539_v62 }
 0x237   :  { %v2779_v46 = vmax.f32 %v2763_v27, 0.0  ;;  %v2764_v15 = vadd.f32 %v2739_v23, %v2652_v0 }
 0x238   :  { %v2765_v6 = vadd.f32 %v2744_v30, %v2653_v18  ;;  %v2654_v36 = vmax.f32 %v5578_v9, %v2636_v31 }
 0x239   :  { %v3328_v22 = vpack.c.bf16 %v2779_v46, %v2779_v46  ;;  %v2780_v34 = vmax.f32 %v2764_v15, 0.0 }
 0x23a   :  { %v2781_v8 = vmax.f32 %v2765_v6, 0.0  ;;  %v2766_v13 = vadd.f32 %v2749_v24, %v2654_v36 }
 0x23b   :  { %2860 = vst.msk [vmem:[%s5721_s3 + $0x30] sm:$0xf] %vm2847_vm1, %v3328_v22  ;;  %v3329_v10 = vpack.c.bf16 %v2780_v34, %v2780_v34 }
 0x23c   :  { %v3330_v3 = vpack.c.bf16 %v2781_v8, %v2781_v8  ;;  %v2782_v47 = vmax.f32 %v2766_v13, 0.0 }
 0x23d   :  { %2861 = vst.msk [vmem:[%s5721_s3 + $0x34] sm:$0xf] %vm2847_vm1, %v3329_v10 }
 0x23e   :  { %2862 = vst.msk [vmem:[%s5721_s3 + $0x38] sm:$0xf] %vm2847_vm1, %v3330_v3  ;;  %v3331_v9 = vpack.c.bf16 %v2782_v47, %v2782_v47 }
 0x240   :  { %2863 = vst.msk [vmem:[%s5721_s3 + $0x3c] sm:$0xf] %vm2847_vm1, %v3331_v9 }

// kernel: convnet_model1_forward.9
= control target key start
LH: loop header
LB: loop body
LE: loop exit
PB: predicated region body
PF: predicated region fallthrough
CT: control target
= control target key end

     0   :  { %v482_v2 = vmov 0.0   ;;  %v74_v10 = vlaneseq  ;;  %v483_v14 = vmov 1966171168   ;;  %s618_s0 = inlined_call_operand.vmem [shape: bf16[2,256], index: 0, kind: input, shape index: {}]   ;;  %s619_s1 = inlined_call_operand.vmem [shape: bf16[256,128], index: 1, kind: input, shape index: {}]   ;;  %s620_s2 = inlined_call_operand.vmem [shape: f32[1,128], index: 2, kind: input, shape index: {}]   ;;  %s621_s3 = inlined_call_operand.vmem [shape: bf16[128,10], index: 3, kind: input, shape index: {}]   ;;  %s622_s4 = inlined_call_operand.vmem [shape: f32[1,10], index: 4, kind: input, shape index: {}]   ;;  %s623_s5 = inlined_call_operand.hbm [shape: f32[2,10], index: 5, kind: output, shape index: {}]  }
   0x1   :  { %v434_v0 = vld [vmem:[%s619_s1 + $0x40] sm:$0xff]   ;;  %410 = vmatprep.subr.bf16.mxu1 %v482_v2  ;;  %v436_v3 = vld [vmem:[%s619_s1 + $0x48] sm:$0xff]   ;;  %v438_v5 = vld [vmem:[%s619_s1 + $0x50] sm:$0xff]   ;;  %v72_v15 = vunpack.c.l.s4 %v483_v14 }
   0x2   :  { %v435_v1 = vld [vmem:[%s619_s1] sm:$0xff]   ;;  %379 = vmatprep.subr.bf16.mxu0 %v434_v0  ;;  %v437_v4 = vld [vmem:[%s619_s1 + $0x8] sm:$0xff]   ;;  %v439_v6 = vld [vmem:[%s619_s1 + $0x10] sm:$0xff]   ;;  %v75_v16 = vshrl.u32 %v74_v10, 7 }
   0x3   :  { %380 = vmatpush3.bf16.msra.mxu0 %v435_v1  ;;  %v440_v7 = vld [vmem:[%s619_s1 + $0x58] sm:$0xff]   ;;  %v442_v9 = vld [vmem:[%s619_s1 + $0x60] sm:$0xff]   ;;  %v444_v12 = vld [vmem:[%s619_s1 + $0x68] sm:$0xff]   ;;  %v73_v20 = vunpack.c.0.s8 %v72_v15 }
   0x4   :  { %381 = vmatprep.subr.bf16.mxu0 %v436_v3  ;;  %v441_v8 = vld [vmem:[%s619_s1 + $0x18] sm:$0xff]   ;;  %v443_v11 = vld [vmem:[%s619_s1 + $0x20] sm:$0xff]   ;;  %v445_v18 = vld [vmem:[%s619_s1 + $0x28] sm:$0xff]  }
   0x5   :  { %v353_v13 = vld.sshfl [vmem:[%s618_s0] sm:$0x11 pattern:$0x75316420]  ;;  %v451_v21 = vld [vmem:[%s621_s3 + $0x8] sm:$0xff]   ;;  %v446_v22 = vld [vmem:[%s619_s1 + $0x70] sm:$0xff]   ;;  %v76_v24 = vsub.s32 %v73_v20, %v75_v16 }
   0x6   :  { %v450_v17 = vld [vmem:[%s621_s3] sm:$0xff]   ;;  %v70_v19 = vcombine.high %v353_v13, %v353_v13  ;;  %v447_v23 = vld [vmem:[%s619_s1 + $0x30] sm:$0xff]   ;;  %v448_v27 = vld [vmem:[%s619_s1 + $0x78] sm:$0xff]  }
   0x7   :  { %382 = vmatpush3.bf16.msra.mxu0 %v437_v4  ;;  %411 = vmatpush3.bf16.msra.mxu1 %v450_v17  ;;  %v452_v25 = vld [vmem:[%s621_s3 + $0x10] sm:$0xff]  }
   0x8   :  { %383 = vmatprep.subr.bf16.mxu0 %v438_v5  ;;  %412 = vmatprep.subr.bf16.mxu1 %v482_v2  ;;  %v84_v26 = vrot.slane %v70_v19, %v76_v24 }
   0xb   :  { %384 = vmatpush3.bf16.msra.mxu0 %v439_v6  ;;  %413 = vmatpush3.bf16.msra.mxu1 %v451_v21 }
   0xc   :  { %385 = vmatprep.subr.bf16.mxu0 %v440_v7  ;;  %414 = vmatprep.subr.bf16.mxu1 %v482_v2 }
   0xf   :  { %386 = vmatpush3.bf16.msra.mxu0 %v441_v8 }
  0x10   :  { %387 = vmatprep.subr.bf16.mxu0 %v442_v9 }
  0x13   :  { %388 = vmatpush3.bf16.msra.mxu0 %v443_v11 }
  0x14   :  { %389 = vmatprep.subr.bf16.mxu0 %v444_v12 }
  0x17   :  { %390 = vmatpush3.bf16.msra.mxu0 %v445_v18 }
  0x18   :  { %391 = vmatprep.subr.bf16.mxu0 %v446_v22 }
  0x19   :  { %10 = vsyncpa [#allocation3], 0  ;;  %215 = vmatprep.mubr.bf16.mxu0 %v84_v26  ;;  %v449_v28 = vld [vmem:[%s619_s1 + $0x38] sm:$0xff]   ;;  %415 = vmatpush3.bf16.msra.mxu1 %v452_v25  ;;  %v77_v30 = vrot.slane %v353_v13, %v76_v24  ;;  %v454_v31 = vld [vmem:[%s621_s3 + $0x20] sm:$0xff]   ;;  %vm484_vm0 = vmmov 0   ;;  %vm336_vm1 = vcmask 74752  }
  0x1a   :  { %v453_v29 = vld [vmem:[%s621_s3 + $0x18] sm:$0xff]   ;;  %416 = vmatprep.subr.bf16.mxu1 %v482_v2  ;;  %v455_v32 = vld [vmem:[%s621_s3 + $0x28] sm:$0xff]   ;;  %v456_v33 = vld [vmem:[%s621_s3 + $0x30] sm:$0xff]   ;;  %426 = vmatprep.mubr.msk.bf16.mxu1 %vm484_vm0, %v482_v2 }
  0x1b   :  { %392 = vmatpush3.bf16.msra.mxu0 %v447_v23  ;;  %v457_v34 = vld [vmem:[%s621_s3 + $0x38] sm:$0xff]   ;;  %v352_v36 = vld [vmem:[%s620_s2] ss:$0 sm:$0xff]  ;;  %s485_s3 = smov [#allocation2]  }
  0x1c   :  { %393 = vmatprep.subr.bf16.mxu0 %v448_v27  ;;  %v370_v44 = vld [vmem:[%s622_s4] ss:$0 sm:$0xff]  ;;  %s344_s20 = sshll.u32 %s485_s3, 4  ;;  %s345_s20 = int_to_ptr.vmem [resolvable:$true] %s344_s20 }
  0x1d   :  { %417 = vmatpush3.bf16.msra.mxu1 %v453_v29  ;;  %s458_s2 = scalar_lea.vmem %s345_s20, 32  ;;  %p463_p1 = scmp.lt.s32.totalorder %s345_s20, %s345_s20 }
  0x1e   :  { %418 = vmatprep.subr.bf16.mxu1 %v482_v2  ;;  %p459_p0 = scmp.ne.s32.totalorder %s345_s20, %s458_s2  ;;  %p464_p2 = scmp.lt.s32.totalorder %s458_s2, %s458_s2 }
  0x1f   :  { %394 = vmatpush3.bf16.msra.mxu0 %v449_v28 }
  0x20   :  { %p465_p3 = por %p464_p2, %p463_p1 }
  0x21   :  { %419 = vmatpush3.bf16.msra.mxu1 %v454_v31 }
  0x22   :  { %216 = vmatmul.mubr.bf16.vlgmr.msra.gmra.mrb[0].mxu0 %v77_v30  ;;  %420 = vmatprep.subr.bf16.mxu1 %v482_v2  ;;  %p466_p4 = pnand %p465_p3, %p459_p0 }
  0x25   :  { %421 = vmatpush3.bf16.msra.mxu1 %v455_v32 }
  0x26   :  { %422 = vmatprep.subr.bf16.mxu1 %v482_v2 }
  0x29   :  { %423 = vmatpush3.bf16.msra.mxu1 %v456_v33 }
  0x2a   :  { %424 = vmatprep.subr.bf16.mxu1 %v482_v2 }
  0x2d   :  { %425 = vmatpush3.bf16.msra.mxu1 %v457_v34 }
  0xf5   :  { %v395_v35 = vpop.f32.mrb[0].mxu0 }
  0xf6   :  { %v396_v37 = vpop.f32.mrb[1].mxu0 }
  0xf7   :  { %v397_v38 = vadd.f32 %v396_v37, %v395_v35  ;;  %v398_v39 = vpop.f32.mrb[2].mxu0 }
  0xf8   :  { %v399_v40 = vpop.f32.mrb[3].mxu0 }
  0xf9   :  { %v218_v41 = vadd.f32 %v397_v38, %v352_v36 }
  0xfb   :  { %v223_v42 = vmax.f32 %v218_v41, 0.0 }
  0xfd   :  { %v224_v43 = vpack.c.bf16 %v223_v42, %v223_v42 }
  0xff   :  { %427 = vmatmul.mubr.bf16.vlgmr.msra.gmra.mrb[0].mxu1 %v224_v43 }
 0x1d2   :  { %v330_v45 = vpop.f32.mrb[0].mxu1 }
 0x1d3   :  { %v331_v46 = vadd.f32 %v370_v44, %v330_v45  ;;  %v428_v47 = vpop.f32.mrb[1].mxu1 }
 0x1d4   :  { %v333_v48 = vpop.f32.mrb[2].mxu1 }
 0x1d5   :  { %v429_v49 = vpop.f32.mrb[3].mxu1  ;;  %337 = vst.msk [vmem:[#allocation2] sm:$0x3] %vm336_vm1, %v331_v46 }
 0x1d6   :  { %469 = shalt.err (!%p466_p4)
}
 0x1d7   :  { %s470_s4 = scalar_lea.hbm %s623_s5, 32 }
 0x1d8   :  { %p471_p5 = scmp.ne.s32.totalorder %s623_s5, %s470_s4  ;;  %p474_p6 = scmp.lt.u32.totalorder %s470_s4, %s623_s5 }
 0x1da   :  { %p476_p7 = pnand %p474_p6, %p471_p5 }
 0x1dc   :  { %479 = shalt.err (!%p476_p7)
}
 0x1dd   :  { %347 = dma.vmem_to_hbm [thread:$0]  %s345_s20, 32, %s623_s5, [#allocation3]  }
 0x1de   :  { %480 = dma.done.wait [#allocation3], 32  }
 0x1df   :  { %481 = vsyncadd [#allocation3], 4294967264 }
 0x1e0   :  { %351 = vsyncpa [#allocation3], 1 }

</bundles_post_ra>
